<compile_context>
chip_gen: v7x
topology: tpu7x:2x2x1
jax: 0.10.0
libtpu: 0.0.40
codegen_flags: <defaults>
</compile_context>

<pallas_src>
import functools

import jax
import jax.numpy as jnp
import numpy as np
from jax.experimental import pallas as pl
from jax.experimental.pallas import tpu as pltpu

HP = 128                                   # per-gate lane slot (padded hidden width)
TILE_N = 3456                              # projection N tile (27 * 128), 6 grid steps
N_OUT = 6890 * 3                           # 20670 (true output width)
N_TILES = (N_OUT + TILE_N - 1) // TILE_N   # 6
N_OUT_PAD = N_TILES * TILE_N               # 20736 (weight pad only; output stays 20670)


# ----------------------------- Fused GRU-stack + projection kernel -----------------------------
def _fused_kernel(num_layers, hp, *refs):
    """Grid over projection N-tiles.

    refs = [x, (wih_t, whh_t, bih, bhh) * L, w_proj_tile, out_tile, hseq_scratch]
    The GRU recurrence runs only at grid step 0 and fills hseq_scratch (persists
    across grid steps); every step then does one lane-dense tile matmul.
    """
    x_ref = refs[0]
    wt_ref = refs[1 + 4 * num_layers]          # (hp, TILE_N) bf16 weight tile
    out_ref = refs[2 + 4 * num_layers]         # (T, TILE_N) f32 output tile
    hseq_ref = refs[3 + 4 * num_layers]        # (T, hp) f32 scratch (persistent)

    j = pl.program_id(0)

    @pl.when(j == 0)
    def _run_gru():
        T = x_ref.shape[0]
        for layer in range(num_layers):
            base = 1 + 4 * layer
            wih_t = refs[base + 0][...]        # (Din_pad, 3*hp)
            whh_t = refs[base + 1][...]        # (hp, 3*hp)
            bih = refs[base + 2][...]          # (1, 3*hp)
            bhh = refs[base + 3][...]          # (1, 3*hp)

            act = x_ref[...] if layer == 0 else hseq_ref[...]

            # Batched input-path gates for ALL timesteps (off the critical path).
            gx_all = jnp.dot(act, wih_t, preferred_element_type=jnp.float32) + bih

            h = jnp.zeros((1, hp), jnp.float32)
            for t in range(T):                 # static unroll; only h-path per step
                gx = gx_all[t:t + 1, :]
                gh = jnp.dot(h, whh_t, preferred_element_type=jnp.float32) + bhh
                # PyTorch gate order: r, z, n — each in its own 128-lane slot.
                r = jax.nn.sigmoid(gx[:, 0:hp] + gh[:, 0:hp])
                z = jax.nn.sigmoid(gx[:, hp:2 * hp] + gh[:, hp:2 * hp])
                n = jnp.tanh(gx[:, 2 * hp:3 * hp] + r * gh[:, 2 * hp:3 * hp])
                h = (1.0 - z) * n + z * h      # padded lanes stay exactly 0
                hseq_ref[t:t + 1, :] = h       # direct row write (no concat repack)

    # Per-tile projection: bf16 x bf16 on the MXU, f32 accumulation.
    h_bf = hseq_ref[...].astype(jnp.bfloat16)  # (T, hp) — tiny cast per step
    out_ref[...] = jnp.dot(h_bf, wt_ref[...], preferred_element_type=jnp.float32)


def dbs_gru_forward(pose_beta_seq, prepped):
    """pose_beta_seq: (T, input_dim) -> (T, 6890, 3)."""
    T = pose_beta_seq.shape[0]
    x = pose_beta_seq.reshape(T, -1).astype(jnp.float32)
    D = x.shape[1]

    layer_params = prepped["layers"]
    wt_bf16 = prepped["proj_w_t"]              # (HP, N_OUT_PAD) bf16
    num_layers = len(layer_params)

    args = [x]
    in_specs = [pl.BlockSpec((T, D), lambda j: (0, 0))]
    for (wih_t, whh_t, bih, bhh) in layer_params:
        for a in (wih_t, whh_t, bih, bhh):
            args.append(a)
            in_specs.append(pl.BlockSpec(a.shape, lambda j: (0, 0)))
    args.append(wt_bf16)
    in_specs.append(pl.BlockSpec((HP, TILE_N), lambda j: (0, j)))   # streamed tile

    kernel = functools.partial(_fused_kernel, num_layers, HP)
    out = pl.pallas_call(
        kernel,
        out_shape=jax.ShapeDtypeStruct((T, N_OUT), jnp.float32),    # true width: no pad slice
        grid_spec=pltpu.PrefetchScalarGridSpec(
            num_scalar_prefetch=0,
            grid=(N_TILES,),
            in_specs=in_specs,
            out_specs=pl.BlockSpec((T, TILE_N), lambda j: (0, j)),  # last block partial -> masked
            scratch_shapes=[pltpu.VMEM((T, HP), jnp.float32)],
        ),
        # "arbitrary": the hseq scratch is initialized at step 0 and reused by
        # all later steps, so the tile axis must stay on one core in order.
        compiler_params=pltpu.CompilerParams(
            dimension_semantics=("arbitrary",)),
    )(*args)
    return out.reshape(T, 6890, 3)


# ----------------------------- Param preparation (done once) -----------------------------
def prepare_params(params, input_dim, hidden_dim, num_stacks, hp=HP):
    """Pre-transpose + pad all weights into the kernel layout (one-time cost)."""
    H = hidden_dim
    layers = []
    for layer in range(num_stacks):
        wih, whh, bih, bhh = params[f"gru_l{layer}"]   # (3H, Din), (3H, H), (3H,), (3H,)
        d_in = wih.shape[1]
        d_in_pad = d_in if layer == 0 else hp          # later layers consume padded hidden
        wih_t = jnp.zeros((d_in_pad, 3 * hp), jnp.float32)
        whh_t = jnp.zeros((hp, 3 * hp), jnp.float32)
        bih_p = jnp.zeros((1, 3 * hp), jnp.float32)
        bhh_p = jnp.zeros((1, 3 * hp), jnp.float32)
        for g in range(3):                             # gate g -> lane slot [g*hp, g*hp+H)
            wih_t = wih_t.at[:d_in, g * hp:g * hp + H].set(wih[g * H:(g + 1) * H, :].T)
            whh_t = whh_t.at[:H, g * hp:g * hp + H].set(whh[g * H:(g + 1) * H, :].T)
            bih_p = bih_p.at[0, g * hp:g * hp + H].set(bih[g * H:(g + 1) * H])
            bhh_p = bhh_p.at[0, g * hp:g * hp + H].set(bhh[g * H:(g + 1) * H])
        layers.append((wih_t, whh_t, bih_p, bhh_p))

    # Projection weight: transpose, pad, store bf16 (f32 master stays host-side).
    w = params["hidden2dbs_w"]                         # (N_OUT, H) f32
    w_t = (jnp.zeros((hp, N_OUT_PAD), jnp.float32)
           .at[:H, :N_OUT].set(w.T)
           .astype(jnp.bfloat16))

    return {"layers": layers, "proj_w_t": w_t}


# ----------------------------- Pure-JAX reference -----------------------------
def _gru_layer_ref(x_seq, wih, whh, bih, bhh):
    H = whh.shape[1]
    hp = jax.lax.Precision.HIGHEST

    def step(h, x):
        gx = jnp.dot(x, wih.T, precision=hp) + bih
        gh = jnp.dot(h, whh.T, precision=hp) + bhh
        r = jax.nn.sigmoid(gx[:H] + gh[:H])
        z = jax.nn.sigmoid(gx[H:2 * H] + gh[H:2 * H])
        n = jnp.tanh(gx[2 * H:] + r * gh[2 * H:])
        h_new = (1.0 - z) * n + z * h
        return h_new, h_new

    h0 = jnp.zeros((H,), jnp.float32)
    _, ys = jax.lax.scan(step, h0, x_seq)
    return ys


def dbs_gru_forward_ref(pose_beta_seq, params, hidden_dim, num_stacks):
    T = pose_beta_seq.shape[0]
    x = pose_beta_seq.reshape(T, -1).astype(jnp.float32)
    for layer in range(num_stacks):
        wih, whh, bih, bhh = params[f"gru_l{layer}"]
        x = _gru_layer_ref(x, wih, whh, bih, bhh)
    out = jnp.dot(x, params["hidden2dbs_w"].T,
                  precision=jax.lax.Precision.HIGHEST)
    return out.reshape(T, 6890, 3)


# ----------------------------- Param init -----------------------------
def init_params(key, input_dim, hidden_dim, num_stacks):
    params = {}
    k = 1.0 / np.sqrt(hidden_dim)
    for layer in range(num_stacks):
        d_in = input_dim if layer == 0 else hidden_dim
        key, k1, k2, k3, k4 = jax.random.split(key, 5)
        params[f"gru_l{layer}"] = (
            jax.random.uniform(k1, (3 * hidden_dim, d_in), jnp.float32, -k, k),
            jax.random.uniform(k2, (3 * hidden_dim, hidden_dim), jnp.float32, -k, k),
            jax.random.uniform(k3, (3 * hidden_dim,), jnp.float32, -k, k),
            jax.random.uniform(k4, (3 * hidden_dim,), jnp.float32, -k, k),
        )
    key, kw = jax.random.split(key)
    params["hidden2dbs_w"] = jax.random.uniform(
        kw, (6890 * 3, hidden_dim), jnp.float32, -k, k)
    return params


# ----------------------------- Main -----------------------------
if __name__ == "__main__":
    T = 8            # num_frames (sequence length)
    input_dim = 16
    hidden_dim = 32
    num_stacks = 2

    key = jax.random.PRNGKey(0)
    key, kp, kx = jax.random.split(key, 3)
    params = init_params(kp, input_dim, hidden_dim, num_stacks)
    pose_beta_seq = jax.random.normal(kx, (T, input_dim), jnp.float32)

    prepped = prepare_params(params, input_dim, hidden_dim, num_stacks)

    dbs = dbs_gru_forward(pose_beta_seq, prepped)
    dbs = jax.block_until_ready(dbs)

    assert dbs.shape == (T, 6890, 3), dbs.shape

    ref = jax.block_until_ready(
        dbs_gru_forward_ref(pose_beta_seq, params, hidden_dim, num_stacks))
    np.testing.assert_allclose(np.asarray(dbs), np.asarray(ref),
                               rtol=1e-2, atol=1e-2)

    print("KERNEL_OK")
</pallas_src>

<mosaic_0001>
module attributes {stable_mosaic.version = 11 : i64} {
  func.func @_fused_kernel(%arg0: i32, %arg1: memref<8x16xf32, #tpu.memory_space<vmem>>, %arg2: memref<16x384xf32, #tpu.memory_space<vmem>>, %arg3: memref<128x384xf32, #tpu.memory_space<vmem>>, %arg4: memref<1x384xf32, #tpu.memory_space<vmem>>, %arg5: memref<1x384xf32, #tpu.memory_space<vmem>>, %arg6: memref<128x384xf32, #tpu.memory_space<vmem>>, %arg7: memref<128x384xf32, #tpu.memory_space<vmem>>, %arg8: memref<1x384xf32, #tpu.memory_space<vmem>>, %arg9: memref<1x384xf32, #tpu.memory_space<vmem>>, %arg10: memref<128x3456xbf16, #tpu.memory_space<vmem>>, %arg11: memref<8x3456xf32, #tpu.memory_space<vmem>>, %arg12: memref<8x128xf32, #tpu.memory_space<vmem>>) attributes {dimension_semantics = [#tpu.dimension_semantics<arbitrary>], iteration_bounds = array<i64: 6>, scalar_prefetch = 0 : i64, scratch_operands = 1 : i64, tpu.core_type = #tpu.core_type<tc>, window_params = [{pipeline_mode = #tpu.pipeline_mode<synchronous>, transform_indices = @transform_0, window_bounds = array<i64: 8, 16>}, {pipeline_mode = #tpu.pipeline_mode<synchronous>, transform_indices = @transform_1, window_bounds = array<i64: 16, 384>}, {pipeline_mode = #tpu.pipeline_mode<synchronous>, transform_indices = @transform_2, window_bounds = array<i64: 128, 384>}, {pipeline_mode = #tpu.pipeline_mode<synchronous>, transform_indices = @transform_3, window_bounds = array<i64: 1, 384>}, {pipeline_mode = #tpu.pipeline_mode<synchronous>, transform_indices = @transform_4, window_bounds = array<i64: 1, 384>}, {pipeline_mode = #tpu.pipeline_mode<synchronous>, transform_indices = @transform_5, window_bounds = array<i64: 128, 384>}, {pipeline_mode = #tpu.pipeline_mode<synchronous>, transform_indices = @transform_6, window_bounds = array<i64: 128, 384>}, {pipeline_mode = #tpu.pipeline_mode<synchronous>, transform_indices = @transform_7, window_bounds = array<i64: 1, 384>}, {pipeline_mode = #tpu.pipeline_mode<synchronous>, transform_indices = @transform_8, window_bounds = array<i64: 1, 384>}, {transform_indices = @transform_9, window_bounds = array<i64: 128, 3456>}, {transform_indices = @transform_10, window_bounds = array<i64: 8, 3456>}]} {
    %c0_i32 = arith.constant 0 : i32
    %0 = arith.cmpi eq, %arg0, %c0_i32 : i32
    %1 = arith.extui %0 : i1 to i32
    %c0_i32_0 = arith.constant 0 : i32
    %2 = arith.cmpi ne, %1, %c0_i32_0 : i32
    scf.if %2 {
      %c0_6 = arith.constant 0 : index
      %c0_7 = arith.constant 0 : index
      %8 = vector.load %arg2[%c0_6, %c0_7] : memref<16x384xf32, #tpu.memory_space<vmem>>, vector<16x384xf32>
      %c0_8 = arith.constant 0 : index
      %c0_9 = arith.constant 0 : index
      %9 = vector.load %arg3[%c0_8, %c0_9] : memref<128x384xf32, #tpu.memory_space<vmem>>, vector<128x384xf32>
      %c0_10 = arith.constant 0 : index
      %c0_11 = arith.constant 0 : index
      %10 = vector.load %arg4[%c0_10, %c0_11] : memref<1x384xf32, #tpu.memory_space<vmem>>, vector<1x384xf32>
      %c0_12 = arith.constant 0 : index
      %c0_13 = arith.constant 0 : index
      %11 = vector.load %arg5[%c0_12, %c0_13] : memref<1x384xf32, #tpu.memory_space<vmem>>, vector<1x384xf32>
      %c0_14 = arith.constant 0 : index
      %c0_15 = arith.constant 0 : index
      %12 = vector.load %arg1[%c0_14, %c0_15] : memref<8x16xf32, #tpu.memory_space<vmem>>, vector<8x16xf32>
      %cst_16 = arith.constant dense<0.000000e+00> : vector<8x384xf32>
      %13 = tpu.matmul %12, %8, %cst_16 {dimension_numbers = #tpu.dot_dimension_numbers<[1], [0], [0], [1], [0, 0, 1, 1], [], []>} : vector<8x16xf32>, vector<16x384xf32>, vector<8x384xf32> -> vector<8x384xf32>
      %14 = vector.broadcast %10 : vector<1x384xf32> to vector<8x384xf32>
      %15 = arith.addf %13, %14 : vector<8x384xf32>
      %cst_17 = arith.constant 0.000000e+00 : f32
      %16 = vector.broadcast %cst_17 : f32 to vector<1x128xf32>
      %17 = vector.extract_strided_slice %15 {offsets = [0, 0], sizes = [1, 384], strides = [1, 1]} : vector<8x384xf32> to vector<1x384xf32>
      %cst_18 = arith.constant dense<0.000000e+00> : vector<1x384xf32>
      %18 = tpu.matmul %16, %9, %cst_18 {dimension_numbers = #tpu.dot_dimension_numbers<[1], [0], [0], [1], [0, 0, 1, 1], [], []>} : vector<1x128xf32>, vector<128x384xf32>, vector<1x384xf32> -> vector<1x384xf32>
      %19 = arith.addf %18, %11 : vector<1x384xf32>
      %20 = vector.extract_strided_slice %17 {offsets = [0, 0], sizes = [1, 128], strides = [1, 1]} : vector<1x384xf32> to vector<1x128xf32>
      %21 = vector.extract_strided_slice %19 {offsets = [0, 0], sizes = [1, 128], strides = [1, 1]} : vector<1x384xf32> to vector<1x128xf32>
      %22 = arith.addf %20, %21 : vector<1x128xf32>
      %23 = arith.negf %22 : vector<1x128xf32>
      %24 = math.exp %23 : vector<1x128xf32>
      %cst_19 = arith.constant 1.000000e+00 : f32
      %25 = vector.broadcast %cst_19 : f32 to vector<1x128xf32>
      %26 = arith.addf %25, %24 : vector<1x128xf32>
      %27 = arith.divf %25, %26 : vector<1x128xf32>
      %28 = vector.extract_strided_slice %17 {offsets = [0, 128], sizes = [1, 128], strides = [1, 1]} : vector<1x384xf32> to vector<1x128xf32>
      %29 = vector.extract_strided_slice %19 {offsets = [0, 128], sizes = [1, 128], strides = [1, 1]} : vector<1x384xf32> to vector<1x128xf32>
      %30 = arith.addf %28, %29 : vector<1x128xf32>
      %31 = arith.negf %30 : vector<1x128xf32>
      %32 = math.exp %31 : vector<1x128xf32>
      %cst_20 = arith.constant 1.000000e+00 : f32
      %33 = vector.broadcast %cst_20 : f32 to vector<1x128xf32>
      %34 = arith.addf %33, %32 : vector<1x128xf32>
      %35 = arith.divf %33, %34 : vector<1x128xf32>
      %36 = vector.extract_strided_slice %17 {offsets = [0, 256], sizes = [1, 128], strides = [1, 1]} : vector<1x384xf32> to vector<1x128xf32>
      %37 = vector.extract_strided_slice %19 {offsets = [0, 256], sizes = [1, 128], strides = [1, 1]} : vector<1x384xf32> to vector<1x128xf32>
      %38 = arith.mulf %27, %37 : vector<1x128xf32>
      %39 = arith.addf %36, %38 : vector<1x128xf32>
      %40 = math.tanh %39 : vector<1x128xf32>
      %cst_21 = arith.constant 1.000000e+00 : f32
      %41 = vector.broadcast %cst_21 : f32 to vector<1x128xf32>
      %42 = arith.subf %41, %35 : vector<1x128xf32>
      %43 = arith.mulf %42, %40 : vector<1x128xf32>
      %44 = arith.mulf %35, %16 : vector<1x128xf32>
      %45 = arith.addf %43, %44 : vector<1x128xf32>
      %c0_22 = arith.constant 0 : index
      %c0_23 = arith.constant 0 : index
      %46 = vector.load %arg12[%c0_22, %c0_23] : memref<8x128xf32, #tpu.memory_space<vmem>>, vector<1x128xf32>
      tpu.vector_store %arg12[%c0_22, %c0_23], %45 {strides = array<i32>} : memref<8x128xf32, #tpu.memory_space<vmem>>, vector<1x128xf32>,
      %47 = vector.extract_strided_slice %15 {offsets = [1, 0], sizes = [1, 384], strides = [1, 1]} : vector<8x384xf32> to vector<1x384xf32>
      %cst_24 = arith.constant dense<0.000000e+00> : vector<1x384xf32>
      %48 = tpu.matmul %45, %9, %cst_24 {dimension_numbers = #tpu.dot_dimension_numbers<[1], [0], [0], [1], [0, 0, 1, 1], [], []>} : vector<1x128xf32>, vector<128x384xf32>, vector<1x384xf32> -> vector<1x384xf32>
      %49 = arith.addf %48, %11 : vector<1x384xf32>
      %50 = vector.extract_strided_slice %47 {offsets = [0, 0], sizes = [1, 128], strides = [1, 1]} : vector<1x384xf32> to vector<1x128xf32>
      %51 = vector.extract_strided_slice %49 {offsets = [0, 0], sizes = [1, 128], strides = [1, 1]} : vector<1x384xf32> to vector<1x128xf32>
      %52 = arith.addf %50, %51 : vector<1x128xf32>
      %53 = arith.negf %52 : vector<1x128xf32>
      %54 = math.exp %53 : vector<1x128xf32>
      %cst_25 = arith.constant 1.000000e+00 : f32
      %55 = vector.broadcast %cst_25 : f32 to vector<1x128xf32>
      %56 = arith.addf %55, %54 : vector<1x128xf32>
      %57 = arith.divf %55, %56 : vector<1x128xf32>
      %58 = vector.extract_strided_slice %47 {offsets = [0, 128], sizes = [1, 128], strides = [1, 1]} : vector<1x384xf32> to vector<1x128xf32>
      %59 = vector.extract_strided_slice %49 {offsets = [0, 128], sizes = [1, 128], strides = [1, 1]} : vector<1x384xf32> to vector<1x128xf32>
      %60 = arith.addf %58, %59 : vector<1x128xf32>
      %61 = arith.negf %60 : vector<1x128xf32>
      %62 = math.exp %61 : vector<1x128xf32>
      %cst_26 = arith.constant 1.000000e+00 : f32
      %63 = vector.broadcast %cst_26 : f32 to vector<1x128xf32>
      %64 = arith.addf %63, %62 : vector<1x128xf32>
      %65 = arith.divf %63, %64 : vector<1x128xf32>
      %66 = vector.extract_strided_slice %47 {offsets = [0, 256], sizes = [1, 128], strides = [1, 1]} : vector<1x384xf32> to vector<1x128xf32>
      %67 = vector.extract_strided_slice %49 {offsets = [0, 256], sizes = [1, 128], strides = [1, 1]} : vector<1x384xf32> to vector<1x128xf32>
      %68 = arith.mulf %57, %67 : vector<1x128xf32>
      %69 = arith.addf %66, %68 : vector<1x128xf32>
      %70 = math.tanh %69 : vector<1x128xf32>
      %cst_27 = arith.constant 1.000000e+00 : f32
      %71 = vector.broadcast %cst_27 : f32 to vector<1x128xf32>
      %72 = arith.subf %71, %65 : vector<1x128xf32>
      %73 = arith.mulf %72, %70 : vector<1x128xf32>
      %74 = arith.mulf %65, %45 : vector<1x128xf32>
      %75 = arith.addf %73, %74 : vector<1x128xf32>
      %c1 = arith.constant 1 : index
      %c0_28 = arith.constant 0 : index
      %76 = vector.load %arg12[%c1, %c0_28] : memref<8x128xf32, #tpu.memory_space<vmem>>, vector<1x128xf32>
      tpu.vector_store %arg12[%c1, %c0_28], %75 {strides = array<i32>} : memref<8x128xf32, #tpu.memory_space<vmem>>, vector<1x128xf32>,
      %77 = vector.extract_strided_slice %15 {offsets = [2, 0], sizes = [1, 384], strides = [1, 1]} : vector<8x384xf32> to vector<1x384xf32>
      %cst_29 = arith.constant dense<0.000000e+00> : vector<1x384xf32>
      %78 = tpu.matmul %75, %9, %cst_29 {dimension_numbers = #tpu.dot_dimension_numbers<[1], [0], [0], [1], [0, 0, 1, 1], [], []>} : vector<1x128xf32>, vector<128x384xf32>, vector<1x384xf32> -> vector<1x384xf32>
      %79 = arith.addf %78, %11 : vector<1x384xf32>
      %80 = vector.extract_strided_slice %77 {offsets = [0, 0], sizes = [1, 128], strides = [1, 1]} : vector<1x384xf32> to vector<1x128xf32>
      %81 = vector.extract_strided_slice %79 {offsets = [0, 0], sizes = [1, 128], strides = [1, 1]} : vector<1x384xf32> to vector<1x128xf32>
      %82 = arith.addf %80, %81 : vector<1x128xf32>
      %83 = arith.negf %82 : vector<1x128xf32>
      %84 = math.exp %83 : vector<1x128xf32>
      %cst_30 = arith.constant 1.000000e+00 : f32
      %85 = vector.broadcast %cst_30 : f32 to vector<1x128xf32>
      %86 = arith.addf %85, %84 : vector<1x128xf32>
      %87 = arith.divf %85, %86 : vector<1x128xf32>
      %88 = vector.extract_strided_slice %77 {offsets = [0, 128], sizes = [1, 128], strides = [1, 1]} : vector<1x384xf32> to vector<1x128xf32>
      %89 = vector.extract_strided_slice %79 {offsets = [0, 128], sizes = [1, 128], strides = [1, 1]} : vector<1x384xf32> to vector<1x128xf32>
      %90 = arith.addf %88, %89 : vector<1x128xf32>
      %91 = arith.negf %90 : vector<1x128xf32>
      %92 = math.exp %91 : vector<1x128xf32>
      %cst_31 = arith.constant 1.000000e+00 : f32
      %93 = vector.broadcast %cst_31 : f32 to vector<1x128xf32>
      %94 = arith.addf %93, %92 : vector<1x128xf32>
      %95 = arith.divf %93, %94 : vector<1x128xf32>
      %96 = vector.extract_strided_slice %77 {offsets = [0, 256], sizes = [1, 128], strides = [1, 1]} : vector<1x384xf32> to vector<1x128xf32>
      %97 = vector.extract_strided_slice %79 {offsets = [0, 256], sizes = [1, 128], strides = [1, 1]} : vector<1x384xf32> to vector<1x128xf32>
      %98 = arith.mulf %87, %97 : vector<1x128xf32>
      %99 = arith.addf %96, %98 : vector<1x128xf32>
      %100 = math.tanh %99 : vector<1x128xf32>
      %cst_32 = arith.constant 1.000000e+00 : f32
      %101 = vector.broadcast %cst_32 : f32 to vector<1x128xf32>
      %102 = arith.subf %101, %95 : vector<1x128xf32>
      %103 = arith.mulf %102, %100 : vector<1x128xf32>
      %104 = arith.mulf %95, %75 : vector<1x128xf32>
      %105 = arith.addf %103, %104 : vector<1x128xf32>
      %c2 = arith.constant 2 : index
      %c0_33 = arith.constant 0 : index
      %106 = vector.load %arg12[%c2, %c0_33] : memref<8x128xf32, #tpu.memory_space<vmem>>, vector<1x128xf32>
      tpu.vector_store %arg12[%c2, %c0_33], %105 {strides = array<i32>} : memref<8x128xf32, #tpu.memory_space<vmem>>, vector<1x128xf32>,
      %107 = vector.extract_strided_slice %15 {offsets = [3, 0], sizes = [1, 384], strides = [1, 1]} : vector<8x384xf32> to vector<1x384xf32>
      %cst_34 = arith.constant dense<0.000000e+00> : vector<1x384xf32>
      %108 = tpu.matmul %105, %9, %cst_34 {dimension_numbers = #tpu.dot_dimension_numbers<[1], [0], [0], [1], [0, 0, 1, 1], [], []>} : vector<1x128xf32>, vector<128x384xf32>, vector<1x384xf32> -> vector<1x384xf32>
      %109 = arith.addf %108, %11 : vector<1x384xf32>
      %110 = vector.extract_strided_slice %107 {offsets = [0, 0], sizes = [1, 128], strides = [1, 1]} : vector<1x384xf32> to vector<1x128xf32>
      %111 = vector.extract_strided_slice %109 {offsets = [0, 0], sizes = [1, 128], strides = [1, 1]} : vector<1x384xf32> to vector<1x128xf32>
      %112 = arith.addf %110, %111 : vector<1x128xf32>
      %113 = arith.negf %112 : vector<1x128xf32>
      %114 = math.exp %113 : vector<1x128xf32>
      %cst_35 = arith.constant 1.000000e+00 : f32
      %115 = vector.broadcast %cst_35 : f32 to vector<1x128xf32>
      %116 = arith.addf %115, %114 : vector<1x128xf32>
      %117 = arith.divf %115, %116 : vector<1x128xf32>
      %118 = vector.extract_strided_slice %107 {offsets = [0, 128], sizes = [1, 128], strides = [1, 1]} : vector<1x384xf32> to vector<1x128xf32>
      %119 = vector.extract_strided_slice %109 {offsets = [0, 128], sizes = [1, 128], strides = [1, 1]} : vector<1x384xf32> to vector<1x128xf32>
      %120 = arith.addf %118, %119 : vector<1x128xf32>
      %121 = arith.negf %120 : vector<1x128xf32>
      %122 = math.exp %121 : vector<1x128xf32>
      %cst_36 = arith.constant 1.000000e+00 : f32
      %123 = vector.broadcast %cst_36 : f32 to vector<1x128xf32>
      %124 = arith.addf %123, %122 : vector<1x128xf32>
      %125 = arith.divf %123, %124 : vector<1x128xf32>
      %126 = vector.extract_strided_slice %107 {offsets = [0, 256], sizes = [1, 128], strides = [1, 1]} : vector<1x384xf32> to vector<1x128xf32>
      %127 = vector.extract_strided_slice %109 {offsets = [0, 256], sizes = [1, 128], strides = [1, 1]} : vector<1x384xf32> to vector<1x128xf32>
      %128 = arith.mulf %117, %127 : vector<1x128xf32>
      %129 = arith.addf %126, %128 : vector<1x128xf32>
      %130 = math.tanh %129 : vector<1x128xf32>
      %cst_37 = arith.constant 1.000000e+00 : f32
      %131 = vector.broadcast %cst_37 : f32 to vector<1x128xf32>
      %132 = arith.subf %131, %125 : vector<1x128xf32>
      %133 = arith.mulf %132, %130 : vector<1x128xf32>
      %134 = arith.mulf %125, %105 : vector<1x128xf32>
      %135 = arith.addf %133, %134 : vector<1x128xf32>
      %c3 = arith.constant 3 : index
      %c0_38 = arith.constant 0 : index
      %136 = vector.load %arg12[%c3, %c0_38] : memref<8x128xf32, #tpu.memory_space<vmem>>, vector<1x128xf32>
      tpu.vector_store %arg12[%c3, %c0_38], %135 {strides = array<i32>} : memref<8x128xf32, #tpu.memory_space<vmem>>, vector<1x128xf32>,
      %137 = vector.extract_strided_slice %15 {offsets = [4, 0], sizes = [1, 384], strides = [1, 1]} : vector<8x384xf32> to vector<1x384xf32>
      %cst_39 = arith.constant dense<0.000000e+00> : vector<1x384xf32>
      %138 = tpu.matmul %135, %9, %cst_39 {dimension_numbers = #tpu.dot_dimension_numbers<[1], [0], [0], [1], [0, 0, 1, 1], [], []>} : vector<1x128xf32>, vector<128x384xf32>, vector<1x384xf32> -> vector<1x384xf32>
      %139 = arith.addf %138, %11 : vector<1x384xf32>
      %140 = vector.extract_strided_slice %137 {offsets = [0, 0], sizes = [1, 128], strides = [1, 1]} : vector<1x384xf32> to vector<1x128xf32>
      %141 = vector.extract_strided_slice %139 {offsets = [0, 0], sizes = [1, 128], strides = [1, 1]} : vector<1x384xf32> to vector<1x128xf32>
      %142 = arith.addf %140, %141 : vector<1x128xf32>
      %143 = arith.negf %142 : vector<1x128xf32>
      %144 = math.exp %143 : vector<1x128xf32>
      %cst_40 = arith.constant 1.000000e+00 : f32
      %145 = vector.broadcast %cst_40 : f32 to vector<1x128xf32>
      %146 = arith.addf %145, %144 : vector<1x128xf32>
      %147 = arith.divf %145, %146 : vector<1x128xf32>
      %148 = vector.extract_strided_slice %137 {offsets = [0, 128], sizes = [1, 128], strides = [1, 1]} : vector<1x384xf32> to vector<1x128xf32>
      %149 = vector.extract_strided_slice %139 {offsets = [0, 128], sizes = [1, 128], strides = [1, 1]} : vector<1x384xf32> to vector<1x128xf32>
      %150 = arith.addf %148, %149 : vector<1x128xf32>
      %151 = arith.negf %150 : vector<1x128xf32>
      %152 = math.exp %151 : vector<1x128xf32>
      %cst_41 = arith.constant 1.000000e+00 : f32
      %153 = vector.broadcast %cst_41 : f32 to vector<1x128xf32>
      %154 = arith.addf %153, %152 : vector<1x128xf32>
      %155 = arith.divf %153, %154 : vector<1x128xf32>
      %156 = vector.extract_strided_slice %137 {offsets = [0, 256], sizes = [1, 128], strides = [1, 1]} : vector<1x384xf32> to vector<1x128xf32>
      %157 = vector.extract_strided_slice %139 {offsets = [0, 256], sizes = [1, 128], strides = [1, 1]} : vector<1x384xf32> to vector<1x128xf32>
      %158 = arith.mulf %147, %157 : vector<1x128xf32>
      %159 = arith.addf %156, %158 : vector<1x128xf32>
      %160 = math.tanh %159 : vector<1x128xf32>
      %cst_42 = arith.constant 1.000000e+00 : f32
      %161 = vector.broadcast %cst_42 : f32 to vector<1x128xf32>
      %162 = arith.subf %161, %155 : vector<1x128xf32>
      %163 = arith.mulf %162, %160 : vector<1x128xf32>
      %164 = arith.mulf %155, %135 : vector<1x128xf32>
      %165 = arith.addf %163, %164 : vector<1x128xf32>
      %c4 = arith.constant 4 : index
      %c0_43 = arith.constant 0 : index
      %166 = vector.load %arg12[%c4, %c0_43] : memref<8x128xf32, #tpu.memory_space<vmem>>, vector<1x128xf32>
      tpu.vector_store %arg12[%c4, %c0_43], %165 {strides = array<i32>} : memref<8x128xf32, #tpu.memory_space<vmem>>, vector<1x128xf32>,
      %167 = vector.extract_strided_slice %15 {offsets = [5, 0], sizes = [1, 384], strides = [1, 1]} : vector<8x384xf32> to vector<1x384xf32>
      %cst_44 = arith.constant dense<0.000000e+00> : vector<1x384xf32>
      %168 = tpu.matmul %165, %9, %cst_44 {dimension_numbers = #tpu.dot_dimension_numbers<[1], [0], [0], [1], [0, 0, 1, 1], [], []>} : vector<1x128xf32>, vector<128x384xf32>, vector<1x384xf32> -> vector<1x384xf32>
      %169 = arith.addf %168, %11 : vector<1x384xf32>
      %170 = vector.extract_strided_slice %167 {offsets = [0, 0], sizes = [1, 128], strides = [1, 1]} : vector<1x384xf32> to vector<1x128xf32>
      %171 = vector.extract_strided_slice %169 {offsets = [0, 0], sizes = [1, 128], strides = [1, 1]} : vector<1x384xf32> to vector<1x128xf32>
      %172 = arith.addf %170, %171 : vector<1x128xf32>
      %173 = arith.negf %172 : vector<1x128xf32>
      %174 = math.exp %173 : vector<1x128xf32>
      %cst_45 = arith.constant 1.000000e+00 : f32
      %175 = vector.broadcast %cst_45 : f32 to vector<1x128xf32>
      %176 = arith.addf %175, %174 : vector<1x128xf32>
      %177 = arith.divf %175, %176 : vector<1x128xf32>
      %178 = vector.extract_strided_slice %167 {offsets = [0, 128], sizes = [1, 128], strides = [1, 1]} : vector<1x384xf32> to vector<1x128xf32>
      %179 = vector.extract_strided_slice %169 {offsets = [0, 128], sizes = [1, 128], strides = [1, 1]} : vector<1x384xf32> to vector<1x128xf32>
      %180 = arith.addf %178, %179 : vector<1x128xf32>
      %181 = arith.negf %180 : vector<1x128xf32>
      %182 = math.exp %181 : vector<1x128xf32>
      %cst_46 = arith.constant 1.000000e+00 : f32
      %183 = vector.broadcast %cst_46 : f32 to vector<1x128xf32>
      %184 = arith.addf %183, %182 : vector<1x128xf32>
      %185 = arith.divf %183, %184 : vector<1x128xf32>
      %186 = vector.extract_strided_slice %167 {offsets = [0, 256], sizes = [1, 128], strides = [1, 1]} : vector<1x384xf32> to vector<1x128xf32>
      %187 = vector.extract_strided_slice %169 {offsets = [0, 256], sizes = [1, 128], strides = [1, 1]} : vector<1x384xf32> to vector<1x128xf32>
      %188 = arith.mulf %177, %187 : vector<1x128xf32>
      %189 = arith.addf %186, %188 : vector<1x128xf32>
      %190 = math.tanh %189 : vector<1x128xf32>
      %cst_47 = arith.constant 1.000000e+00 : f32
      %191 = vector.broadcast %cst_47 : f32 to vector<1x128xf32>
      %192 = arith.subf %191, %185 : vector<1x128xf32>
      %193 = arith.mulf %192, %190 : vector<1x128xf32>
      %194 = arith.mulf %185, %165 : vector<1x128xf32>
      %195 = arith.addf %193, %194 : vector<1x128xf32>
      %c5 = arith.constant 5 : index
      %c0_48 = arith.constant 0 : index
      %196 = vector.load %arg12[%c5, %c0_48] : memref<8x128xf32, #tpu.memory_space<vmem>>, vector<1x128xf32>
      tpu.vector_store %arg12[%c5, %c0_48], %195 {strides = array<i32>} : memref<8x128xf32, #tpu.memory_space<vmem>>, vector<1x128xf32>,
      %197 = vector.extract_strided_slice %15 {offsets = [6, 0], sizes = [1, 384], strides = [1, 1]} : vector<8x384xf32> to vector<1x384xf32>
      %cst_49 = arith.constant dense<0.000000e+00> : vector<1x384xf32>
      %198 = tpu.matmul %195, %9, %cst_49 {dimension_numbers = #tpu.dot_dimension_numbers<[1], [0], [0], [1], [0, 0, 1, 1], [], []>} : vector<1x128xf32>, vector<128x384xf32>, vector<1x384xf32> -> vector<1x384xf32>
      %199 = arith.addf %198, %11 : vector<1x384xf32>
      %200 = vector.extract_strided_slice %197 {offsets = [0, 0], sizes = [1, 128], strides = [1, 1]} : vector<1x384xf32> to vector<1x128xf32>
      %201 = vector.extract_strided_slice %199 {offsets = [0, 0], sizes = [1, 128], strides = [1, 1]} : vector<1x384xf32> to vector<1x128xf32>
      %202 = arith.addf %200, %201 : vector<1x128xf32>
      %203 = arith.negf %202 : vector<1x128xf32>
      %204 = math.exp %203 : vector<1x128xf32>
      %cst_50 = arith.constant 1.000000e+00 : f32
      %205 = vector.broadcast %cst_50 : f32 to vector<1x128xf32>
      %206 = arith.addf %205, %204 : vector<1x128xf32>
      %207 = arith.divf %205, %206 : vector<1x128xf32>
      %208 = vector.extract_strided_slice %197 {offsets = [0, 128], sizes = [1, 128], strides = [1, 1]} : vector<1x384xf32> to vector<1x128xf32>
      %209 = vector.extract_strided_slice %199 {offsets = [0, 128], sizes = [1, 128], strides = [1, 1]} : vector<1x384xf32> to vector<1x128xf32>
      %210 = arith.addf %208, %209 : vector<1x128xf32>
      %211 = arith.negf %210 : vector<1x128xf32>
      %212 = math.exp %211 : vector<1x128xf32>
      %cst_51 = arith.constant 1.000000e+00 : f32
      %213 = vector.broadcast %cst_51 : f32 to vector<1x128xf32>
      %214 = arith.addf %213, %212 : vector<1x128xf32>
      %215 = arith.divf %213, %214 : vector<1x128xf32>
      %216 = vector.extract_strided_slice %197 {offsets = [0, 256], sizes = [1, 128], strides = [1, 1]} : vector<1x384xf32> to vector<1x128xf32>
      %217 = vector.extract_strided_slice %199 {offsets = [0, 256], sizes = [1, 128], strides = [1, 1]} : vector<1x384xf32> to vector<1x128xf32>
      %218 = arith.mulf %207, %217 : vector<1x128xf32>
      %219 = arith.addf %216, %218 : vector<1x128xf32>
      %220 = math.tanh %219 : vector<1x128xf32>
      %cst_52 = arith.constant 1.000000e+00 : f32
      %221 = vector.broadcast %cst_52 : f32 to vector<1x128xf32>
      %222 = arith.subf %221, %215 : vector<1x128xf32>
      %223 = arith.mulf %222, %220 : vector<1x128xf32>
      %224 = arith.mulf %215, %195 : vector<1x128xf32>
      %225 = arith.addf %223, %224 : vector<1x128xf32>
      %c6 = arith.constant 6 : index
      %c0_53 = arith.constant 0 : index
      %226 = vector.load %arg12[%c6, %c0_53] : memref<8x128xf32, #tpu.memory_space<vmem>>, vector<1x128xf32>
      tpu.vector_store %arg12[%c6, %c0_53], %225 {strides = array<i32>} : memref<8x128xf32, #tpu.memory_space<vmem>>, vector<1x128xf32>,
      %227 = vector.extract_strided_slice %15 {offsets = [7, 0], sizes = [1, 384], strides = [1, 1]} : vector<8x384xf32> to vector<1x384xf32>
      %cst_54 = arith.constant dense<0.000000e+00> : vector<1x384xf32>
      %228 = tpu.matmul %225, %9, %cst_54 {dimension_numbers = #tpu.dot_dimension_numbers<[1], [0], [0], [1], [0, 0, 1, 1], [], []>} : vector<1x128xf32>, vector<128x384xf32>, vector<1x384xf32> -> vector<1x384xf32>
      %229 = arith.addf %228, %11 : vector<1x384xf32>
      %230 = vector.extract_strided_slice %227 {offsets = [0, 0], sizes = [1, 128], strides = [1, 1]} : vector<1x384xf32> to vector<1x128xf32>
      %231 = vector.extract_strided_slice %229 {offsets = [0, 0], sizes = [1, 128], strides = [1, 1]} : vector<1x384xf32> to vector<1x128xf32>
      %232 = arith.addf %230, %231 : vector<1x128xf32>
      %233 = arith.negf %232 : vector<1x128xf32>
      %234 = math.exp %233 : vector<1x128xf32>
      %cst_55 = arith.constant 1.000000e+00 : f32
      %235 = vector.broadcast %cst_55 : f32 to vector<1x128xf32>
      %236 = arith.addf %235, %234 : vector<1x128xf32>
      %237 = arith.divf %235, %236 : vector<1x128xf32>
      %238 = vector.extract_strided_slice %227 {offsets = [0, 128], sizes = [1, 128], strides = [1, 1]} : vector<1x384xf32> to vector<1x128xf32>
      %239 = vector.extract_strided_slice %229 {offsets = [0, 128], sizes = [1, 128], strides = [1, 1]} : vector<1x384xf32> to vector<1x128xf32>
      %240 = arith.addf %238, %239 : vector<1x128xf32>
      %241 = arith.negf %240 : vector<1x128xf32>
      %242 = math.exp %241 : vector<1x128xf32>
      %cst_56 = arith.constant 1.000000e+00 : f32
      %243 = vector.broadcast %cst_56 : f32 to vector<1x128xf32>
      %244 = arith.addf %243, %242 : vector<1x128xf32>
      %245 = arith.divf %243, %244 : vector<1x128xf32>
      %246 = vector.extract_strided_slice %227 {offsets = [0, 256], sizes = [1, 128], strides = [1, 1]} : vector<1x384xf32> to vector<1x128xf32>
      %247 = vector.extract_strided_slice %229 {offsets = [0, 256], sizes = [1, 128], strides = [1, 1]} : vector<1x384xf32> to vector<1x128xf32>
      %248 = arith.mulf %237, %247 : vector<1x128xf32>
      %249 = arith.addf %246, %248 : vector<1x128xf32>
      %250 = math.tanh %249 : vector<1x128xf32>
      %cst_57 = arith.constant 1.000000e+00 : f32
      %251 = vector.broadcast %cst_57 : f32 to vector<1x128xf32>
      %252 = arith.subf %251, %245 : vector<1x128xf32>
      %253 = arith.mulf %252, %250 : vector<1x128xf32>
      %254 = arith.mulf %245, %225 : vector<1x128xf32>
      %255 = arith.addf %253, %254 : vector<1x128xf32>
      %c7 = arith.constant 7 : index
      %c0_58 = arith.constant 0 : index
      %256 = vector.load %arg12[%c7, %c0_58] : memref<8x128xf32, #tpu.memory_space<vmem>>, vector<1x128xf32>
      tpu.vector_store %arg12[%c7, %c0_58], %255 {strides = array<i32>} : memref<8x128xf32, #tpu.memory_space<vmem>>, vector<1x128xf32>,
      %c0_59 = arith.constant 0 : index
      %c0_60 = arith.constant 0 : index
      %257 = vector.load %arg6[%c0_59, %c0_60] : memref<128x384xf32, #tpu.memory_space<vmem>>, vector<128x384xf32>
      %c0_61 = arith.constant 0 : index
      %c0_62 = arith.constant 0 : index
      %258 = vector.load %arg7[%c0_61, %c0_62] : memref<128x384xf32, #tpu.memory_space<vmem>>, vector<128x384xf32>
      %c0_63 = arith.constant 0 : index
      %c0_64 = arith.constant 0 : index
      %259 = vector.load %arg8[%c0_63, %c0_64] : memref<1x384xf32, #tpu.memory_space<vmem>>, vector<1x384xf32>
      %c0_65 = arith.constant 0 : index
      %c0_66 = arith.constant 0 : index
      %260 = vector.load %arg9[%c0_65, %c0_66] : memref<1x384xf32, #tpu.memory_space<vmem>>, vector<1x384xf32>
      %c0_67 = arith.constant 0 : index
      %c0_68 = arith.constant 0 : index
      %261 = vector.load %arg12[%c0_67, %c0_68] : memref<8x128xf32, #tpu.memory_space<vmem>>, vector<8x128xf32>
      %cst_69 = arith.constant dense<0.000000e+00> : vector<8x384xf32>
      %262 = tpu.matmul %261, %257, %cst_69 {dimension_numbers = #tpu.dot_dimension_numbers<[1], [0], [0], [1], [0, 0, 1, 1], [], []>} : vector<8x128xf32>, vector<128x384xf32>, vector<8x384xf32> -> vector<8x384xf32>
      %263 = vector.broadcast %259 : vector<1x384xf32> to vector<8x384xf32>
      %264 = arith.addf %262, %263 : vector<8x384xf32>
      %cst_70 = arith.constant 0.000000e+00 : f32
      %265 = vector.broadcast %cst_70 : f32 to vector<1x128xf32>
      %266 = vector.extract_strided_slice %264 {offsets = [0, 0], sizes = [1, 384], strides = [1, 1]} : vector<8x384xf32> to vector<1x384xf32>
      %cst_71 = arith.constant dense<0.000000e+00> : vector<1x384xf32>
      %267 = tpu.matmul %265, %258, %cst_71 {dimension_numbers = #tpu.dot_dimension_numbers<[1], [0], [0], [1], [0, 0, 1, 1], [], []>} : vector<1x128xf32>, vector<128x384xf32>, vector<1x384xf32> -> vector<1x384xf32>
      %268 = arith.addf %267, %260 : vector<1x384xf32>
      %269 = vector.extract_strided_slice %266 {offsets = [0, 0], sizes = [1, 128], strides = [1, 1]} : vector<1x384xf32> to vector<1x128xf32>
      %270 = vector.extract_strided_slice %268 {offsets = [0, 0], sizes = [1, 128], strides = [1, 1]} : vector<1x384xf32> to vector<1x128xf32>
      %271 = arith.addf %269, %270 : vector<1x128xf32>
      %272 = arith.negf %271 : vector<1x128xf32>
      %273 = math.exp %272 : vector<1x128xf32>
      %cst_72 = arith.constant 1.000000e+00 : f32
      %274 = vector.broadcast %cst_72 : f32 to vector<1x128xf32>
      %275 = arith.addf %274, %273 : vector<1x128xf32>
      %276 = arith.divf %274, %275 : vector<1x128xf32>
      %277 = vector.extract_strided_slice %266 {offsets = [0, 128], sizes = [1, 128], strides = [1, 1]} : vector<1x384xf32> to vector<1x128xf32>
      %278 = vector.extract_strided_slice %268 {offsets = [0, 128], sizes = [1, 128], strides = [1, 1]} : vector<1x384xf32> to vector<1x128xf32>
      %279 = arith.addf %277, %278 : vector<1x128xf32>
      %280 = arith.negf %279 : vector<1x128xf32>
      %281 = math.exp %280 : vector<1x128xf32>
      %cst_73 = arith.constant 1.000000e+00 : f32
      %282 = vector.broadcast %cst_73 : f32 to vector<1x128xf32>
      %283 = arith.addf %282, %281 : vector<1x128xf32>
      %284 = arith.divf %282, %283 : vector<1x128xf32>
      %285 = vector.extract_strided_slice %266 {offsets = [0, 256], sizes = [1, 128], strides = [1, 1]} : vector<1x384xf32> to vector<1x128xf32>
      %286 = vector.extract_strided_slice %268 {offsets = [0, 256], sizes = [1, 128], strides = [1, 1]} : vector<1x384xf32> to vector<1x128xf32>
      %287 = arith.mulf %276, %286 : vector<1x128xf32>
      %288 = arith.addf %285, %287 : vector<1x128xf32>
      %289 = math.tanh %288 : vector<1x128xf32>
      %cst_74 = arith.constant 1.000000e+00 : f32
      %290 = vector.broadcast %cst_74 : f32 to vector<1x128xf32>
      %291 = arith.subf %290, %284 : vector<1x128xf32>
      %292 = arith.mulf %291, %289 : vector<1x128xf32>
      %293 = arith.mulf %284, %265 : vector<1x128xf32>
      %294 = arith.addf %292, %293 : vector<1x128xf32>
      %c0_75 = arith.constant 0 : index
      %c0_76 = arith.constant 0 : index
      %295 = vector.load %arg12[%c0_75, %c0_76] : memref<8x128xf32, #tpu.memory_space<vmem>>, vector<1x128xf32>
      tpu.vector_store %arg12[%c0_75, %c0_76], %294 {strides = array<i32>} : memref<8x128xf32, #tpu.memory_space<vmem>>, vector<1x128xf32>,
      %296 = vector.extract_strided_slice %264 {offsets = [1, 0], sizes = [1, 384], strides = [1, 1]} : vector<8x384xf32> to vector<1x384xf32>
      %cst_77 = arith.constant dense<0.000000e+00> : vector<1x384xf32>
      %297 = tpu.matmul %294, %258, %cst_77 {dimension_numbers = #tpu.dot_dimension_numbers<[1], [0], [0], [1], [0, 0, 1, 1], [], []>} : vector<1x128xf32>, vector<128x384xf32>, vector<1x384xf32> -> vector<1x384xf32>
      %298 = arith.addf %297, %260 : vector<1x384xf32>
      %299 = vector.extract_strided_slice %296 {offsets = [0, 0], sizes = [1, 128], strides = [1, 1]} : vector<1x384xf32> to vector<1x128xf32>
      %300 = vector.extract_strided_slice %298 {offsets = [0, 0], sizes = [1, 128], strides = [1, 1]} : vector<1x384xf32> to vector<1x128xf32>
      %301 = arith.addf %299, %300 : vector<1x128xf32>
      %302 = arith.negf %301 : vector<1x128xf32>
      %303 = math.exp %302 : vector<1x128xf32>
      %cst_78 = arith.constant 1.000000e+00 : f32
      %304 = vector.broadcast %cst_78 : f32 to vector<1x128xf32>
      %305 = arith.addf %304, %303 : vector<1x128xf32>
      %306 = arith.divf %304, %305 : vector<1x128xf32>
      %307 = vector.extract_strided_slice %296 {offsets = [0, 128], sizes = [1, 128], strides = [1, 1]} : vector<1x384xf32> to vector<1x128xf32>
      %308 = vector.extract_strided_slice %298 {offsets = [0, 128], sizes = [1, 128], strides = [1, 1]} : vector<1x384xf32> to vector<1x128xf32>
      %309 = arith.addf %307, %308 : vector<1x128xf32>
      %310 = arith.negf %309 : vector<1x128xf32>
      %311 = math.exp %310 : vector<1x128xf32>
      %cst_79 = arith.constant 1.000000e+00 : f32
      %312 = vector.broadcast %cst_79 : f32 to vector<1x128xf32>
      %313 = arith.addf %312, %311 : vector<1x128xf32>
      %314 = arith.divf %312, %313 : vector<1x128xf32>
      %315 = vector.extract_strided_slice %296 {offsets = [0, 256], sizes = [1, 128], strides = [1, 1]} : vector<1x384xf32> to vector<1x128xf32>
      %316 = vector.extract_strided_slice %298 {offsets = [0, 256], sizes = [1, 128], strides = [1, 1]} : vector<1x384xf32> to vector<1x128xf32>
      %317 = arith.mulf %306, %316 : vector<1x128xf32>
      %318 = arith.addf %315, %317 : vector<1x128xf32>
      %319 = math.tanh %318 : vector<1x128xf32>
      %cst_80 = arith.constant 1.000000e+00 : f32
      %320 = vector.broadcast %cst_80 : f32 to vector<1x128xf32>
      %321 = arith.subf %320, %314 : vector<1x128xf32>
      %322 = arith.mulf %321, %319 : vector<1x128xf32>
      %323 = arith.mulf %314, %294 : vector<1x128xf32>
      %324 = arith.addf %322, %323 : vector<1x128xf32>
      %c1_81 = arith.constant 1 : index
      %c0_82 = arith.constant 0 : index
      %325 = vector.load %arg12[%c1_81, %c0_82] : memref<8x128xf32, #tpu.memory_space<vmem>>, vector<1x128xf32>
      tpu.vector_store %arg12[%c1_81, %c0_82], %324 {strides = array<i32>} : memref<8x128xf32, #tpu.memory_space<vmem>>, vector<1x128xf32>,
      %326 = vector.extract_strided_slice %264 {offsets = [2, 0], sizes = [1, 384], strides = [1, 1]} : vector<8x384xf32> to vector<1x384xf32>
      %cst_83 = arith.constant dense<0.000000e+00> : vector<1x384xf32>
      %327 = tpu.matmul %324, %258, %cst_83 {dimension_numbers = #tpu.dot_dimension_numbers<[1], [0], [0], [1], [0, 0, 1, 1], [], []>} : vector<1x128xf32>, vector<128x384xf32>, vector<1x384xf32> -> vector<1x384xf32>
      %328 = arith.addf %327, %260 : vector<1x384xf32>
      %329 = vector.extract_strided_slice %326 {offsets = [0, 0], sizes = [1, 128], strides = [1, 1]} : vector<1x384xf32> to vector<1x128xf32>
      %330 = vector.extract_strided_slice %328 {offsets = [0, 0], sizes = [1, 128], strides = [1, 1]} : vector<1x384xf32> to vector<1x128xf32>
      %331 = arith.addf %329, %330 : vector<1x128xf32>
      %332 = arith.negf %331 : vector<1x128xf32>
      %333 = math.exp %332 : vector<1x128xf32>
      %cst_84 = arith.constant 1.000000e+00 : f32
      %334 = vector.broadcast %cst_84 : f32 to vector<1x128xf32>
      %335 = arith.addf %334, %333 : vector<1x128xf32>
      %336 = arith.divf %334, %335 : vector<1x128xf32>
      %337 = vector.extract_strided_slice %326 {offsets = [0, 128], sizes = [1, 128], strides = [1, 1]} : vector<1x384xf32> to vector<1x128xf32>
      %338 = vector.extract_strided_slice %328 {offsets = [0, 128], sizes = [1, 128], strides = [1, 1]} : vector<1x384xf32> to vector<1x128xf32>
      %339 = arith.addf %337, %338 : vector<1x128xf32>
      %340 = arith.negf %339 : vector<1x128xf32>
      %341 = math.exp %340 : vector<1x128xf32>
      %cst_85 = arith.constant 1.000000e+00 : f32
      %342 = vector.broadcast %cst_85 : f32 to vector<1x128xf32>
      %343 = arith.addf %342, %341 : vector<1x128xf32>
      %344 = arith.divf %342, %343 : vector<1x128xf32>
      %345 = vector.extract_strided_slice %326 {offsets = [0, 256], sizes = [1, 128], strides = [1, 1]} : vector<1x384xf32> to vector<1x128xf32>
      %346 = vector.extract_strided_slice %328 {offsets = [0, 256], sizes = [1, 128], strides = [1, 1]} : vector<1x384xf32> to vector<1x128xf32>
      %347 = arith.mulf %336, %346 : vector<1x128xf32>
      %348 = arith.addf %345, %347 : vector<1x128xf32>
      %349 = math.tanh %348 : vector<1x128xf32>
      %cst_86 = arith.constant 1.000000e+00 : f32
      %350 = vector.broadcast %cst_86 : f32 to vector<1x128xf32>
      %351 = arith.subf %350, %344 : vector<1x128xf32>
      %352 = arith.mulf %351, %349 : vector<1x128xf32>
      %353 = arith.mulf %344, %324 : vector<1x128xf32>
      %354 = arith.addf %352, %353 : vector<1x128xf32>
      %c2_87 = arith.constant 2 : index
      %c0_88 = arith.constant 0 : index
      %355 = vector.load %arg12[%c2_87, %c0_88] : memref<8x128xf32, #tpu.memory_space<vmem>>, vector<1x128xf32>
      tpu.vector_store %arg12[%c2_87, %c0_88], %354 {strides = array<i32>} : memref<8x128xf32, #tpu.memory_space<vmem>>, vector<1x128xf32>,
      %356 = vector.extract_strided_slice %264 {offsets = [3, 0], sizes = [1, 384], strides = [1, 1]} : vector<8x384xf32> to vector<1x384xf32>
      %cst_89 = arith.constant dense<0.000000e+00> : vector<1x384xf32>
      %357 = tpu.matmul %354, %258, %cst_89 {dimension_numbers = #tpu.dot_dimension_numbers<[1], [0], [0], [1], [0, 0, 1, 1], [], []>} : vector<1x128xf32>, vector<128x384xf32>, vector<1x384xf32> -> vector<1x384xf32>
      %358 = arith.addf %357, %260 : vector<1x384xf32>
      %359 = vector.extract_strided_slice %356 {offsets = [0, 0], sizes = [1, 128], strides = [1, 1]} : vector<1x384xf32> to vector<1x128xf32>
      %360 = vector.extract_strided_slice %358 {offsets = [0, 0], sizes = [1, 128], strides = [1, 1]} : vector<1x384xf32> to vector<1x128xf32>
      %361 = arith.addf %359, %360 : vector<1x128xf32>
      %362 = arith.negf %361 : vector<1x128xf32>
      %363 = math.exp %362 : vector<1x128xf32>
      %cst_90 = arith.constant 1.000000e+00 : f32
      %364 = vector.broadcast %cst_90 : f32 to vector<1x128xf32>
      %365 = arith.addf %364, %363 : vector<1x128xf32>
      %366 = arith.divf %364, %365 : vector<1x128xf32>
      %367 = vector.extract_strided_slice %356 {offsets = [0, 128], sizes = [1, 128], strides = [1, 1]} : vector<1x384xf32> to vector<1x128xf32>
      %368 = vector.extract_strided_slice %358 {offsets = [0, 128], sizes = [1, 128], strides = [1, 1]} : vector<1x384xf32> to vector<1x128xf32>
      %369 = arith.addf %367, %368 : vector<1x128xf32>
      %370 = arith.negf %369 : vector<1x128xf32>
      %371 = math.exp %370 : vector<1x128xf32>
      %cst_91 = arith.constant 1.000000e+00 : f32
      %372 = vector.broadcast %cst_91 : f32 to vector<1x128xf32>
      %373 = arith.addf %372, %371 : vector<1x128xf32>
      %374 = arith.divf %372, %373 : vector<1x128xf32>
      %375 = vector.extract_strided_slice %356 {offsets = [0, 256], sizes = [1, 128], strides = [1, 1]} : vector<1x384xf32> to vector<1x128xf32>
      %376 = vector.extract_strided_slice %358 {offsets = [0, 256], sizes = [1, 128], strides = [1, 1]} : vector<1x384xf32> to vector<1x128xf32>
      %377 = arith.mulf %366, %376 : vector<1x128xf32>
      %378 = arith.addf %375, %377 : vector<1x128xf32>
      %379 = math.tanh %378 : vector<1x128xf32>
      %cst_92 = arith.constant 1.000000e+00 : f32
      %380 = vector.broadcast %cst_92 : f32 to vector<1x128xf32>
      %381 = arith.subf %380, %374 : vector<1x128xf32>
      %382 = arith.mulf %381, %379 : vector<1x128xf32>
      %383 = arith.mulf %374, %354 : vector<1x128xf32>
      %384 = arith.addf %382, %383 : vector<1x128xf32>
      %c3_93 = arith.constant 3 : index
      %c0_94 = arith.constant 0 : index
      %385 = vector.load %arg12[%c3_93, %c0_94] : memref<8x128xf32, #tpu.memory_space<vmem>>, vector<1x128xf32>
      tpu.vector_store %arg12[%c3_93, %c0_94], %384 {strides = array<i32>} : memref<8x128xf32, #tpu.memory_space<vmem>>, vector<1x128xf32>,
      %386 = vector.extract_strided_slice %264 {offsets = [4, 0], sizes = [1, 384], strides = [1, 1]} : vector<8x384xf32> to vector<1x384xf32>
      %cst_95 = arith.constant dense<0.000000e+00> : vector<1x384xf32>
      %387 = tpu.matmul %384, %258, %cst_95 {dimension_numbers = #tpu.dot_dimension_numbers<[1], [0], [0], [1], [0, 0, 1, 1], [], []>} : vector<1x128xf32>, vector<128x384xf32>, vector<1x384xf32> -> vector<1x384xf32>
      %388 = arith.addf %387, %260 : vector<1x384xf32>
      %389 = vector.extract_strided_slice %386 {offsets = [0, 0], sizes = [1, 128], strides = [1, 1]} : vector<1x384xf32> to vector<1x128xf32>
      %390 = vector.extract_strided_slice %388 {offsets = [0, 0], sizes = [1, 128], strides = [1, 1]} : vector<1x384xf32> to vector<1x128xf32>
      %391 = arith.addf %389, %390 : vector<1x128xf32>
      %392 = arith.negf %391 : vector<1x128xf32>
      %393 = math.exp %392 : vector<1x128xf32>
      %cst_96 = arith.constant 1.000000e+00 : f32
      %394 = vector.broadcast %cst_96 : f32 to vector<1x128xf32>
      %395 = arith.addf %394, %393 : vector<1x128xf32>
      %396 = arith.divf %394, %395 : vector<1x128xf32>
      %397 = vector.extract_strided_slice %386 {offsets = [0, 128], sizes = [1, 128], strides = [1, 1]} : vector<1x384xf32> to vector<1x128xf32>
      %398 = vector.extract_strided_slice %388 {offsets = [0, 128], sizes = [1, 128], strides = [1, 1]} : vector<1x384xf32> to vector<1x128xf32>
      %399 = arith.addf %397, %398 : vector<1x128xf32>
      %400 = arith.negf %399 : vector<1x128xf32>
      %401 = math.exp %400 : vector<1x128xf32>
      %cst_97 = arith.constant 1.000000e+00 : f32
      %402 = vector.broadcast %cst_97 : f32 to vector<1x128xf32>
      %403 = arith.addf %402, %401 : vector<1x128xf32>
      %404 = arith.divf %402, %403 : vector<1x128xf32>
      %405 = vector.extract_strided_slice %386 {offsets = [0, 256], sizes = [1, 128], strides = [1, 1]} : vector<1x384xf32> to vector<1x128xf32>
      %406 = vector.extract_strided_slice %388 {offsets = [0, 256], sizes = [1, 128], strides = [1, 1]} : vector<1x384xf32> to vector<1x128xf32>
      %407 = arith.mulf %396, %406 : vector<1x128xf32>
      %408 = arith.addf %405, %407 : vector<1x128xf32>
      %409 = math.tanh %408 : vector<1x128xf32>
      %cst_98 = arith.constant 1.000000e+00 : f32
      %410 = vector.broadcast %cst_98 : f32 to vector<1x128xf32>
      %411 = arith.subf %410, %404 : vector<1x128xf32>
      %412 = arith.mulf %411, %409 : vector<1x128xf32>
      %413 = arith.mulf %404, %384 : vector<1x128xf32>
      %414 = arith.addf %412, %413 : vector<1x128xf32>
      %c4_99 = arith.constant 4 : index
      %c0_100 = arith.constant 0 : index
      %415 = vector.load %arg12[%c4_99, %c0_100] : memref<8x128xf32, #tpu.memory_space<vmem>>, vector<1x128xf32>
      tpu.vector_store %arg12[%c4_99, %c0_100], %414 {strides = array<i32>} : memref<8x128xf32, #tpu.memory_space<vmem>>, vector<1x128xf32>,
      %416 = vector.extract_strided_slice %264 {offsets = [5, 0], sizes = [1, 384], strides = [1, 1]} : vector<8x384xf32> to vector<1x384xf32>
      %cst_101 = arith.constant dense<0.000000e+00> : vector<1x384xf32>
      %417 = tpu.matmul %414, %258, %cst_101 {dimension_numbers = #tpu.dot_dimension_numbers<[1], [0], [0], [1], [0, 0, 1, 1], [], []>} : vector<1x128xf32>, vector<128x384xf32>, vector<1x384xf32> -> vector<1x384xf32>
      %418 = arith.addf %417, %260 : vector<1x384xf32>
      %419 = vector.extract_strided_slice %416 {offsets = [0, 0], sizes = [1, 128], strides = [1, 1]} : vector<1x384xf32> to vector<1x128xf32>
      %420 = vector.extract_strided_slice %418 {offsets = [0, 0], sizes = [1, 128], strides = [1, 1]} : vector<1x384xf32> to vector<1x128xf32>
      %421 = arith.addf %419, %420 : vector<1x128xf32>
      %422 = arith.negf %421 : vector<1x128xf32>
      %423 = math.exp %422 : vector<1x128xf32>
      %cst_102 = arith.constant 1.000000e+00 : f32
      %424 = vector.broadcast %cst_102 : f32 to vector<1x128xf32>
      %425 = arith.addf %424, %423 : vector<1x128xf32>
      %426 = arith.divf %424, %425 : vector<1x128xf32>
      %427 = vector.extract_strided_slice %416 {offsets = [0, 128], sizes = [1, 128], strides = [1, 1]} : vector<1x384xf32> to vector<1x128xf32>
      %428 = vector.extract_strided_slice %418 {offsets = [0, 128], sizes = [1, 128], strides = [1, 1]} : vector<1x384xf32> to vector<1x128xf32>
      %429 = arith.addf %427, %428 : vector<1x128xf32>
      %430 = arith.negf %429 : vector<1x128xf32>
      %431 = math.exp %430 : vector<1x128xf32>
      %cst_103 = arith.constant 1.000000e+00 : f32
      %432 = vector.broadcast %cst_103 : f32 to vector<1x128xf32>
      %433 = arith.addf %432, %431 : vector<1x128xf32>
      %434 = arith.divf %432, %433 : vector<1x128xf32>
      %435 = vector.extract_strided_slice %416 {offsets = [0, 256], sizes = [1, 128], strides = [1, 1]} : vector<1x384xf32> to vector<1x128xf32>
      %436 = vector.extract_strided_slice %418 {offsets = [0, 256], sizes = [1, 128], strides = [1, 1]} : vector<1x384xf32> to vector<1x128xf32>
      %437 = arith.mulf %426, %436 : vector<1x128xf32>
      %438 = arith.addf %435, %437 : vector<1x128xf32>
      %439 = math.tanh %438 : vector<1x128xf32>
      %cst_104 = arith.constant 1.000000e+00 : f32
      %440 = vector.broadcast %cst_104 : f32 to vector<1x128xf32>
      %441 = arith.subf %440, %434 : vector<1x128xf32>
      %442 = arith.mulf %441, %439 : vector<1x128xf32>
      %443 = arith.mulf %434, %414 : vector<1x128xf32>
      %444 = arith.addf %442, %443 : vector<1x128xf32>
      %c5_105 = arith.constant 5 : index
      %c0_106 = arith.constant 0 : index
      %445 = vector.load %arg12[%c5_105, %c0_106] : memref<8x128xf32, #tpu.memory_space<vmem>>, vector<1x128xf32>
      tpu.vector_store %arg12[%c5_105, %c0_106], %444 {strides = array<i32>} : memref<8x128xf32, #tpu.memory_space<vmem>>, vector<1x128xf32>,
      %446 = vector.extract_strided_slice %264 {offsets = [6, 0], sizes = [1, 384], strides = [1, 1]} : vector<8x384xf32> to vector<1x384xf32>
      %cst_107 = arith.constant dense<0.000000e+00> : vector<1x384xf32>
      %447 = tpu.matmul %444, %258, %cst_107 {dimension_numbers = #tpu.dot_dimension_numbers<[1], [0], [0], [1], [0, 0, 1, 1], [], []>} : vector<1x128xf32>, vector<128x384xf32>, vector<1x384xf32> -> vector<1x384xf32>
      %448 = arith.addf %447, %260 : vector<1x384xf32>
      %449 = vector.extract_strided_slice %446 {offsets = [0, 0], sizes = [1, 128], strides = [1, 1]} : vector<1x384xf32> to vector<1x128xf32>
      %450 = vector.extract_strided_slice %448 {offsets = [0, 0], sizes = [1, 128], strides = [1, 1]} : vector<1x384xf32> to vector<1x128xf32>
      %451 = arith.addf %449, %450 : vector<1x128xf32>
      %452 = arith.negf %451 : vector<1x128xf32>
      %453 = math.exp %452 : vector<1x128xf32>
      %cst_108 = arith.constant 1.000000e+00 : f32
      %454 = vector.broadcast %cst_108 : f32 to vector<1x128xf32>
      %455 = arith.addf %454, %453 : vector<1x128xf32>
      %456 = arith.divf %454, %455 : vector<1x128xf32>
      %457 = vector.extract_strided_slice %446 {offsets = [0, 128], sizes = [1, 128], strides = [1, 1]} : vector<1x384xf32> to vector<1x128xf32>
      %458 = vector.extract_strided_slice %448 {offsets = [0, 128], sizes = [1, 128], strides = [1, 1]} : vector<1x384xf32> to vector<1x128xf32>
      %459 = arith.addf %457, %458 : vector<1x128xf32>
      %460 = arith.negf %459 : vector<1x128xf32>
      %461 = math.exp %460 : vector<1x128xf32>
      %cst_109 = arith.constant 1.000000e+00 : f32
      %462 = vector.broadcast %cst_109 : f32 to vector<1x128xf32>
      %463 = arith.addf %462, %461 : vector<1x128xf32>
      %464 = arith.divf %462, %463 : vector<1x128xf32>
      %465 = vector.extract_strided_slice %446 {offsets = [0, 256], sizes = [1, 128], strides = [1, 1]} : vector<1x384xf32> to vector<1x128xf32>
      %466 = vector.extract_strided_slice %448 {offsets = [0, 256], sizes = [1, 128], strides = [1, 1]} : vector<1x384xf32> to vector<1x128xf32>
      %467 = arith.mulf %456, %466 : vector<1x128xf32>
      %468 = arith.addf %465, %467 : vector<1x128xf32>
      %469 = math.tanh %468 : vector<1x128xf32>
      %cst_110 = arith.constant 1.000000e+00 : f32
      %470 = vector.broadcast %cst_110 : f32 to vector<1x128xf32>
      %471 = arith.subf %470, %464 : vector<1x128xf32>
      %472 = arith.mulf %471, %469 : vector<1x128xf32>
      %473 = arith.mulf %464, %444 : vector<1x128xf32>
      %474 = arith.addf %472, %473 : vector<1x128xf32>
      %c6_111 = arith.constant 6 : index
      %c0_112 = arith.constant 0 : index
      %475 = vector.load %arg12[%c6_111, %c0_112] : memref<8x128xf32, #tpu.memory_space<vmem>>, vector<1x128xf32>
      tpu.vector_store %arg12[%c6_111, %c0_112], %474 {strides = array<i32>} : memref<8x128xf32, #tpu.memory_space<vmem>>, vector<1x128xf32>,
      %476 = vector.extract_strided_slice %264 {offsets = [7, 0], sizes = [1, 384], strides = [1, 1]} : vector<8x384xf32> to vector<1x384xf32>
      %cst_113 = arith.constant dense<0.000000e+00> : vector<1x384xf32>
      %477 = tpu.matmul %474, %258, %cst_113 {dimension_numbers = #tpu.dot_dimension_numbers<[1], [0], [0], [1], [0, 0, 1, 1], [], []>} : vector<1x128xf32>, vector<128x384xf32>, vector<1x384xf32> -> vector<1x384xf32>
      %478 = arith.addf %477, %260 : vector<1x384xf32>
      %479 = vector.extract_strided_slice %476 {offsets = [0, 0], sizes = [1, 128], strides = [1, 1]} : vector<1x384xf32> to vector<1x128xf32>
      %480 = vector.extract_strided_slice %478 {offsets = [0, 0], sizes = [1, 128], strides = [1, 1]} : vector<1x384xf32> to vector<1x128xf32>
      %481 = arith.addf %479, %480 : vector<1x128xf32>
      %482 = arith.negf %481 : vector<1x128xf32>
      %483 = math.exp %482 : vector<1x128xf32>
      %cst_114 = arith.constant 1.000000e+00 : f32
      %484 = vector.broadcast %cst_114 : f32 to vector<1x128xf32>
      %485 = arith.addf %484, %483 : vector<1x128xf32>
      %486 = arith.divf %484, %485 : vector<1x128xf32>
      %487 = vector.extract_strided_slice %476 {offsets = [0, 128], sizes = [1, 128], strides = [1, 1]} : vector<1x384xf32> to vector<1x128xf32>
      %488 = vector.extract_strided_slice %478 {offsets = [0, 128], sizes = [1, 128], strides = [1, 1]} : vector<1x384xf32> to vector<1x128xf32>
      %489 = arith.addf %487, %488 : vector<1x128xf32>
      %490 = arith.negf %489 : vector<1x128xf32>
      %491 = math.exp %490 : vector<1x128xf32>
      %cst_115 = arith.constant 1.000000e+00 : f32
      %492 = vector.broadcast %cst_115 : f32 to vector<1x128xf32>
      %493 = arith.addf %492, %491 : vector<1x128xf32>
      %494 = arith.divf %492, %493 : vector<1x128xf32>
      %495 = vector.extract_strided_slice %476 {offsets = [0, 256], sizes = [1, 128], strides = [1, 1]} : vector<1x384xf32> to vector<1x128xf32>
      %496 = vector.extract_strided_slice %478 {offsets = [0, 256], sizes = [1, 128], strides = [1, 1]} : vector<1x384xf32> to vector<1x128xf32>
      %497 = arith.mulf %486, %496 : vector<1x128xf32>
      %498 = arith.addf %495, %497 : vector<1x128xf32>
      %499 = math.tanh %498 : vector<1x128xf32>
      %cst_116 = arith.constant 1.000000e+00 : f32
      %500 = vector.broadcast %cst_116 : f32 to vector<1x128xf32>
      %501 = arith.subf %500, %494 : vector<1x128xf32>
      %502 = arith.mulf %501, %499 : vector<1x128xf32>
      %503 = arith.mulf %494, %474 : vector<1x128xf32>
      %504 = arith.addf %502, %503 : vector<1x128xf32>
      %c7_117 = arith.constant 7 : index
      %c0_118 = arith.constant 0 : index
      %505 = vector.load %arg12[%c7_117, %c0_118] : memref<8x128xf32, #tpu.memory_space<vmem>>, vector<1x128xf32>
      tpu.vector_store %arg12[%c7_117, %c0_118], %504 {strides = array<i32>} : memref<8x128xf32, #tpu.memory_space<vmem>>, vector<1x128xf32>,
    } else {
    }
    %c0 = arith.constant 0 : index
    %c0_1 = arith.constant 0 : index
    %3 = vector.load %arg12[%c0, %c0_1] : memref<8x128xf32, #tpu.memory_space<vmem>>, vector<8x128xf32>
    %4 = arith.truncf %3 : vector<8x128xf32> to vector<8x128xbf16>
    %c0_2 = arith.constant 0 : index
    %c0_3 = arith.constant 0 : index
    %5 = vector.load %arg10[%c0_2, %c0_3] : memref<128x3456xbf16, #tpu.memory_space<vmem>>, vector<128x3456xbf16>
    %cst = arith.constant dense<0.000000e+00> : vector<8x3456xf32>
    %6 = tpu.matmul %4, %5, %cst {dimension_numbers = #tpu.dot_dimension_numbers<[1], [0], [0], [1], [0, 0, 1, 1], [], []>} : vector<8x128xbf16>, vector<128x3456xbf16>, vector<8x3456xf32> -> vector<8x3456xf32>
    %c0_4 = arith.constant 0 : index
    %c0_5 = arith.constant 0 : index
    %7 = vector.load %arg11[%c0_4, %c0_5] : memref<8x3456xf32, #tpu.memory_space<vmem>>, vector<8x3456xf32>
    tpu.vector_store %arg11[%c0_4, %c0_5], %6 {strides = array<i32>} : memref<8x3456xf32, #tpu.memory_space<vmem>>, vector<8x3456xf32>,
    return
  }
  func.func @transform_0(%arg0: i32) -> (i32, i32) {
    %c0_i32 = arith.constant 0 : i32
    %c0_i32_0 = arith.constant 0 : i32
    %c0_i32_1 = arith.constant 0 : i32
    return %c0_i32, %c0_i32_0 : i32, i32
  }
  func.func @transform_1(%arg0: i32) -> (i32, i32) {
    %c0_i32 = arith.constant 0 : i32
    %c0_i32_0 = arith.constant 0 : i32
    %c0_i32_1 = arith.constant 0 : i32
    return %c0_i32, %c0_i32_0 : i32, i32
  }
  func.func @transform_2(%arg0: i32) -> (i32, i32) {
    %c0_i32 = arith.constant 0 : i32
    %c0_i32_0 = arith.constant 0 : i32
    %c0_i32_1 = arith.constant 0 : i32
    return %c0_i32, %c0_i32_0 : i32, i32
  }
  func.func @transform_3(%arg0: i32) -> (i32, i32) {
    %c0_i32 = arith.constant 0 : i32
    %c0_i32_0 = arith.constant 0 : i32
    %c0_i32_1 = arith.constant 0 : i32
    return %c0_i32, %c0_i32_0 : i32, i32
  }
  func.func @transform_4(%arg0: i32) -> (i32, i32) {
    %c0_i32 = arith.constant 0 : i32
    %c0_i32_0 = arith.constant 0 : i32
    %c0_i32_1 = arith.constant 0 : i32
    return %c0_i32, %c0_i32_0 : i32, i32
  }
  func.func @transform_5(%arg0: i32) -> (i32, i32) {
    %c0_i32 = arith.constant 0 : i32
    %c0_i32_0 = arith.constant 0 : i32
    %c0_i32_1 = arith.constant 0 : i32
    return %c0_i32, %c0_i32_0 : i32, i32
  }
  func.func @transform_6(%arg0: i32) -> (i32, i32) {
    %c0_i32 = arith.constant 0 : i32
    %c0_i32_0 = arith.constant 0 : i32
    %c0_i32_1 = arith.constant 0 : i32
    return %c0_i32, %c0_i32_0 : i32, i32
  }
  func.func @transform_7(%arg0: i32) -> (i32, i32) {
    %c0_i32 = arith.constant 0 : i32
    %c0_i32_0 = arith.constant 0 : i32
    %c0_i32_1 = arith.constant 0 : i32
    return %c0_i32, %c0_i32_0 : i32, i32
  }
  func.func @transform_8(%arg0: i32) -> (i32, i32) {
    %c0_i32 = arith.constant 0 : i32
    %c0_i32_0 = arith.constant 0 : i32
    %c0_i32_1 = arith.constant 0 : i32
    return %c0_i32, %c0_i32_0 : i32, i32
  }
  func.func @transform_9(%arg0: i32) -> (i32, i32) {
    %c0_i32 = arith.constant 0 : i32
    %c0_i32_0 = arith.constant 0 : i32
    return %c0_i32, %arg0 : i32, i32
  }
  func.func @transform_10(%arg0: i32) -> (i32, i32) {
    %c0_i32 = arith.constant 0 : i32
    %c0_i32_0 = arith.constant 0 : i32
    return %c0_i32, %arg0 : i32, i32
  }
}

</mosaic_0001>

<bundles_post_ra>
// kernel: tpu_custom_call.1
= control target key start
LH: loop header
LB: loop body
LE: loop exit
PB: predicated region body
PF: predicated region fallthrough
CT: control target
= control target key end

     0   :  { %s10691_s0 = inlined_call_operand.hbm [shape: f32[8,16], index: 0, kind: input, shape index: {}]   ;;  %s10692_s1 = inlined_call_operand.hbm [shape: f32[16,384], index: 1, kind: input, shape index: {}]   ;;  %s10693_s2 = inlined_call_operand.hbm [shape: f32[128,384], index: 2, kind: input, shape index: {}]   ;;  %s10694_s3 = inlined_call_operand.hbm [shape: f32[1,384], index: 3, kind: input, shape index: {}]   ;;  %s10695_s4 = inlined_call_operand.hbm [shape: f32[1,384], index: 4, kind: input, shape index: {}]   ;;  %s10696_s5 = inlined_call_operand.hbm [shape: f32[128,384], index: 5, kind: input, shape index: {}]   ;;  %s10697_s6 = inlined_call_operand.hbm [shape: f32[128,384], index: 6, kind: input, shape index: {}]   ;;  %s10698_s7 = inlined_call_operand.hbm [shape: f32[1,384], index: 7, kind: input, shape index: {}]   ;;  %s10699_s8 = inlined_call_operand.hbm [shape: f32[1,384], index: 8, kind: input, shape index: {}]   ;;  %s10700_s9 = inlined_call_operand.hbm [shape: bf16[128,20736], index: 9, kind: input, shape index: {}]   ;;  %s10701_s10 = inlined_call_operand.hbm [shape: f32[8,20670], index: 10, kind: output, shape index: {}]  }
   0x1   :  { %10707 = sst [smem:[#allocation29_spill]] %s10691_s0 }
   0x2   :  { %10708 = sst [smem:[#allocation30_spill]] %s10692_s1 }
   0x3   :  { %10709 = sst [smem:[#allocation31_spill]] %s10701_s10 }
   0x4   :  { %15 = vsyncpa [#allocation4], 0 }
   0x5   :  { %16 = vsyncpa [#allocation7], 0 }
   0x6   :  { %17 = vsyncpa [#allocation10], 0 }
   0x7   :  { %18 = vsyncpa [#allocation13], 0 }
   0x8   :  { %19 = vsyncpa [#allocation16], 0 }
   0x9   :  { %20 = vsyncpa [#allocation19], 0 }
   0xa   :  { %22 = vsyncpa [#allocation19 + $0x1], 0 }
   0xb   :  { %23 = vsyncpa [#allocation5], 0 }
   0xc   :  { %25 = vsyncpa [#allocation5 + $0x1], 0  ;;  %s9138_s13 = smov 0   ;;  %s9140_s14 = smov 0  }
   0xd   :  { %s9142_s15 = smov 0   ;;  %s9144_s16 = smov 0  }
   0xe LB: > { %s9061_s17 = smov [#allocation6]   ;;  %s9159_s19 = sadd.s32 4294967295, %s9059_s16   ;;  %s9059_s16 = sphi %s9144_s16, %s10740_s16   ;;  %s9055_s15 = sphi %s9142_s15, %s10739_s15   ;;  %s9051_s14 = sphi %s9140_s14, %s10738_s14   ;;  %s9047_s13 = sphi %s9138_s13, %s10737_s13  }
   0xf   : > { %s300_s18 = sshll.u32 %s9061_s17, 4  ;;  %p5900_p0 = scmp.ge.s32.totalorder %s9059_s16, 1  ;;  %s9165_s18 = int_to_ptr.vmem [resolvable:$true] %s300_s18 }
  0x10   : > { %p10704_p1 = scmp.eq.s32.totalorder %s9159_s19, 0  ;;  %p277_p2 = scmp.lt.s32.totalorder %s9059_s16, 7 }
  0x11   : > { %s9062_s21 = smov [#allocation9]   ;;  %s9063_s24 = smov [#allocation12]  }
  0x12   : > { %p9167_p4 = pnand %p5900_p0, %p277_p2  ;;  %s327_s22 = sshll.u32 %s9062_s21, 4  ;;  %s9179_s22 = int_to_ptr.vmem [resolvable:$true] %s327_s22 }
  0x13   : > { %s348_s25 = sshll.u32 %s9063_s24, 4  ;;  %s10713_s1 = sld [smem:[#allocation30_spill]]  ;;  %s9181_s25 = int_to_ptr.vmem [resolvable:$true] %s348_s25 }
  0x14   : > { %s10710_s20 = scalar_select %p9167_p4, 1, 0 }
  0x15   : > { %p8103_p5 = pneg %p9167_p4 }
  0x16   : > { %10711 = sst [smem:[#allocation28_spill]] %s10710_s20 }
  0x17   : > { %p9175_p6 = pnand %p8103_p5, %p10704_p1 }
  0x19   : > { %s8691_s28 = scalar_lea.hbm %s10713_s1, 768  ;;  %p9191_p8 = pneg %p9175_p6 }
  0x1a   : > { %p8692_p7 = scmp.ne.s32.totalorder %s10713_s1, %s8691_s28  ;;  %p8698_p11 = scmp.lt.u32.totalorder %s8691_s28, %s10713_s1 }
  0x1c   : > { %p8694_p9 = pnand %p9191_p8, %p8692_p7 }
  0x1e   : > { %p8695_p10 = pneg %p8694_p9 }
  0x20   : > { %p8700_p12 = pnand %p8698_p11, %p8695_p10 }
  0x22   : > { %8703 = shalt.err (!%p8700_p12)
}
  0x23   : > { %s8704_s21 = scalar_lea.vmem %s9165_s18, 768  ;;  %p8712_p5 = scmp.lt.s32.totalorder %s9165_s18, %s9165_s18 }
  0x24   : > { %p8705_p13 = scmp.ne.s32.totalorder %s9165_s18, %s8704_s21  ;;  %p8713_p3 = scmp.lt.s32.totalorder %s8704_s21, %s8704_s21 }
  0x26   : > { %p8707_p0 = pnand %p8705_p13, %p9191_p8  ;;  %p8714_p7 = por %p8713_p3, %p8712_p5 }
  0x28   : > { %p8708_p2 = pneg %p8707_p0 }
  0x2a   : > { %p8715_p9 = pnand %p8714_p7, %p8708_p2 }
  0x2c   : > { %8718 = shalt.err (!%p8715_p9)
}
  0x2d   : > { %s9064_s24 = smov 384   ;;  %s9065_s26 = smov 24  }
  0x2e   : > { %8109 = dma.hbm_to_vmem [thread:$0]  (!%p9175_p6), %s10713_s1, 768, %s9165_s18, [#allocation7], %s9064_s24, %s9064_s24, %s9065_s26  }
  0x2f   : > { %s8719_s12 = scalar_lea.hbm %s10694_s3, 48 }
  0x30   : > { %p8720_p3 = scmp.ne.s32.totalorder %s10694_s3, %s8719_s12  ;;  %p8726_p12 = scmp.lt.u32.totalorder %s8719_s12, %s10694_s3 }
  0x32   : > { %p8722_p10 = pnand %p8720_p3, %p9191_p8 }
  0x34   : > { %p8723_p11 = pneg %p8722_p10 }
  0x36   : > { %p8728_p13 = pnand %p8726_p12, %p8723_p11 }
  0x38   : > { %8731 = shalt.err (!%p8728_p13)
}
  0x39   : > { %s8732_s18 = scalar_lea.vmem %s9179_s22, 48  ;;  %s8739_s27 = scalar_lea.vmem %s9179_s22, 64 }
  0x3a   : > { %p8733_p0 = scmp.ne.s32.totalorder %s9179_s22, %s8732_s18  ;;  %p8740_p7 = scmp.lt.s32.totalorder %s9179_s22, %s9179_s22 }
  0x3b   : > { %p8741_p9 = scmp.lt.s32.totalorder %s8739_s27, %s8732_s18 }
  0x3c   : > { %p8735_p2 = pnand %p8733_p0, %p9191_p8 }
  0x3d   : > { %p8742_p3 = por %p8741_p9, %p8740_p7 }
  0x3e   : > { %p8736_p5 = pneg %p8735_p2 }
  0x40   : > { %p8743_p10 = pnand %p8742_p3, %p8736_p5 }
  0x42   : > { %8746 = shalt.err (!%p8743_p10)
}
  0x43   : > { %8115 = dma.hbm_to_vmem [thread:$0]  (!%p9175_p6), %s10694_s3, 48, %s9179_s22, [#allocation10]  }
  0x44   : > { %s8747_s30 = scalar_lea.hbm %s10696_s5, 6144 }
  0x45   : > { %p8748_p11 = scmp.ne.s32.totalorder %s10696_s5, %s8747_s30  ;;  %p8754_p0 = scmp.lt.u32.totalorder %s8747_s30, %s10696_s5 }
  0x47   : > { %p8750_p12 = pnand %p8748_p11, %p9191_p8 }
  0x49   : > { %p8751_p13 = pneg %p8750_p12 }
  0x4b   : > { %p8756_p2 = pnand %p8754_p0, %p8751_p13 }
  0x4d   : > { %8759 = shalt.err (!%p8756_p2)
}
  0x4e   : > { %s8760_s22 = scalar_lea.vmem %s9181_s25, 6144  ;;  %p8768_p3 = scmp.lt.s32.totalorder %s9181_s25, %s9181_s25 }
  0x4f   : > { %p8761_p5 = scmp.ne.s32.totalorder %s9181_s25, %s8760_s22  ;;  %p8769_p10 = scmp.lt.s32.totalorder %s8760_s22, %s8760_s22 }
  0x51   : > { %p8763_p7 = pnand %p8761_p5, %p9191_p8  ;;  %p8770_p11 = por %p8769_p10, %p8768_p3 }
  0x53   : > { %p8764_p9 = pneg %p8763_p7 }
  0x55   : > { %p8771_p12 = pnand %p8770_p11, %p8764_p9 }
  0x57   : > { %8774 = shalt.err (!%p8771_p12)
}
  0x58   : > { %8121 = dma.hbm_to_vmem [thread:$0]  (!%p9175_p6), %s10696_s5, 6144, %s9181_s25, [#allocation13], %s9064_s24, %s9064_s24, %s9065_s26  }
  0x59   : > { %s9066_s20 = smov [#allocation15]   ;;  %s9067_s29 = smov [#allocation3]  }
  0x5a   : > { %s375_s28 = sshll.u32 %s9066_s20, 4  ;;  %s290_s30 = sshll.u32 %s9067_s29, 4  ;;  %s376_s28 = int_to_ptr.vmem [resolvable:$true] %s375_s28  ;;  %s291_s30 = int_to_ptr.vmem [resolvable:$true] %s290_s30 }
  0x5b   : > { %s8775_s21 = scalar_lea.hbm %s10698_s7, 48 }
  0x5c   : > { %p8776_p13 = scmp.ne.s32.totalorder %s10698_s7, %s8775_s21  ;;  %p8782_p5 = scmp.lt.u32.totalorder %s8775_s21, %s10698_s7 }
  0x5e   : > { %p8778_p0 = pnand %p8776_p13, %p9191_p8 }
  0x60   : > { %p8779_p2 = pneg %p8778_p0 }
  0x62   : > { %p8784_p7 = pnand %p8782_p5, %p8779_p2 }
  0x64   : > { %8787 = shalt.err (!%p8784_p7)
}
  0x65   : > { %s8788_s25 = scalar_lea.vmem %s376_s28, 48  ;;  %s8795_s10 = scalar_lea.vmem %s376_s28, 64 }
  0x66   : > { %p8789_p9 = scmp.ne.s32.totalorder %s376_s28, %s8788_s25  ;;  %p8796_p11 = scmp.lt.s32.totalorder %s376_s28, %s376_s28 }
  0x67   : > { %p8797_p12 = scmp.lt.s32.totalorder %s8795_s10, %s8788_s25 }
  0x68   : > { %p8791_p3 = pnand %p8789_p9, %p9191_p8 }
  0x69   : > { %p8798_p1 = por %p8797_p12, %p8796_p11 }
  0x6a   : > { %p8792_p10 = pneg %p8791_p3 }
  0x6c   : > { %p8799_p4 = pnand %p8798_p1, %p8792_p10 }
  0x6e   : > { %8802 = shalt.err (!%p8799_p4)
}
  0x6f   : > { %8127 = dma.hbm_to_vmem [thread:$0]  (!%p9175_p6), %s10698_s7, 48, %s376_s28, [#allocation16]  }
  0x70   : > { %s10715_s0 = sld [smem:[#allocation29_spill]] }
  0x76   : > { %s8803_s17 = scalar_lea.hbm %s10715_s0, 128 }
  0x77   : > { %p8804_p13 = scmp.ne.s32.totalorder %s10715_s0, %s8803_s17  ;;  %p8810_p4 = scmp.lt.u32.totalorder %s8803_s17, %s10715_s0 }
  0x79   : > { %p8806_p0 = pnand %p8804_p13, %p9191_p8 }
  0x7b   : > { %p8807_p1 = pneg %p8806_p0 }
  0x7d   : > { %p8812_p2 = pnand %p8810_p4, %p8807_p1 }
  0x7f   : > { %8815 = shalt.err (!%p8812_p2)
}
  0x80   : > { %s8816_s25 = scalar_lea.vmem %s291_s30, 128  ;;  %p8824_p3 = scmp.lt.s32.totalorder %s291_s30, %s291_s30 }
  0x81   : > { %p8817_p5 = scmp.ne.s32.totalorder %s291_s30, %s8816_s25  ;;  %p8825_p10 = scmp.lt.s32.totalorder %s8816_s25, %s8816_s25 }
  0x83   : > { %p8819_p7 = pnand %p8817_p5, %p9191_p8  ;;  %p8826_p11 = por %p8825_p10, %p8824_p3 }
  0x85   : > { %p8820_p9 = pneg %p8819_p7 }
  0x87   : > { %p8827_p12 = pnand %p8826_p11, %p8820_p9 }
  0x89   : > { %8830 = shalt.err (!%p8827_p12)
}
  0x8a   : > { %8106 = dma.hbm_to_vmem [thread:$0]  (!%p9175_p6), %s10715_s0, 128, %s291_s30, [#allocation4]  }
  0x8b   : > { %s9068_s20 = smov [#allocation8]   ;;  %s9069_s1 = smov [#allocation11]  }
  0x8c   : > { %s313_s29 = sshll.u32 %s9068_s20, 4  ;;  %s338_s12 = sshll.u32 %s9069_s1, 4  ;;  %s314_s29 = int_to_ptr.vmem [resolvable:$true] %s313_s29  ;;  %s339_s12 = int_to_ptr.vmem [resolvable:$true] %s338_s12 }
  0x8d   : > { %s8831_s18 = scalar_lea.hbm %s10693_s2, 6144 }
  0x8e   : > { %p8832_p13 = scmp.ne.s32.totalorder %s10693_s2, %s8831_s18  ;;  %p8838_p4 = scmp.lt.u32.totalorder %s8831_s18, %s10693_s2 }
  0x90   : > { %p8834_p0 = pnand %p8832_p13, %p9191_p8 }
  0x92   : > { %p8835_p1 = pneg %p8834_p0 }
  0x94   : > { %p8840_p2 = pnand %p8838_p4, %p8835_p1 }
  0x96   : > { %8843 = shalt.err (!%p8840_p2)
}
  0x97   : > { %s8844_s30 = scalar_lea.vmem %s314_s29, 6144  ;;  %p8852_p3 = scmp.lt.s32.totalorder %s314_s29, %s314_s29 }
  0x98   : > { %p8845_p5 = scmp.ne.s32.totalorder %s314_s29, %s8844_s30  ;;  %p8853_p10 = scmp.lt.s32.totalorder %s8844_s30, %s8844_s30 }
  0x9a   : > { %p8847_p7 = pnand %p8845_p5, %p9191_p8  ;;  %p8854_p11 = por %p8853_p10, %p8852_p3 }
  0x9c   : > { %p8848_p9 = pneg %p8847_p7 }
  0x9e   : > { %p8855_p12 = pnand %p8854_p11, %p8848_p9 }
  0xa0   : > { %8858 = shalt.err (!%p8855_p12)
}
  0xa1   : > { %8112 = dma.hbm_to_vmem [thread:$0]  (!%p9175_p6), %s10693_s2, 6144, %s314_s29, [#allocation7], %s9064_s24, %s9064_s24, %s9065_s26  }
  0xa2   : > { %s8859_s21 = scalar_lea.hbm %s10695_s4, 48 }
  0xa3   : > { %p8860_p13 = scmp.ne.s32.totalorder %s10695_s4, %s8859_s21  ;;  %p8866_p4 = scmp.lt.u32.totalorder %s8859_s21, %s10695_s4 }
  0xa5   : > { %p8862_p0 = pnand %p8860_p13, %p9191_p8 }
  0xa7   : > { %p8863_p1 = pneg %p8862_p0 }
  0xa9   : > { %p8868_p2 = pnand %p8866_p4, %p8863_p1 }
  0xab   : > { %8871 = shalt.err (!%p8868_p2)
}
  0xac   : > { %s8872_s28 = scalar_lea.vmem %s339_s12, 48  ;;  %s8879_s29 = scalar_lea.vmem %s339_s12, 64 }
  0xad   : > { %p8873_p5 = scmp.ne.s32.totalorder %s339_s12, %s8872_s28  ;;  %p8880_p3 = scmp.lt.s32.totalorder %s339_s12, %s339_s12 }
  0xae   : > { %p8881_p10 = scmp.lt.s32.totalorder %s8879_s29, %s8872_s28 }
  0xaf   : > { %p8875_p7 = pnand %p8873_p5, %p9191_p8 }
  0xb0   : > { %p8882_p11 = por %p8881_p10, %p8880_p3 }
  0xb1   : > { %p8876_p9 = pneg %p8875_p7 }
  0xb3   : > { %p8883_p12 = pnand %p8882_p11, %p8876_p9 }
  0xb5   : > { %8886 = shalt.err (!%p8883_p12)
}
  0xb6   : > { %8118 = dma.hbm_to_vmem [thread:$0]  (!%p9175_p6), %s10695_s4, 48, %s339_s12, [#allocation10]  }
  0xb7   : > { %s9070_s20 = smov [#allocation14]   ;;  %s9071_s17 = smov [#allocation17]  }
  0xb8   : > { %s361_s1 = sshll.u32 %s9070_s20, 4  ;;  %s386_s21 = sshll.u32 %s9071_s17, 4  ;;  %s362_s1 = int_to_ptr.vmem [resolvable:$true] %s361_s1  ;;  %s387_s21 = int_to_ptr.vmem [resolvable:$true] %s386_s21 }
  0xb9   : > { %s8887_s27 = scalar_lea.hbm %s10697_s6, 6144 }
  0xba   : > { %p8888_p13 = scmp.ne.s32.totalorder %s10697_s6, %s8887_s27  ;;  %p8894_p4 = scmp.lt.u32.totalorder %s8887_s27, %s10697_s6 }
  0xbc   : > { %p8890_p0 = pnand %p8888_p13, %p9191_p8 }
  0xbe   : > { %p8891_p1 = pneg %p8890_p0 }
  0xc0   : > { %p8896_p2 = pnand %p8894_p4, %p8891_p1 }
  0xc2   : > { %8899 = shalt.err (!%p8896_p2)
}
  0xc3   : > { %s8900_s12 = scalar_lea.vmem %s362_s1, 6144  ;;  %p8908_p3 = scmp.lt.s32.totalorder %s362_s1, %s362_s1 }
  0xc4   : > { %p8901_p5 = scmp.ne.s32.totalorder %s362_s1, %s8900_s12  ;;  %p8909_p10 = scmp.lt.s32.totalorder %s8900_s12, %s8900_s12 }
  0xc6   : > { %p8903_p7 = pnand %p8901_p5, %p9191_p8  ;;  %p8910_p11 = por %p8909_p10, %p8908_p3 }
  0xc8   : > { %p8904_p9 = pneg %p8903_p7 }
  0xca   : > { %p8911_p12 = pnand %p8910_p11, %p8904_p9 }
  0xcc   : > { %8914 = shalt.err (!%p8911_p12)
}
  0xcd   : > { %8124 = dma.hbm_to_vmem [thread:$0]  (!%p9175_p6), %s10697_s6, 6144, %s362_s1, [#allocation13], %s9064_s24, %s9064_s24, %s9065_s26  }
  0xce   : > { %s8915_s22 = scalar_lea.hbm %s10699_s8, 48 }
  0xcf   : > { %p8916_p13 = scmp.ne.s32.totalorder %s10699_s8, %s8915_s22  ;;  %p8922_p4 = scmp.lt.u32.totalorder %s8915_s22, %s10699_s8 }
  0xd1   : > { %p8918_p0 = pnand %p8916_p13, %p9191_p8 }
  0xd3   : > { %p8919_p1 = pneg %p8918_p0 }
  0xd5   : > { %p8924_p2 = pnand %p8922_p4, %p8919_p1 }
  0xd7   : > { %8927 = shalt.err (!%p8924_p2)
}
  0xd8   : > { %s8928_s30 = scalar_lea.vmem %s387_s21, 48  ;;  %s8935_s24 = scalar_lea.vmem %s387_s21, 64 }
  0xd9   : > { %p8929_p5 = scmp.ne.s32.totalorder %s387_s21, %s8928_s30  ;;  %p8936_p3 = scmp.lt.s32.totalorder %s387_s21, %s387_s21 }
  0xda   : > { %p8937_p10 = scmp.lt.s32.totalorder %s8935_s24, %s8928_s30 }
  0xdb   : > { %p8931_p7 = pnand %p8929_p5, %p9191_p8 }
  0xdc   : > { %p8938_p11 = por %p8937_p10, %p8936_p3 }
  0xdd   : > { %p8932_p9 = pneg %p8931_p7 }
  0xdf   : > { %p8939_p12 = pnand %p8938_p11, %p8932_p9 }
  0xe1   : > { %8942 = shalt.err (!%p8939_p12)
}
  0xe2   : > { %8130 = dma.hbm_to_vmem [thread:$0]  (!%p9175_p6), %s10699_s8, 48, %s387_s21, [#allocation16]  }
  0xe3   : > { %s5899_s11 = sadd.s32 4294967294, %s9059_s16   ;;  %s9381_s23 = sadd.s32 1, %s9059_s16  }
  0xe4   : > { %s227_s12 = sadd.s32 1, %s9055_s15  ;;  %s224_s10 = ssub.s32 %s9059_s16, %s9381_s23 }
  0xe5   : > { %p234_p8 = scmp.ne.s32.totalorder %s9055_s15, %s9051_s14  ;;  %p225_p13 = scmp.eq.s32.totalorder %s224_s10, 0 }
  0xe6   : > { %p235_p0 = scmp.eq.s32.totalorder %s9059_s16, 0  ;;  %p240_p1 = scmp.ne.s32.totalorder %s9051_s14, %s9047_s13 }
  0xe7   : > { %p264_p4 = scmp.eq.s32.totalorder %s9159_s19, 5  ;;  %p10716_p5 = scmp.eq.s32.totalorder %s9159_s19, 0 }
  0xe8   : > { %s9393_s20 = scalar_select %p225_p13, %s9055_s15, %s227_s12  }
  0xe9   : > { %p236_p2 = por %p235_p0, %p234_p8  ;;  %p9397_p7 = por %p10716_p5, %p240_p1 }
  0xea   : > { %p9401_p6 = por %p264_p4, %p234_p8  ;;  %p270_p9 = scmp.eq.s32.totalorder %s5899_s11, 5 }
  0xeb   : > { %p8148_p3 = scmp.lt.s32.totalorder %s9059_s16, 6  ;;  %s397_s18 = sand.u32 1, %s9055_s15  }
  0xec   : > { %s10718_s21 = scalar_select %p9401_p6, 1, 0 }
  0xed   : > { %p9407_p10 = por %p270_p9, %p240_p1  ;;  %s8060_s27 = smul.u32 1728, %s397_s18 }
  0xee   : > { %p9411_p11 = pnand %p8148_p3, %p236_p2  ;;  %s6176_s28 = smul.u32 1728, %s9059_s16 }
  0xef   : > { %s10719_s22 = scalar_select %p9407_p10, 1, 0 }
  0xf0   : > { %s9419_s24 = scalar_lea.hbm %s10700_s9, %s6176_s28  ;;  %s401_s26 = scalar_lea.vmem [#allocation18], %s8060_s27 }
  0xf1   : > { %s408_s1 = sshll.u32 %s401_s26, 4  ;;  %s9423_s11 = scalar_lea.sflag [#allocation19], %s397_s18  ;;  %s9421_s1 = int_to_ptr.vmem [resolvable:$true] %s408_s1 }
  0xf2   : > { %s8943_s12 = scalar_lea.hbm %s9419_s24, 27648  ;;  %p8945_p8 = pneg %p9411_p11 }
  0xf3   : > { %p8944_p12 = scmp.ne.s32.totalorder %s9419_s24, %s8943_s12  ;;  %s8948_s29 = scalar_lea.hbm %s10700_s9, 165888 }
  0xf4   : > { %p8949_p1 = scmp.lt.u32.totalorder %s9419_s24, %s10700_s9  ;;  %p8950_p4 = scmp.lt.u32.totalorder %s8948_s29, %s8943_s12 }
  0xf5   : > { %p8946_p13 = pnand %p8945_p8, %p8944_p12  ;;  %p8952_p5 = scmp.lt.u32.totalorder %s8943_s12, %s9419_s24 }
  0xf6   : > { %p8951_p2 = por %p8950_p4, %p8949_p1 }
  0xf7   : > { %p8947_p0 = pneg %p8946_p13 }
  0xf8   : > { %p8953_p9 = por %p8952_p5, %p8951_p2 }
  0xfa   : > { %p8954_p3 = pnand %p8953_p9, %p8947_p0 }
  0xfc   : > { %8957 = shalt.err (!%p8954_p3)
}
  0xfd   : > { %s8958_s18 = scalar_lea.vmem %s9421_s1, 27648  ;;  %s9072_s27 = smov [#allocation18]  }
  0xfe   : > { %p8959_p12 = scmp.ne.s32.totalorder %s9421_s1, %s8958_s18  ;;  %s8963_s26 = sshll.u32 %s9072_s27, 4  ;;  %s8964_s26 = int_to_ptr.vmem [resolvable:$false] %s8963_s26 }
  0xff   : > { %s8965_s0 = scalar_lea.vmem %s8964_s26, 55296  ;;  %p8966_p6 = scmp.lt.s32.totalorder %s9421_s1, %s8964_s26 }
 0x100   : > { %p8961_p13 = pnand %p8959_p12, %p8945_p8  ;;  %p8967_p1 = scmp.lt.s32.totalorder %s8965_s0, %s8958_s18 }
 0x102   : > { %p8962_p10 = pneg %p8961_p13  ;;  %p8968_p4 = por %p8967_p1, %p8966_p6 }
 0x104   : > { %p8969_p2 = pnand %p8968_p4, %p8962_p10 }
 0x106   : > { %8972 = shalt.err (!%p8969_p2)
}
 0x107   : > { %s9073_s12 = smov 10368   ;;  %s9074_s10 = smov 1728  }
 0x108   : > { %s9075_s28 = smov 108   ;;  %s10721_s29 = sld [smem:[#allocation28_spill]] }
 0x109   : > { %8134 = dma.hbm_to_vmem [thread:$0]  (!%p9411_p11), %s9419_s24, 27648, %s9421_s1, %s9423_s11, %s9073_s12, %s9074_s10, %s9075_s28  }
 0x10e   : > { %p10722_p8 = scmp.ne.s32.totalorder %s10721_s29, 0 }
 0x10f   : > { %p10723_p0 = scmp.eq.s32.totalorder (!%p10722_p8), %s9159_s19, 0 }
 0x110   : > { %420 = sbr.rel (%p10722_p8) target bundleno = 5060 (0x13c4), region = 60 }
 0x117   : > { %9018 = dma.done.wait (%p10723_p0), [#allocation4], 128   ;;  %p10724_p5 = pmov %p10723_p0 }
 0x118   : > { %p10725_p6 = pmov %p10723_p0 }
 0x119   : > { %9020 = vsyncadd (%p10724_p5), [#allocation4], 4294967168 }
 0x11a   : > { %9022 = dma.done.wait (%p10725_p6), [#allocation7], 6912   ;;  %p10726_p10 = pmov %p10723_p0 }
 0x11b   : > { %p10727_p9 = pmov %p10723_p0 }
 0x11c   : > { %9024 = vsyncadd (%p10726_p10), [#allocation7], 4294960384 }
 0x11d   : > { %9026 = dma.done.wait (%p10727_p9), [#allocation10], 96   ;;  %p10728_p11 = pmov %p10723_p0 }
 0x11e   : > { %p10729_p3 = pmov %p10723_p0 }
 0x11f   : > { %9028 = vsyncadd (%p10728_p11), [#allocation10], 4294967200 }
 0x120   : > { %9030 = dma.done.wait (%p10729_p3), [#allocation13], 12288   ;;  %p10730_p12 = pmov %p10723_p0 }
 0x121   : > { %p10731_p13 = pmov %p10723_p0 }
 0x122   : > { %9032 = vsyncadd (%p10730_p12), [#allocation13], 4294955008 }
 0x123   : > { %9034 = dma.done.wait (%p10731_p13), [#allocation16], 96   ;;  %p10732_p1 = pmov %p10723_p0 }
 0x124   : > { %s9474_s25 = sand.u32 1, %s9051_s14  }
 0x125   : > { %9036 = vsyncadd (%p10732_p1), [#allocation16], 4294967200  ;;  %s8061_s24 = smul.u32 1728, %s9474_s25  ;;  %s459_s1 = scalar_lea.sflag [#allocation19], %s9474_s25 }
 0x127   : > { %s9478_s11 = scalar_lea.vmem [#allocation18], %s8061_s24 }
 0x128   : > { %9038 = dma.done.wait (%p9397_p7), %s459_s1, 27648  }
 0x129   : > { %9040 = vsyncadd (%p9397_p7), %s459_s1, 4294939648  ;;  %s8062_s30 = smul.u32 216, %s9474_s25  ;;  %p10733_p4 = scmp.ne.s32.totalorder %s9159_s19, 0 }
 0x12a   : > { %v507_v0 = vld [vmem:[#allocation6 + $0x8] sm:$0xff] (!%p10733_p4)  ;;  %v510_v1 = vld [vmem:[#allocation6 + $0x20] sm:$0xff] (!%p10733_p4)  ;;  %v509_v4 = vld [vmem:[#allocation6 + $0x18] sm:$0xff] (!%p10733_p4)  ;;  %v9076_v5 = vmov (!%p10733_p4), 0.0   ;;  %v9077_v7 = vmov (!%p10733_p4), 0.0|0.0   ;;  %vm9078_vm0 = vmmov (!%p10733_p4), 0  }
 0x12b   : > { %s9485_s18 = scalar_lea.vmem [#allocation20], %s8062_s30  ;;  %505 = sbr.rel (%p10733_p4) target bundleno = 4606 (0x11fe), region = 104  ;;  %v506_v2 = vld [vmem:[#allocation6] sm:$0xff] (!%p10733_p4)  ;;  %v7101_v3 = vpack.c.bf16 (!%p10733_p4), %v510_v1, %v507_v0  ;;  %647 = vmatprep.mubr.f32.mxu0 (!%p10733_p4), %v9076_v5  ;;  %v513_v6 = vld [vmem:[#allocation8 + $0x8] sm:$0xff] (!%p10733_p4)  ;;  %7105 = vmatprep.subr.bf16.mxu1 (!%p10733_p4), %v9077_v7  ;;  %v516_v9 = vld [vmem:[#allocation8 + $0x20] sm:$0xff] (!%p10733_p4)  ;;  %vm579_vm1 = vcmask (!%p10733_p4), 130048  }
 0x12c   : > { %v7103_v8 = vpack.c.bf16 (!%p10733_p4), %v509_v4, %v506_v2  ;;  %v512_v10 = vld [vmem:[#allocation8] sm:$0xff] (!%p10733_p4)  ;;  %v515_v11 = vld [vmem:[#allocation8 + $0x18] sm:$0xff] (!%p10733_p4)  ;;  %6483 = vmatprep.mubr.msk.f32.mxu1 (!%p10733_p4), %vm9078_vm0, %v9076_v5  ;;  %v9493_v12 = vpack.c.bf16 (!%p10733_p4), %v516_v9, %v513_v6  ;;  %v522_v14 = vld [vmem:[#allocation8 + $0x50] sm:$0xff] (!%p10733_p4) }
 0x12d   : > { %7102 = vmatprep.subr.bf16.mxu0 (!%p10733_p4), %v7101_v3  ;;  %v519_v13 = vld [vmem:[#allocation8 + $0x38] sm:$0xff] (!%p10733_p4)  ;;  %v562_v15 = vld [vmem:[#allocation3] sm:$0xff] (!%p10733_p4)  ;;  %v9495_v16 = vpack.c.bf16 (!%p10733_p4), %v515_v11, %v512_v10  ;;  %v518_v18 = vld [vmem:[#allocation8 + $0x30] sm:$0xff] (!%p10733_p4) }
 0x12e   : > { %7104 = vmatpush1.bf16.msra.mxu0 (!%p10733_p4), %v7103_v8  ;;  %v9498_v17 = vpack.c.bf16 (!%p10733_p4), %v522_v14, %v519_v13  ;;  %v521_v19 = vld [vmem:[#allocation8 + $0x48] sm:$0xff] (!%p10733_p4)  ;;  %v528_v21 = vld [vmem:[#allocation8 + $0x80] sm:$0xff] (!%p10733_p4)  ;;  %v527_v25 = vld [vmem:[#allocation8 + $0x78] sm:$0xff] (!%p10733_p4) }
 0x12f   : > { %7109 = vmatprep.subr.bf16.mxu0 (!%p10733_p4), %v9493_v12  ;;  %v525_v20 = vld [vmem:[#allocation8 + $0x68] sm:$0xff] (!%p10733_p4)  ;;  %v9502_v22 = vpack.c.bf16 (!%p10733_p4), %v521_v19, %v518_v18  ;;  %v524_v24 = vld [vmem:[#allocation8 + $0x60] sm:$0xff] (!%p10733_p4)  ;;  %v531_v27 = vld [vmem:[#allocation8 + $0x98] sm:$0xff] (!%p10733_p4) }
 0x130   : > { %v9506_v23 = vpack.c.bf16 (!%p10733_p4), %v528_v21, %v525_v20  ;;  %v508_v26 = vld [vmem:[#allocation6 + $0x10] sm:$0xff] (!%p10733_p4)  ;;  %v534_v28 = vld [vmem:[#allocation8 + $0xb0] sm:$0xff] (!%p10733_p4)  ;;  %v511_v29 = vld [vmem:[#allocation6 + $0x28] sm:$0xff] (!%p10733_p4)  ;;  %v9509_v31 = vpack.c.bf16 (!%p10733_p4), %v527_v25, %v524_v24 }
 0x131   : > { %5923 = vmatmul.mubr.msk.f32.vlgmr.msra.gmra.mrb[0].mxu0 (!%p10733_p4), %vm579_vm1, %v562_v15  ;;  %v7106_v30 = vpack.c.bf16 (!%p10733_p4), %v511_v29, %v508_v26  ;;  %v514_v32 = vld [vmem:[#allocation8 + $0x10] sm:$0xff] (!%p10733_p4)  ;;  %v517_v33 = vld [vmem:[#allocation8 + $0x28] sm:$0xff] (!%p10733_p4)  ;;  %v9512_v34 = vpack.c.bf16 (!%p10733_p4), %v534_v28, %v531_v27  ;;  %v540_v39 = vld [vmem:[#allocation8 + $0xe0] sm:$0xff] (!%p10733_p4) }
 0x132   : > { %7111 = vmatpush1.bf16.msra.mxu0 %v9495_v16  ;;  %804 = vmatprep.mubr.f32.mxu0 %v9076_v5  ;;  %v530_v35 = vld [vmem:[#allocation8 + $0x90] sm:$0xff]  ;;  %v533_v36 = vld [vmem:[#allocation8 + $0xa8] sm:$0xff]  ;;  %v9514_v38 = vpack.c.bf16 %v517_v33, %v514_v32  ;;  %v520_v40 = vld [vmem:[#allocation8 + $0x40] sm:$0xff]  ;;  %v564_v32 = vlaneseq }
 0x133   : > { %7113 = vmatprep.subr.bf16.mxu0 %v9498_v17  ;;  %v537_v37 = vld [vmem:[#allocation8 + $0xc8] sm:$0xff]  ;;  %7107 = vmatpush3.bf16.msra.mxu1 %v7106_v30  ;;  %v523_v41 = vld [vmem:[#allocation8 + $0x58] sm:$0xff]  ;;  %v9518_v42 = vpack.c.bf16 %v533_v36, %v530_v35  ;;  %v536_v44 = vld [vmem:[#allocation8 + $0xc0] sm:$0xff] }
 0x134   : > { %7140 = vmatprep.subr.bf16.mxu1 %v9077_v7  ;;  %v9522_v43 = vpack.c.bf16 %v540_v39, %v537_v37  ;;  %v539_v45 = vld [vmem:[#allocation8 + $0xd8] sm:$0xff]  ;;  %v9525_v47 = vpack.c.bf16 %v523_v41, %v520_v40  ;;  %v546_v48 = vld [vmem:[#allocation8 + $0x110] sm:$0xff]  ;;  %v529_v50 = vld [vmem:[#allocation8 + $0x88] sm:$0xff]  ;;  %v565_v33 = vshrl.u32 %v564_v32, 7 }
 0x135   : > { %v543_v46 = vld [vmem:[#allocation8 + $0xf8] sm:$0xff]  ;;  %v526_v49 = vld [vmem:[#allocation8 + $0x70] sm:$0xff]  ;;  %v9531_v51 = vpack.c.bf16 %v539_v45, %v536_v44  ;;  %v545_v54 = vld [vmem:[#allocation8 + $0x108] sm:$0xff] }
 0x136   : > { %7115 = vmatpush1.bf16.msra.mxu0 %v9502_v22  ;;  %6484 = vmatmul.mubr.msk.f32.vlgmr.msra.gmra.mrb[0].mxu1 %vm579_vm1, %v562_v15  ;;  %v9534_v52 = vpack.c.bf16 %v546_v48, %v543_v46  ;;  %v542_v53 = vld [vmem:[#allocation8 + $0xf0] sm:$0xff]  ;;  %v549_v55 = vld [vmem:[#allocation8 + $0x128] sm:$0xff]  ;;  %v9537_v56 = vpack.c.bf16 %v529_v50, %v526_v49  ;;  %v552_v57 = vld [vmem:[#allocation8 + $0x140] sm:$0xff]  ;;  %v9617_v35 = vsub.s32 0, %v565_v33  ;;  %v9619_v39 = vsub.s32 1, %v565_v33 }
 0x137   : > { %7117 = vmatprep.subr.bf16.mxu0 %v9506_v23  ;;  %7142 = vmatpush3.bf16.msra.mxu1 %v9514_v38  ;;  %v532_v58 = vld [vmem:[#allocation8 + $0xa0] sm:$0xff]  ;;  %v535_v59 = vld [vmem:[#allocation8 + $0xb8] sm:$0xff]  ;;  %v9541_v60 = vpack.c.bf16 %v545_v54, %v542_v53  ;;  %v9544_v61 = vpack.c.bf16 %v552_v57, %v549_v55  ;;  %v558_v2 = vld [vmem:[#allocation8 + $0x170] sm:$0xff] }
 0x138   : > { %7143 = vmatprep.subr.bf16.mxu1 %v9077_v7  ;;  %6518 = vmatprep.mubr.msk.f32.mxu1 %vm9078_vm0, %v9076_v5  ;;  %v548_v62 = vld [vmem:[#allocation8 + $0x120] sm:$0xff]  ;;  %v551_v63 = vld [vmem:[#allocation8 + $0x138] sm:$0xff]  ;;  %v9547_v1 = vpack.c.bf16 %v535_v59, %v532_v58  ;;  %v538_v3 = vld [vmem:[#allocation8 + $0xd0] sm:$0xff] }
 0x139   : > { %v555_v0 = vld [vmem:[#allocation8 + $0x158] sm:$0xff]  ;;  %v541_v4 = vld [vmem:[#allocation8 + $0xe8] sm:$0xff]  ;;  %v9551_v6 = vpack.c.bf16 %v551_v63, %v548_v62  ;;  %v554_v9 = vld [vmem:[#allocation8 + $0x150] sm:$0xff] }
 0x13a   : > { %7119 = vmatpush1.bf16.msra.mxu0 %v9509_v31  ;;  %v9554_v8 = vpack.c.bf16 %v558_v2, %v555_v0  ;;  %v557_v10 = vld [vmem:[#allocation8 + $0x168] sm:$0xff]  ;;  %v9557_v11 = vpack.c.bf16 %v541_v4, %v538_v3  ;;  %v544_v13 = vld [vmem:[#allocation8 + $0x100] sm:$0xff]  ;;  %v547_v14 = vld [vmem:[#allocation8 + $0x118] sm:$0xff]  ;;  %v9637_v3 = vsub.s32 2, %v565_v33 }
 0x13b   : > { %7121 = vmatprep.subr.bf16.mxu0 %v9512_v34  ;;  %7145 = vmatpush3.bf16.msra.mxu1 %v9525_v47  ;;  %v9561_v15 = vpack.c.bf16 %v557_v10, %v554_v9  ;;  %v9565_v18 = vpack.c.bf16 %v547_v14, %v544_v13  ;;  %v550_v19 = vld [vmem:[#allocation8 + $0x130] sm:$0xff]  ;;  %v553_v20 = vld [vmem:[#allocation8 + $0x148] sm:$0xff]  ;;  %v556_v24 = vld [vmem:[#allocation8 + $0x160] sm:$0xff] }
 0x13c   : > { %7146 = vmatprep.subr.bf16.mxu1 %v9077_v7  ;;  %v9570_v21 = vpack.c.bf16 %v553_v20, %v550_v19  ;;  %v559_v25 = vld [vmem:[#allocation8 + $0x178] sm:$0xff]  ;;  %v560_v36 = vld [vmem:[#allocation9] sm:$0x7]  ;;  %v561_v37 = vld [vmem:[#allocation11] sm:$0x7] }
 0x13d   : > { %v9578_v26 = vpack.c.bf16 %v559_v25, %v556_v24  ;;  %v567_v40 = vrot.slane %v560_v36, %v9617_v35  ;;  %v9623_v41 = vrot.slane %v561_v37, %v9617_v35  ;;  %v9626_v44 = vrot.slane %v561_v37, %v9619_v39 }
 0x13e   : > { %7123 = vmatpush1.bf16.msra.mxu0 %v9518_v42  ;;  %v571_v45 = vrot.slane %v560_v36, %v9619_v39  ;;  %v9640_v4 = vrot.slane %v561_v37, %v9637_v3  ;;  %v575_v10 = vrot.slane %v560_v36, %v9637_v3 }
 0x13f   : > { %7125 = vmatprep.subr.bf16.mxu0 %v9522_v43  ;;  %7148 = vmatpush3.bf16.msra.mxu1 %v9537_v56 }
 0x140   : > { %7149 = vmatprep.subr.bf16.mxu1 %v9077_v7 }
 0x142   : > { %7127 = vmatpush1.bf16.msra.mxu0 %v9531_v51 }
 0x143   : > { %7129 = vmatprep.subr.bf16.mxu0 %v9534_v52  ;;  %7151 = vmatpush3.bf16.msra.mxu1 %v9547_v1 }
 0x144   : > { %7152 = vmatprep.subr.bf16.mxu1 %v9077_v7 }
 0x146   : > { %7131 = vmatpush1.bf16.msra.mxu0 %v9541_v60 }
 0x147   : > { %7133 = vmatprep.subr.bf16.mxu0 %v9544_v61  ;;  %7154 = vmatpush3.bf16.msra.mxu1 %v9557_v11 }
 0x148   : > { %7155 = vmatprep.subr.bf16.mxu1 %v9077_v7 }
 0x14a   : > { %7135 = vmatpush1.bf16.msra.mxu0 %v9551_v6 }
 0x14b   : > { %7137 = vmatprep.subr.bf16.mxu0 %v9554_v8  ;;  %7157 = vmatpush3.bf16.msra.mxu1 %v9565_v18 }
 0x14c   : > { %7158 = vmatprep.subr.bf16.mxu1 %v9077_v7 }
 0x14e   : > { %7139 = vmatpush1.bf16.msra.mxu0 %v9561_v15 }
 0x14f   : > { %7165 = vmatprep.subr.bf16.mxu0 %v9493_v12  ;;  %7160 = vmatpush3.bf16.msra.mxu1 %v9570_v21 }
 0x150   : > { %7161 = vmatprep.subr.bf16.mxu1 %v9077_v7 }
 0x151   : > { %805 = vmatmul.mubr.f32.vlgmr.msra.gmra.mrb[2].mxu0 %v9076_v5 }
 0x152   : > { %7167 = vmatpush1.bf16.msra.mxu0 %v9495_v16  ;;  %967 = vmatprep.mubr.f32.mxu0 %v9076_v5 }
 0x153   : > { %7169 = vmatprep.subr.bf16.mxu0 %v9498_v17  ;;  %7163 = vmatpush3.bf16.msra.mxu1 %v9578_v26 }
 0x154   : > { %7196 = vmatprep.subr.bf16.mxu1 %v9077_v7 }
 0x156   : > { %7171 = vmatpush1.bf16.msra.mxu0 %v9502_v22  ;;  %6519 = vmatmul.mubr.f32.vlgmr.msra.gmra.mrb[2].mxu1 %v9076_v5 }
 0x157   : > { %7173 = vmatprep.subr.bf16.mxu0 %v9506_v23  ;;  %7198 = vmatpush3.bf16.msra.mxu1 %v9514_v38 }
 0x158   : > { %7199 = vmatprep.subr.bf16.mxu1 %v9077_v7  ;;  %6553 = vmatprep.mubr.msk.f32.mxu1 %vm9078_vm0, %v9076_v5 }
 0x15a   : > { %7175 = vmatpush1.bf16.msra.mxu0 %v9509_v31 }
 0x15b   : > { %7177 = vmatprep.subr.bf16.mxu0 %v9512_v34  ;;  %7201 = vmatpush3.bf16.msra.mxu1 %v9525_v47 }
 0x15c   : > { %7202 = vmatprep.subr.bf16.mxu1 %v9077_v7 }
 0x15e   : > { %7179 = vmatpush1.bf16.msra.mxu0 %v9518_v42 }
 0x15f   : > { %7181 = vmatprep.subr.bf16.mxu0 %v9522_v43  ;;  %7204 = vmatpush3.bf16.msra.mxu1 %v9537_v56 }
 0x160   : > { %7205 = vmatprep.subr.bf16.mxu1 %v9077_v7 }
 0x162   : > { %7183 = vmatpush1.bf16.msra.mxu0 %v9531_v51 }
 0x163   : > { %7185 = vmatprep.subr.bf16.mxu0 %v9534_v52  ;;  %7207 = vmatpush3.bf16.msra.mxu1 %v9547_v1 }
 0x164   : > { %7208 = vmatprep.subr.bf16.mxu1 %v9077_v7 }
 0x166   : > { %7187 = vmatpush1.bf16.msra.mxu0 %v9541_v60 }
 0x167   : > { %7189 = vmatprep.subr.bf16.mxu0 %v9544_v61  ;;  %7210 = vmatpush3.bf16.msra.mxu1 %v9557_v11 }
 0x168   : > { %7211 = vmatprep.subr.bf16.mxu1 %v9077_v7 }
 0x16a   : > { %7191 = vmatpush1.bf16.msra.mxu0 %v9551_v6 }
 0x16b   : > { %7193 = vmatprep.subr.bf16.mxu0 %v9554_v8  ;;  %7213 = vmatpush3.bf16.msra.mxu1 %v9565_v18 }
 0x16c   : > { %7214 = vmatprep.subr.bf16.mxu1 %v9077_v7 }
 0x16e   : > { %7195 = vmatpush1.bf16.msra.mxu0 %v9561_v15 }
 0x16f   : > { %7221 = vmatprep.subr.bf16.mxu0 %v9493_v12  ;;  %7216 = vmatpush3.bf16.msra.mxu1 %v9570_v21 }
 0x170   : > { %7217 = vmatprep.subr.bf16.mxu1 %v9077_v7 }
 0x173   : > { %7219 = vmatpush3.bf16.msra.mxu1 %v9578_v26 }
 0x174   : > { %7252 = vmatprep.subr.bf16.mxu1 %v9077_v7 }
 0x204   : > { %v649_v27 = vpop.f32.mrb[0].mxu0 }
 0x205   : > { %v651_v28 = vpop.f32.mrb[1].mxu0  ;;  %v9629_v48 = vadd.f32 %v649_v27, %v567_v40 }
 0x206   : > { %v9634_v55 = vadd.f32 %v651_v28, %v571_v45 }
 0x209   : > { %v720_v29 = vpop.f32.mrb[0].mxu1 }
 0x20a   : > { %v6485_v30 = vpop.f32.mrb[1].mxu1  ;;  %v9644_v20 = vadd.f32 %v720_v29, %v575_v10 }
 0x224   : > { %v806_v46 = vpop.f32.mrb[2].mxu0 }
 0x225   : > { %v807_v49 = vadd.f32 %v806_v46, %v9623_v41  ;;  %v808_v50 = vpop.f32.mrb[3].mxu0 }
 0x226   : > { %v809_v53 = vadd.f32 %v808_v50, %v9626_v44 }
 0x227   : > { %v881_v54 = vadd.f32 %v807_v49, %v9629_v48 }
 0x228   : > { %v888_v58 = vadd.f32 %v809_v53, %v9634_v55 }
 0x229   : > { %v5925_v57 = vmul.f32 -1.442695, %v881_v54  ;;  %v877_v59 = vpop.f32.mrb[2].mxu1 }
 0x22a   : > { %v5926_v62 = vmul.f32 -1.442695, %v888_v58  ;;  %v6520_v63 = vpop.f32.mrb[3].mxu1  ;;  %v878_v14 = vadd.f32 %v877_v59, %v9640_v4 }
 0x22b   : > { %8211 = vpow2.f32 %v5925_v57 }
 0x22c   : > { %8213 = vpow2.f32 %v5926_v62 }
 0x235   : > { %v8212_v0 = vpop.eup %8211 }
 0x236   : > { %v885_v2 = vadd.f32 1.0, %v8212_v0  ;;  %v8214_v9 = vpop.eup %8213 }
 0x237   : > { %v892_v13 = vadd.f32 1.0, %v8214_v9 }
 0x238   : > { %8215 = vrcp.f32 %v885_v2 }
 0x239   : > { %8217 = vrcp.f32 %v892_v13 }
 0x242   : > { %v8216_v19 = vpop.eup %8215 }
 0x243   : > { %v895_v24 = vmul.f32 %v8216_v19, %v878_v14  ;;  %v8218_v27 = vpop.eup %8217 }
 0x244   : > { %v898_v28 = vsub.f32 1.0, %v8218_v27  ;;  %v900_v33 = vmul.f32 0.0, %v8218_v27 }
 0x245   : > { %v896_v25 = vadd.f32 %v895_v24, %v9644_v20 }
 0x247   : > { %8219 = vtanh.f32 %v896_v25 }
 0x251   : > { %v8220_v30 = vpop.eup %8219 }
 0x252   : > { %v899_v32 = vmul.f32 %v8220_v30, %v898_v28 }
 0x254   : > { %v9647_v37 = vadd.f32 %v900_v33, %v899_v32 }
 0x256   : > { %902 = vst [vmem:[#allocation2] sm:$0x1] %v9647_v37  ;;  %968 = vmatmul.mubr.f32.vlgmr.msra.gmra.mrb[4].mxu0 %v9647_v37  ;;  %6554 = vmatmul.mubr.f32.vlgmr.msra.gmra.mrb[4].mxu1 %v9647_v37  ;;  %v1073_v14 = vrot.slane %v9647_v37, 7 }
 0x257   : > { %7223 = vmatpush1.bf16.msra.mxu0 %v9495_v16  ;;  %7254 = vmatpush3.bf16.msra.mxu1 %v9514_v38 }
 0x258   : > { %7225 = vmatprep.subr.bf16.mxu0 %v9498_v17  ;;  %7255 = vmatprep.subr.bf16.mxu1 %v9077_v7 }
 0x259   : > { %1145 = vmatprep.mubr.f32.mxu0 %v9076_v5  ;;  %6588 = vmatprep.mubr.msk.f32.mxu1 %vm9078_vm0, %v9076_v5 }
 0x25b   : > { %7227 = vmatpush1.bf16.msra.mxu0 %v9502_v22  ;;  %7257 = vmatpush3.bf16.msra.mxu1 %v9525_v47 }
 0x25c   : > { %7229 = vmatprep.subr.bf16.mxu0 %v9506_v23  ;;  %7258 = vmatprep.subr.bf16.mxu1 %v9077_v7 }
 0x25f   : > { %7231 = vmatpush1.bf16.msra.mxu0 %v9509_v31  ;;  %7260 = vmatpush3.bf16.msra.mxu1 %v9537_v56 }
 0x260   : > { %7233 = vmatprep.subr.bf16.mxu0 %v9512_v34  ;;  %7261 = vmatprep.subr.bf16.mxu1 %v9077_v7 }
 0x263   : > { %7235 = vmatpush1.bf16.msra.mxu0 %v9518_v42  ;;  %7263 = vmatpush3.bf16.msra.mxu1 %v9547_v1 }
 0x264   : > { %7237 = vmatprep.subr.bf16.mxu0 %v9522_v43  ;;  %7264 = vmatprep.subr.bf16.mxu1 %v9077_v7 }
 0x267   : > { %7239 = vmatpush1.bf16.msra.mxu0 %v9531_v51  ;;  %7266 = vmatpush3.bf16.msra.mxu1 %v9557_v11 }
 0x268   : > { %7241 = vmatprep.subr.bf16.mxu0 %v9534_v52  ;;  %7267 = vmatprep.subr.bf16.mxu1 %v9077_v7 }
 0x26b   : > { %7243 = vmatpush1.bf16.msra.mxu0 %v9541_v60  ;;  %7269 = vmatpush3.bf16.msra.mxu1 %v9565_v18 }
 0x26c   : > { %7245 = vmatprep.subr.bf16.mxu0 %v9544_v61  ;;  %7270 = vmatprep.subr.bf16.mxu1 %v9077_v7 }
 0x26f   : > { %7247 = vmatpush1.bf16.msra.mxu0 %v9551_v6  ;;  %7272 = vmatpush3.bf16.msra.mxu1 %v9570_v21 }
 0x270   : > { %7249 = vmatprep.subr.bf16.mxu0 %v9554_v8  ;;  %7273 = vmatprep.subr.bf16.mxu1 %v9077_v7 }
 0x273   : > { %7251 = vmatpush1.bf16.msra.mxu0 %v9561_v15  ;;  %7275 = vmatpush3.bf16.msra.mxu1 %v9578_v26 }
 0x274   : > { %7277 = vmatprep.subr.bf16.mxu0 %v9493_v12  ;;  %7308 = vmatprep.subr.bf16.mxu1 %v9077_v7 }
 0x329   : > { %v969_v29 = vpop.f32.mrb[4].mxu0  ;;  %v1040_v36 = vpop.f32.mrb[4].mxu1 }
 0x32a   : > { %v970_v40 = vadd.f32 %v969_v29, %v9623_v41  ;;  %v971_v45 = vpop.f32.mrb[5].mxu0  ;;  %v6555_v46 = vpop.f32.mrb[5].mxu1  ;;  %v1041_v9 = vadd.f32 %v1040_v36, %v9640_v4 }
 0x32b   : > { %v972_v49 = vadd.f32 %v971_v45, %v9626_v44 }
 0x32c   : > { %v1045_v50 = vrot.slane %v970_v40, 7  ;;  %v1065_v10 = vrot.slane %v1041_v9, 7 }
 0x32d   : > { %v1055_v53 = vrot.slane %v972_v49, 7 }
 0x32e   : > { %v1047_v54 = vadd.f32 %v1045_v50, %v9629_v48 }
 0x32f   : > { %v1057_v57 = vadd.f32 %v1055_v53, %v9634_v55 }
 0x330   : > { %v5927_v58 = vmul.f32 -1.442695, %v1047_v54 }
 0x331   : > { %v5928_v59 = vmul.f32 -1.442695, %v1057_v57 }
 0x332   : > { %8221 = vpow2.f32 %v5927_v58 }
 0x333   : > { %8223 = vpow2.f32 %v5928_v59 }
 0x33c   : > { %v8222_v62 = vpop.eup %8221 }
 0x33d   : > { %v8224_v63 = vpop.eup %8223  ;;  %v1051_v0 = vadd.f32 1.0, %v8222_v62 }
 0x33e   : > { %v1061_v2 = vadd.f32 1.0, %v8224_v63 }
 0x33f   : > { %8225 = vrcp.f32 %v1051_v0 }
 0x340   : > { %8227 = vrcp.f32 %v1061_v2 }
 0x349   : > { %v8226_v13 = vpop.eup %8225 }
 0x34a   : > { %v8228_v19 = vpop.eup %8227  ;;  %v1067_v24 = vmul.f32 %v8226_v13, %v1065_v10 }
 0x34b   : > { %v1075_v25 = vmul.f32 %v8228_v19, %v1073_v14  ;;  %v1070_v28 = vsub.f32 1.0, %v8228_v19 }
 0x34c   : > { %v1068_v27 = vadd.f32 %v1067_v24, %v9644_v20 }
 0x34e   : > { %8229 = vtanh.f32 %v1068_v27 }
 0x358   : > { %v8230_v30 = vpop.eup %8229 }
 0x359   : > { %v1071_v32 = vmul.f32 %v8230_v30, %v1070_v28 }
 0x35b   : > { %v9694_v33 = vadd.f32 %v1075_v25, %v1071_v32 }
 0x35d   : > { %1077 = vst [vmem:[#allocation2] sm:$0x2] %v9694_v33  ;;  %v1079_v29 = vrot.slane %v9694_v33, 1  ;;  %v1250_v14 = vrot.slane %v9694_v33, 7 }
 0x35f   : > { %1146 = vmatmul.mubr.f32.vlgmr.msra.gmra.mrb[6].mxu0 %v1079_v29  ;;  %6589 = vmatmul.mubr.f32.vlgmr.msra.gmra.mrb[6].mxu1 %v1079_v29 }
 0x360   : > { %7279 = vmatpush1.bf16.msra.mxu0 %v9495_v16  ;;  %7310 = vmatpush3.bf16.msra.mxu1 %v9514_v38 }
 0x361   : > { %7281 = vmatprep.subr.bf16.mxu0 %v9498_v17  ;;  %7311 = vmatprep.subr.bf16.mxu1 %v9077_v7 }
 0x362   : > { %1322 = vmatprep.mubr.f32.mxu0 %v9076_v5  ;;  %6623 = vmatprep.mubr.msk.f32.mxu1 %vm9078_vm0, %v9076_v5 }
 0x364   : > { %7283 = vmatpush1.bf16.msra.mxu0 %v9502_v22  ;;  %7313 = vmatpush3.bf16.msra.mxu1 %v9525_v47 }
 0x365   : > { %7285 = vmatprep.subr.bf16.mxu0 %v9506_v23  ;;  %7314 = vmatprep.subr.bf16.mxu1 %v9077_v7 }
 0x368   : > { %7287 = vmatpush1.bf16.msra.mxu0 %v9509_v31  ;;  %7316 = vmatpush3.bf16.msra.mxu1 %v9537_v56 }
 0x369   : > { %7289 = vmatprep.subr.bf16.mxu0 %v9512_v34  ;;  %7317 = vmatprep.subr.bf16.mxu1 %v9077_v7 }
 0x36c   : > { %7291 = vmatpush1.bf16.msra.mxu0 %v9518_v42  ;;  %7319 = vmatpush3.bf16.msra.mxu1 %v9547_v1 }
 0x36d   : > { %7293 = vmatprep.subr.bf16.mxu0 %v9522_v43  ;;  %7320 = vmatprep.subr.bf16.mxu1 %v9077_v7 }
 0x370   : > { %7295 = vmatpush1.bf16.msra.mxu0 %v9531_v51  ;;  %7322 = vmatpush3.bf16.msra.mxu1 %v9557_v11 }
 0x371   : > { %7297 = vmatprep.subr.bf16.mxu0 %v9534_v52  ;;  %7323 = vmatprep.subr.bf16.mxu1 %v9077_v7 }
 0x374   : > { %7299 = vmatpush1.bf16.msra.mxu0 %v9541_v60  ;;  %7325 = vmatpush3.bf16.msra.mxu1 %v9565_v18 }
 0x375   : > { %7301 = vmatprep.subr.bf16.mxu0 %v9544_v61  ;;  %7326 = vmatprep.subr.bf16.mxu1 %v9077_v7 }
 0x378   : > { %7303 = vmatpush1.bf16.msra.mxu0 %v9551_v6  ;;  %7328 = vmatpush3.bf16.msra.mxu1 %v9570_v21 }
 0x379   : > { %7305 = vmatprep.subr.bf16.mxu0 %v9554_v8  ;;  %7329 = vmatprep.subr.bf16.mxu1 %v9077_v7 }
 0x37c   : > { %7307 = vmatpush1.bf16.msra.mxu0 %v9561_v15  ;;  %7331 = vmatpush3.bf16.msra.mxu1 %v9578_v26 }
 0x37d   : > { %7333 = vmatprep.subr.bf16.mxu0 %v9493_v12  ;;  %7364 = vmatprep.subr.bf16.mxu1 %v9077_v7 }
 0x432   : > { %v1147_v37 = vpop.f32.mrb[6].mxu0  ;;  %v1218_v36 = vpop.f32.mrb[6].mxu1 }
 0x433   : > { %v1148_v40 = vadd.f32 %v1147_v37, %v9623_v41  ;;  %v1149_v45 = vpop.f32.mrb[7].mxu0  ;;  %v6590_v46 = vpop.f32.mrb[7].mxu1  ;;  %v1219_v9 = vadd.f32 %v1218_v36, %v9640_v4 }
 0x434   : > { %v1150_v49 = vadd.f32 %v1149_v45, %v9626_v44 }
 0x435   : > { %v1223_v50 = vrot.slane %v1148_v40, 6  ;;  %v1243_v10 = vrot.slane %v1219_v9, 6 }
 0x436   : > { %v1233_v53 = vrot.slane %v1150_v49, 6 }
 0x437   : > { %v1225_v54 = vadd.f32 %v1223_v50, %v9629_v48 }
 0x438   : > { %v1235_v57 = vadd.f32 %v1233_v53, %v9634_v55 }
 0x439   : > { %v5929_v58 = vmul.f32 -1.442695, %v1225_v54 }
 0x43a   : > { %v5930_v59 = vmul.f32 -1.442695, %v1235_v57 }
 0x43b   : > { %8231 = vpow2.f32 %v5929_v58 }
 0x43c   : > { %8233 = vpow2.f32 %v5930_v59 }
 0x445   : > { %v8232_v62 = vpop.eup %8231 }
 0x446   : > { %v8234_v63 = vpop.eup %8233  ;;  %v1229_v0 = vadd.f32 1.0, %v8232_v62 }
 0x447   : > { %v1239_v2 = vadd.f32 1.0, %v8234_v63 }
 0x448   : > { %8235 = vrcp.f32 %v1229_v0 }
 0x449   : > { %8237 = vrcp.f32 %v1239_v2 }
 0x452   : > { %v8236_v13 = vpop.eup %8235 }
 0x453   : > { %v8238_v19 = vpop.eup %8237  ;;  %v1245_v24 = vmul.f32 %v8236_v13, %v1243_v10 }
 0x454   : > { %v1252_v25 = vmul.f32 %v8238_v19, %v1250_v14  ;;  %v1248_v28 = vsub.f32 1.0, %v8238_v19 }
 0x455   : > { %v1246_v27 = vadd.f32 %v1245_v24, %v9644_v20 }
 0x457   : > { %8239 = vtanh.f32 %v1246_v27 }
 0x461   : > { %v8240_v30 = vpop.eup %8239 }
 0x462   : > { %v1249_v32 = vmul.f32 %v8240_v30, %v1248_v28 }
 0x464   : > { %v9740_v29 = vadd.f32 %v1252_v25, %v1249_v32 }
 0x466   : > { %1254 = vst [vmem:[#allocation2] sm:$0x4] %v9740_v29  ;;  %v1256_v37 = vrot.slane %v9740_v29, 2  ;;  %v1427_v14 = vrot.slane %v9740_v29, 7 }
 0x468   : > { %1323 = vmatmul.mubr.f32.vlgmr.msra.gmra.mrb[8].mxu0 %v1256_v37  ;;  %6624 = vmatmul.mubr.f32.vlgmr.msra.gmra.mrb[8].mxu1 %v1256_v37 }
 0x469   : > { %7335 = vmatpush1.bf16.msra.mxu0 %v9495_v16  ;;  %7366 = vmatpush3.bf16.msra.mxu1 %v9514_v38 }
 0x46a   : > { %7337 = vmatprep.subr.bf16.mxu0 %v9498_v17  ;;  %7367 = vmatprep.subr.bf16.mxu1 %v9077_v7 }
 0x46b   : > { %1499 = vmatprep.mubr.f32.mxu0 %v9076_v5  ;;  %6658 = vmatprep.mubr.msk.f32.mxu1 %vm9078_vm0, %v9076_v5 }
 0x46d   : > { %7339 = vmatpush1.bf16.msra.mxu0 %v9502_v22  ;;  %7369 = vmatpush3.bf16.msra.mxu1 %v9525_v47 }
 0x46e   : > { %7341 = vmatprep.subr.bf16.mxu0 %v9506_v23  ;;  %7370 = vmatprep.subr.bf16.mxu1 %v9077_v7 }
 0x471   : > { %7343 = vmatpush1.bf16.msra.mxu0 %v9509_v31  ;;  %7372 = vmatpush3.bf16.msra.mxu1 %v9537_v56 }
 0x472   : > { %7345 = vmatprep.subr.bf16.mxu0 %v9512_v34  ;;  %7373 = vmatprep.subr.bf16.mxu1 %v9077_v7 }
 0x475   : > { %7347 = vmatpush1.bf16.msra.mxu0 %v9518_v42  ;;  %7375 = vmatpush3.bf16.msra.mxu1 %v9547_v1 }
 0x476   : > { %7349 = vmatprep.subr.bf16.mxu0 %v9522_v43  ;;  %7376 = vmatprep.subr.bf16.mxu1 %v9077_v7 }
 0x479   : > { %7351 = vmatpush1.bf16.msra.mxu0 %v9531_v51  ;;  %7378 = vmatpush3.bf16.msra.mxu1 %v9557_v11 }
 0x47a   : > { %7353 = vmatprep.subr.bf16.mxu0 %v9534_v52  ;;  %7379 = vmatprep.subr.bf16.mxu1 %v9077_v7 }
 0x47d   : > { %7355 = vmatpush1.bf16.msra.mxu0 %v9541_v60  ;;  %7381 = vmatpush3.bf16.msra.mxu1 %v9565_v18 }
 0x47e   : > { %7357 = vmatprep.subr.bf16.mxu0 %v9544_v61  ;;  %7382 = vmatprep.subr.bf16.mxu1 %v9077_v7 }
 0x481   : > { %7359 = vmatpush1.bf16.msra.mxu0 %v9551_v6  ;;  %7384 = vmatpush3.bf16.msra.mxu1 %v9570_v21 }
 0x482   : > { %7361 = vmatprep.subr.bf16.mxu0 %v9554_v8  ;;  %7385 = vmatprep.subr.bf16.mxu1 %v9077_v7 }
 0x485   : > { %7363 = vmatpush1.bf16.msra.mxu0 %v9561_v15  ;;  %7387 = vmatpush3.bf16.msra.mxu1 %v9578_v26 }
 0x486   : > { %7389 = vmatprep.subr.bf16.mxu0 %v9493_v12  ;;  %7420 = vmatprep.subr.bf16.mxu1 %v9077_v7 }
 0x53b   : > { %v1324_v33 = vpop.f32.mrb[8].mxu0  ;;  %v1395_v36 = vpop.f32.mrb[8].mxu1 }
 0x53c   : > { %v1325_v40 = vadd.f32 %v1324_v33, %v9623_v41  ;;  %v1326_v45 = vpop.f32.mrb[9].mxu0  ;;  %v6625_v46 = vpop.f32.mrb[9].mxu1  ;;  %v1396_v9 = vadd.f32 %v1395_v36, %v9640_v4 }
 0x53d   : > { %v1327_v49 = vadd.f32 %v1326_v45, %v9626_v44 }
 0x53e   : > { %v1400_v50 = vrot.slane %v1325_v40, 5  ;;  %v1420_v10 = vrot.slane %v1396_v9, 5 }
 0x53f   : > { %v1410_v53 = vrot.slane %v1327_v49, 5 }
 0x540   : > { %v1402_v54 = vadd.f32 %v1400_v50, %v9629_v48 }
 0x541   : > { %v1412_v57 = vadd.f32 %v1410_v53, %v9634_v55 }
 0x542   : > { %v5931_v58 = vmul.f32 -1.442695, %v1402_v54 }
 0x543   : > { %v5932_v59 = vmul.f32 -1.442695, %v1412_v57 }
 0x544   : > { %8241 = vpow2.f32 %v5931_v58 }
 0x545   : > { %8243 = vpow2.f32 %v5932_v59 }
 0x54e   : > { %v8242_v62 = vpop.eup %8241 }
 0x54f   : > { %v8244_v63 = vpop.eup %8243  ;;  %v1406_v0 = vadd.f32 1.0, %v8242_v62 }
 0x550   : > { %v1416_v2 = vadd.f32 1.0, %v8244_v63 }
 0x551   : > { %8245 = vrcp.f32 %v1406_v0 }
 0x552   : > { %8247 = vrcp.f32 %v1416_v2 }
 0x55b   : > { %v8246_v13 = vpop.eup %8245 }
 0x55c   : > { %v8248_v19 = vpop.eup %8247  ;;  %v1422_v24 = vmul.f32 %v8246_v13, %v1420_v10 }
 0x55d   : > { %v1429_v25 = vmul.f32 %v8248_v19, %v1427_v14  ;;  %v1425_v28 = vsub.f32 1.0, %v8248_v19 }
 0x55e   : > { %v1423_v27 = vadd.f32 %v1422_v24, %v9644_v20 }
 0x560   : > { %8249 = vtanh.f32 %v1423_v27 }
 0x56a   : > { %v8250_v30 = vpop.eup %8249 }
 0x56b   : > { %v1426_v32 = vmul.f32 %v8250_v30, %v1425_v28 }
 0x56d   : > { %v9786_v37 = vadd.f32 %v1429_v25, %v1426_v32 }
 0x56f   : > { %1431 = vst [vmem:[#allocation2] sm:$0x8] %v9786_v37  ;;  %v1433_v33 = vrot.slane %v9786_v37, 3  ;;  %v1604_v14 = vrot.slane %v9786_v37, 7 }
 0x571   : > { %1500 = vmatmul.mubr.f32.vlgmr.msra.gmra.mrb[10].mxu0 %v1433_v33  ;;  %6659 = vmatmul.mubr.f32.vlgmr.msra.gmra.mrb[10].mxu1 %v1433_v33 }
 0x572   : > { %7391 = vmatpush1.bf16.msra.mxu0 %v9495_v16  ;;  %7422 = vmatpush3.bf16.msra.mxu1 %v9514_v38 }
 0x573   : > { %7393 = vmatprep.subr.bf16.mxu0 %v9498_v17  ;;  %7423 = vmatprep.subr.bf16.mxu1 %v9077_v7 }
 0x574   : > { %1676 = vmatprep.mubr.f32.mxu0 %v9076_v5  ;;  %6693 = vmatprep.mubr.msk.f32.mxu1 %vm9078_vm0, %v9076_v5 }
 0x576   : > { %7395 = vmatpush1.bf16.msra.mxu0 %v9502_v22  ;;  %7425 = vmatpush3.bf16.msra.mxu1 %v9525_v47 }
 0x577   : > { %7397 = vmatprep.subr.bf16.mxu0 %v9506_v23  ;;  %7426 = vmatprep.subr.bf16.mxu1 %v9077_v7 }
 0x57a   : > { %7399 = vmatpush1.bf16.msra.mxu0 %v9509_v31  ;;  %7428 = vmatpush3.bf16.msra.mxu1 %v9537_v56 }
 0x57b   : > { %7401 = vmatprep.subr.bf16.mxu0 %v9512_v34  ;;  %7429 = vmatprep.subr.bf16.mxu1 %v9077_v7 }
 0x57e   : > { %7403 = vmatpush1.bf16.msra.mxu0 %v9518_v42  ;;  %7431 = vmatpush3.bf16.msra.mxu1 %v9547_v1 }
 0x57f   : > { %7405 = vmatprep.subr.bf16.mxu0 %v9522_v43  ;;  %7432 = vmatprep.subr.bf16.mxu1 %v9077_v7 }
 0x582   : > { %7407 = vmatpush1.bf16.msra.mxu0 %v9531_v51  ;;  %7434 = vmatpush3.bf16.msra.mxu1 %v9557_v11 }
 0x583   : > { %7409 = vmatprep.subr.bf16.mxu0 %v9534_v52  ;;  %7435 = vmatprep.subr.bf16.mxu1 %v9077_v7 }
 0x586   : > { %7411 = vmatpush1.bf16.msra.mxu0 %v9541_v60  ;;  %7437 = vmatpush3.bf16.msra.mxu1 %v9565_v18 }
 0x587   : > { %7413 = vmatprep.subr.bf16.mxu0 %v9544_v61  ;;  %7438 = vmatprep.subr.bf16.mxu1 %v9077_v7 }
 0x58a   : > { %7415 = vmatpush1.bf16.msra.mxu0 %v9551_v6  ;;  %7440 = vmatpush3.bf16.msra.mxu1 %v9570_v21 }
 0x58b   : > { %7417 = vmatprep.subr.bf16.mxu0 %v9554_v8  ;;  %7441 = vmatprep.subr.bf16.mxu1 %v9077_v7 }
 0x58e   : > { %7419 = vmatpush1.bf16.msra.mxu0 %v9561_v15  ;;  %7443 = vmatpush3.bf16.msra.mxu1 %v9578_v26 }
 0x58f   : > { %7445 = vmatprep.subr.bf16.mxu0 %v9493_v12  ;;  %7476 = vmatprep.subr.bf16.mxu1 %v9077_v7 }
 0x644   : > { %v1501_v29 = vpop.f32.mrb[10].mxu0  ;;  %v1572_v36 = vpop.f32.mrb[10].mxu1 }
 0x645   : > { %v1502_v40 = vadd.f32 %v1501_v29, %v9623_v41  ;;  %v1503_v45 = vpop.f32.mrb[11].mxu0  ;;  %v6660_v46 = vpop.f32.mrb[11].mxu1  ;;  %v1573_v9 = vadd.f32 %v1572_v36, %v9640_v4 }
 0x646   : > { %v1504_v49 = vadd.f32 %v1503_v45, %v9626_v44 }
 0x647   : > { %v1577_v50 = vrot.slane %v1502_v40, 4  ;;  %v1597_v10 = vrot.slane %v1573_v9, 4 }
 0x648   : > { %v1587_v53 = vrot.slane %v1504_v49, 4 }
 0x649   : > { %v1579_v54 = vadd.f32 %v1577_v50, %v9629_v48 }
 0x64a   : > { %v1589_v57 = vadd.f32 %v1587_v53, %v9634_v55 }
 0x64b   : > { %v5933_v58 = vmul.f32 -1.442695, %v1579_v54 }
 0x64c   : > { %v5934_v59 = vmul.f32 -1.442695, %v1589_v57 }
 0x64d   : > { %8251 = vpow2.f32 %v5933_v58 }
 0x64e   : > { %8253 = vpow2.f32 %v5934_v59 }
 0x657   : > { %v8252_v62 = vpop.eup %8251 }
 0x658   : > { %v8254_v63 = vpop.eup %8253  ;;  %v1583_v0 = vadd.f32 1.0, %v8252_v62 }
 0x659   : > { %v1593_v2 = vadd.f32 1.0, %v8254_v63 }
 0x65a   : > { %8255 = vrcp.f32 %v1583_v0 }
 0x65b   : > { %8257 = vrcp.f32 %v1593_v2 }
 0x664   : > { %v8256_v13 = vpop.eup %8255 }
 0x665   : > { %v8258_v19 = vpop.eup %8257  ;;  %v1599_v24 = vmul.f32 %v8256_v13, %v1597_v10 }
 0x666   : > { %v1606_v25 = vmul.f32 %v8258_v19, %v1604_v14  ;;  %v1602_v28 = vsub.f32 1.0, %v8258_v19 }
 0x667   : > { %v1600_v27 = vadd.f32 %v1599_v24, %v9644_v20 }
 0x669   : > { %8259 = vtanh.f32 %v1600_v27 }
 0x673   : > { %v8260_v30 = vpop.eup %8259 }
 0x674   : > { %v1603_v32 = vmul.f32 %v8260_v30, %v1602_v28 }
 0x676   : > { %v9832_v33 = vadd.f32 %v1606_v25, %v1603_v32 }
 0x678   : > { %1608 = vst [vmem:[#allocation2] sm:$0x10] %v9832_v33  ;;  %v1610_v29 = vrot.slane %v9832_v33, 4  ;;  %v1781_v13 = vrot.slane %v9832_v33, 7 }
 0x67a   : > { %1677 = vmatmul.mubr.f32.vlgmr.msra.gmra.mrb[12].mxu0 %v1610_v29  ;;  %6694 = vmatmul.mubr.f32.vlgmr.msra.gmra.mrb[12].mxu1 %v1610_v29 }
 0x67b   : > { %7447 = vmatpush1.bf16.msra.mxu0 %v9495_v16  ;;  %7478 = vmatpush3.bf16.msra.mxu1 %v9514_v38 }
 0x67c   : > { %7449 = vmatprep.subr.bf16.mxu0 %v9498_v17  ;;  %7479 = vmatprep.subr.bf16.mxu1 %v9077_v7 }
 0x67d   : > { %1853 = vmatprep.mubr.f32.mxu0 %v9076_v5  ;;  %6728 = vmatprep.mubr.msk.f32.mxu1 %vm9078_vm0, %v9076_v5 }
 0x67f   : > { %7451 = vmatpush1.bf16.msra.mxu0 %v9502_v22  ;;  %7481 = vmatpush3.bf16.msra.mxu1 %v9525_v47 }
 0x680   : > { %7453 = vmatprep.subr.bf16.mxu0 %v9506_v23  ;;  %7482 = vmatprep.subr.bf16.mxu1 %v9077_v7 }
 0x683   : > { %7455 = vmatpush1.bf16.msra.mxu0 %v9509_v31  ;;  %7484 = vmatpush3.bf16.msra.mxu1 %v9537_v56 }
 0x684   : > { %7457 = vmatprep.subr.bf16.mxu0 %v9512_v34  ;;  %7485 = vmatprep.subr.bf16.mxu1 %v9077_v7 }
 0x687   : > { %7459 = vmatpush1.bf16.msra.mxu0 %v9518_v42  ;;  %7487 = vmatpush3.bf16.msra.mxu1 %v9547_v1 }
 0x688   : > { %7461 = vmatprep.subr.bf16.mxu0 %v9522_v43  ;;  %7488 = vmatprep.subr.bf16.mxu1 %v9077_v7 }
 0x68b   : > { %7463 = vmatpush1.bf16.msra.mxu0 %v9531_v51  ;;  %7490 = vmatpush3.bf16.msra.mxu1 %v9557_v11 }
 0x68c   : > { %7465 = vmatprep.subr.bf16.mxu0 %v9534_v52  ;;  %7491 = vmatprep.subr.bf16.mxu1 %v9077_v7 }
 0x68f   : > { %7467 = vmatpush1.bf16.msra.mxu0 %v9541_v60  ;;  %7493 = vmatpush3.bf16.msra.mxu1 %v9565_v18 }
 0x690   : > { %7469 = vmatprep.subr.bf16.mxu0 %v9544_v61  ;;  %7494 = vmatprep.subr.bf16.mxu1 %v9077_v7 }
 0x693   : > { %7471 = vmatpush1.bf16.msra.mxu0 %v9551_v6  ;;  %7496 = vmatpush3.bf16.msra.mxu1 %v9570_v21 }
 0x694   : > { %7473 = vmatprep.subr.bf16.mxu0 %v9554_v8  ;;  %7497 = vmatprep.subr.bf16.mxu1 %v9077_v7 }
 0x697   : > { %7475 = vmatpush1.bf16.msra.mxu0 %v9561_v15  ;;  %7499 = vmatpush3.bf16.msra.mxu1 %v9578_v26 }
 0x698   : > { %7501 = vmatprep.subr.bf16.mxu0 %v9493_v12  ;;  %7532 = vmatprep.subr.bf16.mxu1 %v9077_v7 }
 0x74d   : > { %v1678_v37 = vpop.f32.mrb[12].mxu0  ;;  %v1749_v36 = vpop.f32.mrb[12].mxu1 }
 0x74e   : > { %v1679_v40 = vadd.f32 %v1678_v37, %v9623_v41  ;;  %v1680_v45 = vpop.f32.mrb[13].mxu0  ;;  %v6695_v46 = vpop.f32.mrb[13].mxu1  ;;  %v1750_v2 = vadd.f32 %v1749_v36, %v9640_v4 }
 0x74f   : > { %v1681_v49 = vadd.f32 %v1680_v45, %v9626_v44 }
 0x750   : > { %v1754_v50 = vrot.slane %v1679_v40, 3  ;;  %v1774_v9 = vrot.slane %v1750_v2, 3 }
 0x751   : > { %v1764_v53 = vrot.slane %v1681_v49, 3  ;;  %v2141_v49 = vld [vmem:[#allocation12 + $0x8] sm:$0xff] }
 0x752   : > { %v1756_v54 = vadd.f32 %v1754_v50, %v9629_v48  ;;  %v2144_v50 = vld [vmem:[#allocation12 + $0x20] sm:$0xff] }
 0x753   : > { %v1766_v57 = vadd.f32 %v1764_v53, %v9634_v55  ;;  %v7556_v53 = vpack.c.bf16 %v2144_v50, %v2141_v49  ;;  %v2175_v49 = vld [vmem:[#allocation12 + $0x118] sm:$0xff] }
 0x754   : > { %v5935_v58 = vmul.f32 -1.442695, %v1756_v54  ;;  %v2140_v54 = vld [vmem:[#allocation12] sm:$0xff] }
 0x755   : > { %v5936_v59 = vmul.f32 -1.442695, %v1766_v57  ;;  %v2143_v57 = vld [vmem:[#allocation12 + $0x18] sm:$0xff] }
 0x756   : > { %8261 = vpow2.f32 %v5935_v58  ;;  %v7558_v58 = vpack.c.bf16 %v2143_v57, %v2140_v54  ;;  %v2180_v54 = vld [vmem:[#allocation12 + $0x140] sm:$0xff] }
 0x757   : > { %8263 = vpow2.f32 %v5936_v59  ;;  %v2142_v59 = vld [vmem:[#allocation12 + $0x10] sm:$0xff] }
 0x760   : > { %v8262_v12 = vpop.eup %8261 }
 0x761   : > { %v8264_v62 = vpop.eup %8263  ;;  %v1760_v63 = vadd.f32 1.0, %v8262_v12  ;;  %v2145_v12 = vld [vmem:[#allocation12 + $0x28] sm:$0xff] }
 0x762   : > { %v1770_v0 = vadd.f32 1.0, %v8264_v62  ;;  %v7589_v62 = vpack.c.bf16 %v2145_v12, %v2142_v59  ;;  %v2179_v59 = vld [vmem:[#allocation12 + $0x138] sm:$0xff] }
 0x763   : > { %8265 = vrcp.f32 %v1760_v63  ;;  %v2147_v63 = vld [vmem:[#allocation12 + $0x38] sm:$0xff] }
 0x764   : > { %8267 = vrcp.f32 %v1770_v0  ;;  %v2150_v0 = vld [vmem:[#allocation12 + $0x50] sm:$0xff] }
 0x765   : > { %v7560_v2 = vpack.c.bf16 %v2150_v0, %v2147_v63  ;;  %v2181_v63 = vld [vmem:[#allocation12 + $0x148] sm:$0xff] }
 0x76d   : > { %v8266_v10 = vpop.eup %8265 }
 0x76e   : > { %v8268_v14 = vpop.eup %8267  ;;  %v1776_v19 = vmul.f32 %v8266_v10, %v1774_v9  ;;  %v2146_v9 = vld [vmem:[#allocation12 + $0x30] sm:$0xff]  ;;  %v2149_v10 = vld [vmem:[#allocation12 + $0x48] sm:$0xff] }
 0x76f   : > { %v1783_v24 = vmul.f32 %v8268_v14, %v1781_v13  ;;  %v1779_v27 = vsub.f32 1.0, %v8268_v14  ;;  %v7562_v13 = vpack.c.bf16 %v2149_v10, %v2146_v9  ;;  %v2148_v14 = vld [vmem:[#allocation12 + $0x40] sm:$0xff]  ;;  %v2186_v9 = vld [vmem:[#allocation12 + $0x170] sm:$0xff] }
 0x770   : > { %v1777_v25 = vadd.f32 %v1776_v19, %v9644_v20  ;;  %v2151_v19 = vld [vmem:[#allocation12 + $0x58] sm:$0xff]  ;;  %v2182_v10 = vld [vmem:[#allocation12 + $0x150] sm:$0xff] }
 0x772   : > { %8269 = vtanh.f32 %v1777_v25  ;;  %v2153_v25 = vld [vmem:[#allocation12 + $0x68] sm:$0xff] }
 0x77c   : > { %v8270_v28 = vpop.eup %8269 }
 0x77d   : > { %v1780_v30 = vmul.f32 %v8270_v28, %v1779_v27  ;;  %v2156_v27 = vld [vmem:[#allocation12 + $0x80] sm:$0xff] }
 0x77e   : > { %v7564_v28 = vpack.c.bf16 %v2156_v27, %v2153_v25 }
 0x77f   : > { %v9878_v32 = vadd.f32 %v1783_v24, %v1780_v30  ;;  %v7592_v24 = vpack.c.bf16 %v2151_v19, %v2148_v14  ;;  %v2152_v30 = vld [vmem:[#allocation12 + $0x60] sm:$0xff]  ;;  %v2185_v14 = vld [vmem:[#allocation12 + $0x168] sm:$0xff] }
 0x780   : > { %v2184_v19 = vld [vmem:[#allocation12 + $0x160] sm:$0xff]  ;;  %v7586_v25 = vpack.c.bf16 %v2185_v14, %v2182_v10  ;;  %v2202_v10 = vld [vmem:[#allocation14 + $0x70] sm:$0xff]  ;;  %v2207_v14 = vld [vmem:[#allocation14 + $0x98] sm:$0xff] }
 0x781   : > { %1785 = vst [vmem:[#allocation2] sm:$0x20] %v9878_v32  ;;  %v1787_v29 = vrot.slane %v9878_v32, 5 }
 0x783   : > { %1854 = vmatmul.mubr.f32.vlgmr.msra.gmra.mrb[14].mxu0 %v1787_v29  ;;  %6729 = vmatmul.mubr.f32.vlgmr.msra.gmra.mrb[14].mxu1 %v1787_v29 }
 0x784   : > { %7503 = vmatpush1.bf16.msra.mxu0 %v9495_v16  ;;  %7534 = vmatpush3.bf16.msra.mxu1 %v9514_v38 }
 0x785   : > { %7505 = vmatprep.subr.bf16.mxu0 %v9498_v17  ;;  %7535 = vmatprep.subr.bf16.mxu1 %v9077_v7 }
 0x786   : > { %2030 = vmatprep.mubr.f32.mxu0 %v9076_v5  ;;  %6763 = vmatprep.mubr.msk.f32.mxu1 %vm9078_vm0, %v9076_v5 }
 0x788   : > { %7507 = vmatpush1.bf16.msra.mxu0 %v9502_v22  ;;  %7537 = vmatpush3.bf16.msra.mxu1 %v9525_v47 }
 0x789   : > { %7509 = vmatprep.subr.bf16.mxu0 %v9506_v23  ;;  %7538 = vmatprep.subr.bf16.mxu1 %v9077_v7 }
 0x78c   : > { %7511 = vmatpush1.bf16.msra.mxu0 %v9509_v31  ;;  %7540 = vmatpush3.bf16.msra.mxu1 %v9537_v56 }
 0x78d   : > { %7513 = vmatprep.subr.bf16.mxu0 %v9512_v34  ;;  %7541 = vmatprep.subr.bf16.mxu1 %v9077_v7 }
 0x790   : > { %7515 = vmatpush1.bf16.msra.mxu0 %v9518_v42  ;;  %7543 = vmatpush3.bf16.msra.mxu1 %v9547_v1 }
 0x791   : > { %7517 = vmatprep.subr.bf16.mxu0 %v9522_v43  ;;  %7544 = vmatprep.subr.bf16.mxu1 %v9077_v7 }
 0x794   : > { %7519 = vmatpush1.bf16.msra.mxu0 %v9531_v51  ;;  %7546 = vmatpush3.bf16.msra.mxu1 %v9557_v11 }
 0x795   : > { %7521 = vmatprep.subr.bf16.mxu0 %v9534_v52  ;;  %7547 = vmatprep.subr.bf16.mxu1 %v9077_v7 }
 0x798   : > { %7523 = vmatpush1.bf16.msra.mxu0 %v9541_v60  ;;  %7549 = vmatpush3.bf16.msra.mxu1 %v9565_v18 }
 0x799   : > { %7525 = vmatprep.subr.bf16.mxu0 %v9544_v61  ;;  %7550 = vmatprep.subr.bf16.mxu1 %v9077_v7 }
 0x79c   : > { %7527 = vmatpush1.bf16.msra.mxu0 %v9551_v6  ;;  %7552 = vmatpush3.bf16.msra.mxu1 %v9570_v21 }
 0x79d   : > { %7529 = vmatprep.subr.bf16.mxu0 %v9554_v8  ;;  %7553 = vmatprep.subr.bf16.mxu1 %v9077_v7 }
 0x7a0   : > { %7531 = vmatpush1.bf16.msra.mxu0 %v9561_v15  ;;  %7555 = vmatpush3.bf16.msra.mxu1 %v9578_v26  ;;  %v1958_v15 = vrot.slane %v9878_v32, 7  ;;  %v2155_v32 = vld [vmem:[#allocation12 + $0x78] sm:$0xff] }
 0x7a1   : > { %7588 = vmatprep.subr.bf16.mxu1 %v9077_v7  ;;  %7557 = vmatprep.subr.bf16.mxu0 %v7556_v53  ;;  %v7566_v29 = vpack.c.bf16 %v2155_v32, %v2152_v30  ;;  %v2177_v53 = vld [vmem:[#allocation12 + $0x128] sm:$0xff]  ;;  %v2192_v30 = vld [vmem:[#allocation14 + $0x20] sm:$0xff] }
 0x7a2   : > { %v7580_v57 = vpack.c.bf16 %v2180_v54, %v2177_v53  ;;  %v2196_v54 = vld [vmem:[#allocation14 + $0x40] sm:$0xff] }
 0x856   : > { %v1855_v16 = vpop.f32.mrb[14].mxu0  ;;  %v1926_v17 = vpop.f32.mrb[14].mxu1 }
 0x857   : > { %v1856_v22 = vadd.f32 %v1855_v16, %v9623_v41  ;;  %v1857_v23 = vpop.f32.mrb[15].mxu0  ;;  %v6730_v31 = vpop.f32.mrb[15].mxu1  ;;  %v1927_v6 = vadd.f32 %v1926_v17, %v9640_v4  ;;  %v2154_v16 = vld [vmem:[#allocation12 + $0x70] sm:$0xff]  ;;  %v2157_v17 = vld [vmem:[#allocation12 + $0x88] sm:$0xff] }
 0x858   : > { %v1858_v34 = vadd.f32 %v1857_v23, %v9626_v44  ;;  %v2159_v23 = vld [vmem:[#allocation12 + $0x98] sm:$0xff]  ;;  %v2162_v31 = vld [vmem:[#allocation12 + $0xb0] sm:$0xff] }
 0x859   : > { %v1931_v38 = vrot.slane %v1856_v22, 2  ;;  %v1951_v8 = vrot.slane %v1927_v6, 2  ;;  %v7595_v22 = vpack.c.bf16 %v2157_v17, %v2154_v16  ;;  %v2167_v6 = vld [vmem:[#allocation12 + $0xd8] sm:$0xff] }
 0x85a   : > { %v1941_v42 = vrot.slane %v1858_v34, 2  ;;  %v7568_v34 = vpack.c.bf16 %v2162_v31, %v2159_v23 }
 0x85b   : > { %v1933_v43 = vadd.f32 %v1931_v38, %v9629_v48  ;;  %v2158_v38 = vld [vmem:[#allocation12 + $0x90] sm:$0xff] }
 0x85c   : > { %v1943_v47 = vadd.f32 %v1941_v42, %v9634_v55  ;;  %v2161_v42 = vld [vmem:[#allocation12 + $0xa8] sm:$0xff] }
 0x85d   : > { %v5937_v51 = vmul.f32 -1.442695, %v1933_v43  ;;  %v7570_v43 = vpack.c.bf16 %v2161_v42, %v2158_v38 }
 0x85e   : > { %v5938_v52 = vmul.f32 -1.442695, %v1943_v47  ;;  %v2160_v47 = vld [vmem:[#allocation12 + $0xa0] sm:$0xff] }
 0x85f   : > { %8271 = vpow2.f32 %v5937_v51  ;;  %v2163_v51 = vld [vmem:[#allocation12 + $0xb8] sm:$0xff] }
 0x860   : > { %8273 = vpow2.f32 %v5938_v52  ;;  %v7598_v52 = vpack.c.bf16 %v2163_v51, %v2160_v47 }
 0x869   : > { %v8272_v56 = vpop.eup %8271 }
 0x86a   : > { %v8274_v60 = vpop.eup %8273  ;;  %v1937_v61 = vadd.f32 1.0, %v8272_v56  ;;  %v2165_v56 = vld [vmem:[#allocation12 + $0xc8] sm:$0xff] }
 0x86b   : > { %v1947_v1 = vadd.f32 1.0, %v8274_v60  ;;  %v2168_v60 = vld [vmem:[#allocation12 + $0xe0] sm:$0xff] }
 0x86c   : > { %8275 = vrcp.f32 %v1937_v61  ;;  %v7572_v61 = vpack.c.bf16 %v2168_v60, %v2165_v56 }
 0x86d   : > { %8277 = vrcp.f32 %v1947_v1  ;;  %v2164_v1 = vld [vmem:[#allocation12 + $0xc0] sm:$0xff] }
 0x876   : > { %v8276_v11 = vpop.eup %8275 }
 0x877   : > { %v8278_v18 = vpop.eup %8277  ;;  %v1953_v21 = vmul.f32 %v8276_v11, %v1951_v8  ;;  %v7574_v8 = vpack.c.bf16 %v2167_v6, %v2164_v1  ;;  %v2166_v11 = vld [vmem:[#allocation12 + $0xd0] sm:$0xff] }
 0x878   : > { %v1960_v26 = vmul.f32 %v8278_v18, %v1958_v15  ;;  %v1956_v37 = vsub.f32 1.0, %v8278_v18  ;;  %v2169_v15 = vld [vmem:[#allocation12 + $0xe8] sm:$0xff] }
 0x879   : > { %v1954_v33 = vadd.f32 %v1953_v21, %v9644_v20  ;;  %v7601_v18 = vpack.c.bf16 %v2169_v15, %v2166_v11  ;;  %v2171_v21 = vld [vmem:[#allocation12 + $0xf8] sm:$0xff] }
 0x87b   : > { %8279 = vtanh.f32 %v1954_v33 }
 0x885   : > { %v8280_v36 = vpop.eup %8279 }
 0x886   : > { %v1957_v40 = vmul.f32 %v8280_v36, %v1956_v37  ;;  %v2170_v37 = vld [vmem:[#allocation12 + $0xf0] sm:$0xff]  ;;  %v2173_v36 = vld [vmem:[#allocation12 + $0x108] sm:$0xff] }
 0x888   : > { %v9923_v45 = vadd.f32 %v1960_v26, %v1957_v40  ;;  %v2174_v26 = vld [vmem:[#allocation12 + $0x110] sm:$0xff]  ;;  %v7578_v40 = vpack.c.bf16 %v2173_v36, %v2170_v37  ;;  %v2191_v37 = vld [vmem:[#allocation14 + $0x18] sm:$0xff] }
 0x889   : > { %v7576_v33 = vpack.c.bf16 %v2174_v26, %v2171_v21  ;;  %v2190_v36 = vld [vmem:[#allocation14 + $0x10] sm:$0xff] }
 0x88a   : > { %1962 = vst [vmem:[#allocation2] sm:$0x40] %v9923_v45  ;;  %v1964_v46 = vrot.slane %v9923_v45, 6  ;;  %v2135_v6 = vrot.slane %v9923_v45, 7  ;;  %v2194_v45 = vld [vmem:[#allocation14 + $0x30] sm:$0xff] }
 0x88c   : > { %2031 = vmatmul.mubr.f32.vlgmr.msra.gmra.mrb[16].mxu0 %v1964_v46  ;;  %6764 = vmatmul.mubr.f32.vlgmr.msra.gmra.mrb[16].mxu1 %v1964_v46  ;;  %v2172_v46 = vld [vmem:[#allocation12 + $0x100] sm:$0xff] }
 0x88d   : > { %2319 = vmatprep.mubr.f32.mxu0 %v9076_v5  ;;  %6798 = vmatprep.mubr.msk.f32.mxu1 %vm9078_vm0, %v9076_v5  ;;  %v7604_v50 = vpack.c.bf16 %v2175_v49, %v2172_v46  ;;  %v2198_v46 = vld [vmem:[#allocation14 + $0x50] sm:$0xff] }
 0x88e   : > { %7559 = vmatpush1.bf16.msra.mxu0 %v7558_v58  ;;  %7590 = vmatpush3.bf16.msra.mxu1 %v7589_v62  ;;  %v2176_v58 = vld [vmem:[#allocation12 + $0x120] sm:$0xff]  ;;  %v2178_v62 = vld [vmem:[#allocation12 + $0x130] sm:$0xff] }
 0x88f   : > { %7591 = vmatprep.subr.bf16.mxu1 %v9077_v7  ;;  %7561 = vmatprep.subr.bf16.mxu0 %v7560_v2  ;;  %v7582_v12 = vpack.c.bf16 %v2179_v59, %v2176_v58  ;;  %v7607_v0 = vpack.c.bf16 %v2181_v63, %v2178_v62  ;;  %v2183_v2 = vld [vmem:[#allocation12 + $0x158] sm:$0xff]  ;;  %v2201_v59 = vld [vmem:[#allocation14 + $0x68] sm:$0xff]  ;;  %v2200_v63 = vld [vmem:[#allocation14 + $0x60] sm:$0xff] }
 0x892   : > { %7563 = vmatpush1.bf16.msra.mxu0 %v7562_v13  ;;  %7593 = vmatpush3.bf16.msra.mxu1 %v7592_v24  ;;  %v7584_v13 = vpack.c.bf16 %v2186_v9, %v2183_v2  ;;  %v2187_v24 = vld [vmem:[#allocation12 + $0x178] sm:$0xff] }
 0x893   : > { %7594 = vmatprep.subr.bf16.mxu1 %v9077_v7  ;;  %7565 = vmatprep.subr.bf16.mxu0 %v7564_v28  ;;  %v7610_v27 = vpack.c.bf16 %v2187_v24, %v2184_v19  ;;  %v2189_v28 = vld [vmem:[#allocation14 + $0x8] sm:$0xff]  ;;  %v2203_v9 = vld [vmem:[#allocation14 + $0x78] sm:$0xff]  ;;  %v2210_v19 = vld [vmem:[#allocation14 + $0xb0] sm:$0xff] }
 0x894   : > { %v9937_v32 = vpack.c.bf16 %v2192_v30, %v2189_v28  ;;  %v9968_v24 = vpack.c.bf16 %v2203_v9, %v2200_v63  ;;  %v9974_v28 = vpack.c.bf16 %v2210_v19, %v2207_v14  ;;  %v2209_v30 = vld [vmem:[#allocation14 + $0xa8] sm:$0xff]  ;;  %v2236_v14 = vld [vmem:[#allocation15] sm:$0x7] }
 0x896   : > { %7567 = vmatpush1.bf16.msra.mxu0 %v7566_v29  ;;  %7596 = vmatpush3.bf16.msra.mxu1 %v7595_v22 }
 0x897   : > { %7597 = vmatprep.subr.bf16.mxu1 %v9077_v7  ;;  %7569 = vmatprep.subr.bf16.mxu0 %v7568_v34 }
 0x89a   : > { %7571 = vmatpush1.bf16.msra.mxu0 %v7570_v43  ;;  %7599 = vmatpush3.bf16.msra.mxu1 %v7598_v52 }
 0x89b   : > { %7600 = vmatprep.subr.bf16.mxu1 %v9077_v7  ;;  %7573 = vmatprep.subr.bf16.mxu0 %v7572_v61 }
 0x89e   : > { %7575 = vmatpush1.bf16.msra.mxu0 %v7574_v8  ;;  %7602 = vmatpush3.bf16.msra.mxu1 %v7601_v18 }
 0x89f   : > { %7603 = vmatprep.subr.bf16.mxu1 %v9077_v7  ;;  %7577 = vmatprep.subr.bf16.mxu0 %v7576_v33  ;;  %v2188_v33 = vld [vmem:[#allocation14] sm:$0xff] }
 0x8a0   : > { %v9948_v49 = vpack.c.bf16 %v2191_v37, %v2188_v33  ;;  %v2229_v33 = vld [vmem:[#allocation14 + $0x148] sm:$0xff]  ;;  %v2231_v37 = vld [vmem:[#allocation14 + $0x158] sm:$0xff] }
 0x8a2   : > { %7579 = vmatpush1.bf16.msra.mxu0 %v7578_v40  ;;  %7605 = vmatpush3.bf16.msra.mxu1 %v7604_v50  ;;  %v2193_v40 = vld [vmem:[#allocation14 + $0x28] sm:$0xff] }
 0x8a3   : > { %7606 = vmatprep.subr.bf16.mxu1 %v9077_v7  ;;  %7581 = vmatprep.subr.bf16.mxu0 %v7580_v57  ;;  %v9950_v50 = vpack.c.bf16 %v2193_v40, %v2190_v36  ;;  %v2199_v57 = vld [vmem:[#allocation14 + $0x58] sm:$0xff]  ;;  %v2234_v36 = vld [vmem:[#allocation14 + $0x170] sm:$0xff] }
 0x8a6   : > { %7583 = vmatpush1.bf16.msra.mxu0 %v7582_v12  ;;  %7608 = vmatpush3.bf16.msra.mxu1 %v7607_v0  ;;  %v2204_v12 = vld [vmem:[#allocation14 + $0x80] sm:$0xff]  ;;  %v9958_v0 = vpack.c.bf16 %v2199_v57, %v2196_v54  ;;  %v2235_v57 = vld [vmem:[#allocation14 + $0x178] sm:$0xff] }
 0x8a7   : > { %7609 = vmatprep.subr.bf16.mxu1 %v9077_v7  ;;  %7585 = vmatprep.subr.bf16.mxu0 %v7584_v13  ;;  %v9961_v2 = vpack.c.bf16 %v2204_v12, %v2201_v59  ;;  %v2205_v13 = vld [vmem:[#allocation14 + $0x88] sm:$0xff]  ;;  %v2232_v54 = vld [vmem:[#allocation14 + $0x160] sm:$0xff] }
 0x8a8   : > { %v10021_v59 = vpack.c.bf16 %v2235_v57, %v2232_v54 }
 0x8aa   : > { %7587 = vmatpush1.bf16.msra.mxu0 %v7586_v25  ;;  %7611 = vmatpush3.bf16.msra.mxu1 %v7610_v27  ;;  %v2206_v25 = vld [vmem:[#allocation14 + $0x90] sm:$0xff]  ;;  %v9971_v27 = vpack.c.bf16 %v2205_v13, %v2202_v10  ;;  %v2237_v13 = vld [vmem:[#allocation17] sm:$0x7] }
 0x8ab   : > { %7613 = vmatprep.subr.bf16.mxu0 %v9937_v32  ;;  %7644 = vmatprep.subr.bf16.mxu1 %v9077_v7  ;;  %v10067_v19 = vrot.slane %v2237_v13, %v9617_v35 }
 0x95f   : > { %v2032_v29 = vpop.f32.mrb[16].mxu0  ;;  %v2103_v16 = vpop.f32.mrb[16].mxu1 }
 0x960   : > { %v2033_v17 = vadd.f32 %v2032_v29, %v9623_v41  ;;  %v2034_v22 = vpop.f32.mrb[17].mxu0  ;;  %v6765_v23 = vpop.f32.mrb[17].mxu1  ;;  %v2104_v41 = vadd.f32 %v2103_v16, %v9640_v4  ;;  %v2195_v4 = vld [vmem:[#allocation14 + $0x38] sm:$0xff]  ;;  %v2208_v29 = vld [vmem:[#allocation14 + $0xa0] sm:$0xff] }
 0x961   : > { %v2035_v31 = vadd.f32 %v2034_v22, %v9626_v44  ;;  %v9952_v53 = vpack.c.bf16 %v2198_v46, %v2195_v4  ;;  %v2211_v16 = vld [vmem:[#allocation14 + $0xb8] sm:$0xff]  ;;  %v2216_v22 = vld [vmem:[#allocation14 + $0xe0] sm:$0xff]  ;;  %v9978_v23 = vpack.c.bf16 %v2209_v30, %v2206_v25  ;;  %v2230_v4 = vld [vmem:[#allocation14 + $0x150] sm:$0xff]  ;;  %v2243_v25 = vrot.slane %v2236_v14, %v9617_v35 }
 0x962   : > { %v2108_v34 = vrot.slane %v2033_v17, 1  ;;  %v2128_v1 = vrot.slane %v2104_v41, 1  ;;  %v2213_v17 = vld [vmem:[#allocation14 + $0xc8] sm:$0xff]  ;;  %v10071_v30 = vrot.slane %v2237_v13, %v9619_v39 }
 0x963   : > { %v2118_v38 = vrot.slane %v2035_v31, 1  ;;  %v2212_v31 = vld [vmem:[#allocation14 + $0xc0] sm:$0xff] }
 0x964   : > { %v2110_v42 = vadd.f32 %v2108_v34, %v9629_v48  ;;  %v9981_v34 = vpack.c.bf16 %v2211_v16, %v2208_v29  ;;  %v2247_v29 = vrot.slane %v2236_v14, %v9619_v39 }
 0x965   : > { %v2120_v43 = vadd.f32 %v2118_v38, %v9634_v55  ;;  %v9984_v38 = vpack.c.bf16 %v2216_v22, %v2213_v17 }
 0x966   : > { %v5939_v47 = vmul.f32 -1.442695, %v2110_v42  ;;  %v2215_v42 = vld [vmem:[#allocation14 + $0xd8] sm:$0xff] }
 0x967   : > { %v5940_v51 = vmul.f32 -1.442695, %v2120_v43  ;;  %v2214_v43 = vld [vmem:[#allocation14 + $0xd0] sm:$0xff] }
 0x968   : > { %8281 = vpow2.f32 %v5939_v47  ;;  %v2217_v47 = vld [vmem:[#allocation14 + $0xe8] sm:$0xff] }
 0x969   : > { %8283 = vpow2.f32 %v5940_v51  ;;  %v2219_v51 = vld [vmem:[#allocation14 + $0xf8] sm:$0xff] }
 0x972   : > { %v8282_v52 = vpop.eup %8281 }
 0x973   : > { %v8284_v56 = vpop.eup %8283  ;;  %v2114_v60 = vadd.f32 1.0, %v8282_v52  ;;  %v2222_v52 = vld [vmem:[#allocation14 + $0x110] sm:$0xff] }
 0x974   : > { %v2124_v61 = vadd.f32 1.0, %v8284_v56  ;;  %v9988_v56 = vpack.c.bf16 %v2215_v42, %v2212_v31  ;;  %v9994_v41 = vpack.c.bf16 %v2222_v52, %v2219_v51 }
 0x975   : > { %8285 = vrcp.f32 %v2114_v60  ;;  %v2218_v60 = vld [vmem:[#allocation14 + $0xf0] sm:$0xff] }
 0x976   : > { %8287 = vrcp.f32 %v2124_v61  ;;  %v9991_v61 = vpack.c.bf16 %v2217_v47, %v2214_v43 }
 0x97f   : > { %v8286_v44 = vpop.eup %8285 }
 0x980   : > { %v8288_v8 = vpop.eup %8287  ;;  %v2130_v48 = vmul.f32 %v8286_v44, %v2128_v1  ;;  %v2221_v1 = vld [vmem:[#allocation14 + $0x108] sm:$0xff]  ;;  %v2220_v44 = vld [vmem:[#allocation14 + $0x100] sm:$0xff] }
 0x981   : > { %v2137_v11 = vmul.f32 %v8288_v8, %v2135_v6  ;;  %v2133_v15 = vsub.f32 1.0, %v8288_v8  ;;  %v2223_v6 = vld [vmem:[#allocation14 + $0x118] sm:$0xff]  ;;  %v2225_v8 = vld [vmem:[#allocation14 + $0x128] sm:$0xff] }
 0x982   : > { %v2131_v55 = vadd.f32 %v2130_v48, %v9644_v20  ;;  %v2197_v20 = vld [vmem:[#allocation14 + $0x48] sm:$0xff]  ;;  %v2228_v48 = vld [vmem:[#allocation14 + $0x140] sm:$0xff] }
 0x983   : > { %v9955_v62 = vpack.c.bf16 %v2197_v20, %v2194_v45  ;;  %v10014_v45 = vpack.c.bf16 %v2234_v36, %v2231_v37  ;;  %v2233_v20 = vld [vmem:[#allocation14 + $0x168] sm:$0xff] }
 0x984   : > { %8289 = vtanh.f32 %v2131_v55  ;;  %v2224_v55 = vld [vmem:[#allocation14 + $0x120] sm:$0xff] }
 0x98e   : > { %v8290_v18 = vpop.eup %8289 }
 0x98f   : > { %v2134_v21 = vmul.f32 %v8290_v18, %v2133_v15  ;;  %v10001_v15 = vpack.c.bf16 %v2223_v6, %v2220_v44  ;;  %v10004_v18 = vpack.c.bf16 %v2228_v48, %v2225_v8  ;;  %v10083_v6 = vrot.slane %v2237_v13, %v9637_v3 }
 0x990   : > { %v2251_v48 = vrot.slane %v2236_v14, %v9637_v3 }
 0x991   : > { %v2138_v26 = vadd.f32 %v2137_v11, %v2134_v21  ;;  %v9998_v11 = vpack.c.bf16 %v2221_v1, %v2218_v60  ;;  %v2227_v21 = vld [vmem:[#allocation14 + $0x138] sm:$0xff] }
 0x992   : > { %v10008_v40 = vpack.c.bf16 %v2227_v21, %v2224_v55 }
 0x993   : > { %2139 = vst [vmem:[#allocation2] sm:$0x80] %v2138_v26  ;;  %v2226_v26 = vld [vmem:[#allocation14 + $0x130] sm:$0xff] }
 0x994   : > { %v10011_v46 = vpack.c.bf16 %v2229_v33, %v2226_v26 }
 0x99a   : > { %v2238_v58 = vld [vmem:[#allocation2] sm:$0xff] }
 0x99b   : > { %2320 = vmatmul.mubr.f32.vlgmr.msra.gmra.mrb[18].mxu0 %v2238_v58  ;;  %6799 = vmatmul.mubr.f32.vlgmr.msra.gmra.mrb[18].mxu1 %v2238_v58  ;;  %v10018_v58 = vpack.c.bf16 %v2233_v20, %v2230_v4 }
 0x99c   : > { %7615 = vmatpush1.bf16.msra.mxu0 %v9948_v49  ;;  %7646 = vmatpush3.bf16.msra.mxu1 %v9950_v50 }
 0x99d   : > { %7617 = vmatprep.subr.bf16.mxu0 %v9952_v53  ;;  %2476 = vmatprep.mubr.f32.mxu0 %v9076_v5 }
 0x99e   : > { %7647 = vmatprep.subr.bf16.mxu1 %v9077_v7  ;;  %6833 = vmatprep.mubr.msk.f32.mxu1 %vm9078_vm0, %v9076_v5 }
 0x9a0   : > { %7619 = vmatpush1.bf16.msra.mxu0 %v9955_v62  ;;  %7649 = vmatpush3.bf16.msra.mxu1 %v9958_v0 }
 0x9a1   : > { %7621 = vmatprep.subr.bf16.mxu0 %v9961_v2  ;;  %7650 = vmatprep.subr.bf16.mxu1 %v9077_v7 }
 0x9a4   : > { %7623 = vmatpush1.bf16.msra.mxu0 %v9968_v24  ;;  %7652 = vmatpush3.bf16.msra.mxu1 %v9971_v27 }
 0x9a5   : > { %7625 = vmatprep.subr.bf16.mxu0 %v9974_v28  ;;  %7653 = vmatprep.subr.bf16.mxu1 %v9077_v7 }
 0x9a8   : > { %7627 = vmatpush1.bf16.msra.mxu0 %v9978_v23  ;;  %7655 = vmatpush3.bf16.msra.mxu1 %v9981_v34 }
 0x9a9   : > { %7629 = vmatprep.subr.bf16.mxu0 %v9984_v38  ;;  %7656 = vmatprep.subr.bf16.mxu1 %v9077_v7 }
 0x9ac   : > { %7631 = vmatpush1.bf16.msra.mxu0 %v9988_v56  ;;  %7658 = vmatpush3.bf16.msra.mxu1 %v9991_v61 }
 0x9ad   : > { %7633 = vmatprep.subr.bf16.mxu0 %v9994_v41  ;;  %7659 = vmatprep.subr.bf16.mxu1 %v9077_v7 }
 0x9b0   : > { %7635 = vmatpush1.bf16.msra.mxu0 %v9998_v11  ;;  %7661 = vmatpush3.bf16.msra.mxu1 %v10001_v15 }
 0x9b1   : > { %7637 = vmatprep.subr.bf16.mxu0 %v10004_v18  ;;  %7662 = vmatprep.subr.bf16.mxu1 %v9077_v7 }
 0x9b4   : > { %7639 = vmatpush1.bf16.msra.mxu0 %v10008_v40  ;;  %7664 = vmatpush3.bf16.msra.mxu1 %v10011_v46 }
 0x9b5   : > { %7641 = vmatprep.subr.bf16.mxu0 %v10014_v45  ;;  %7665 = vmatprep.subr.bf16.mxu1 %v9077_v7 }
 0x9b8   : > { %7643 = vmatpush1.bf16.msra.mxu0 %v10018_v58  ;;  %7667 = vmatpush3.bf16.msra.mxu1 %v10021_v59 }
 0x9b9   : > { %7669 = vmatprep.subr.bf16.mxu0 %v9937_v32  ;;  %7700 = vmatprep.subr.bf16.mxu1 %v9077_v7 }
 0x9bb   : > { %2477 = vmatmul.mubr.f32.vlgmr.msra.gmra.mrb[20].mxu0 %v9076_v5  ;;  %6834 = vmatmul.mubr.f32.vlgmr.msra.gmra.mrb[20].mxu1 %v9076_v5 }
 0x9bc   : > { %7671 = vmatpush1.bf16.msra.mxu0 %v9948_v49  ;;  %7702 = vmatpush3.bf16.msra.mxu1 %v9950_v50 }
 0x9bd   : > { %7673 = vmatprep.subr.bf16.mxu0 %v9952_v53  ;;  %7703 = vmatprep.subr.bf16.mxu1 %v9077_v7 }
 0x9be   : > { %2639 = vmatprep.mubr.f32.mxu0 %v9076_v5  ;;  %6868 = vmatprep.mubr.msk.f32.mxu1 %vm9078_vm0, %v9076_v5 }
 0x9c0   : > { %7675 = vmatpush1.bf16.msra.mxu0 %v9955_v62  ;;  %7705 = vmatpush3.bf16.msra.mxu1 %v9958_v0 }
 0x9c1   : > { %7677 = vmatprep.subr.bf16.mxu0 %v9961_v2  ;;  %7706 = vmatprep.subr.bf16.mxu1 %v9077_v7 }
 0x9c4   : > { %7679 = vmatpush1.bf16.msra.mxu0 %v9968_v24  ;;  %7708 = vmatpush3.bf16.msra.mxu1 %v9971_v27 }
 0x9c5   : > { %7681 = vmatprep.subr.bf16.mxu0 %v9974_v28  ;;  %7709 = vmatprep.subr.bf16.mxu1 %v9077_v7 }
 0x9c8   : > { %7683 = vmatpush1.bf16.msra.mxu0 %v9978_v23  ;;  %7711 = vmatpush3.bf16.msra.mxu1 %v9981_v34 }
 0x9c9   : > { %7685 = vmatprep.subr.bf16.mxu0 %v9984_v38  ;;  %7712 = vmatprep.subr.bf16.mxu1 %v9077_v7 }
 0x9cc   : > { %7687 = vmatpush1.bf16.msra.mxu0 %v9988_v56  ;;  %7714 = vmatpush3.bf16.msra.mxu1 %v9991_v61 }
 0x9cd   : > { %7689 = vmatprep.subr.bf16.mxu0 %v9994_v41  ;;  %7715 = vmatprep.subr.bf16.mxu1 %v9077_v7 }
 0x9d0   : > { %7691 = vmatpush1.bf16.msra.mxu0 %v9998_v11  ;;  %7717 = vmatpush3.bf16.msra.mxu1 %v10001_v15 }
 0x9d1   : > { %7693 = vmatprep.subr.bf16.mxu0 %v10004_v18  ;;  %7718 = vmatprep.subr.bf16.mxu1 %v9077_v7 }
 0x9d4   : > { %7695 = vmatpush1.bf16.msra.mxu0 %v10008_v40  ;;  %7720 = vmatpush3.bf16.msra.mxu1 %v10011_v46 }
 0x9d5   : > { %7697 = vmatprep.subr.bf16.mxu0 %v10014_v45  ;;  %7721 = vmatprep.subr.bf16.mxu1 %v9077_v7 }
 0x9d8   : > { %7699 = vmatpush1.bf16.msra.mxu0 %v10018_v58  ;;  %7723 = vmatpush3.bf16.msra.mxu1 %v10021_v59 }
 0x9d9   : > { %7725 = vmatprep.subr.bf16.mxu0 %v9937_v32  ;;  %7756 = vmatprep.subr.bf16.mxu1 %v9077_v7 }
 0xa6e   : > { %v2321_v12 = vpop.f32.mrb[18].mxu0  ;;  %v2392_v63 = vpop.f32.mrb[18].mxu1 }
 0xa6f   : > { %v2323_v9 = vpop.f32.mrb[19].mxu0  ;;  %v6800_v10 = vpop.f32.mrb[19].mxu1  ;;  %v10074_v22 = vadd.f32 %v2321_v12, %v2243_v25  ;;  %v10087_v33 = vadd.f32 %v2392_v63, %v2251_v48 }
 0xa70   : > { %v10079_v52 = vadd.f32 %v2323_v9, %v2247_v29 }
 0xa8e   : > { %v2478_v16 = vpop.f32.mrb[20].mxu0  ;;  %v2549_v17 = vpop.f32.mrb[20].mxu1 }
 0xa8f   : > { %v2479_v31 = vadd.f32 %v2478_v16, %v10067_v19  ;;  %v2480_v42 = vpop.f32.mrb[21].mxu0  ;;  %v6835_v43 = vpop.f32.mrb[21].mxu1  ;;  %v2550_v21 = vadd.f32 %v2549_v17, %v10083_v6 }
 0xa90   : > { %v2481_v47 = vadd.f32 %v2480_v42, %v10071_v30 }
 0xa91   : > { %v2553_v51 = vadd.f32 %v2479_v31, %v10074_v22 }
 0xa92   : > { %v2560_v60 = vadd.f32 %v2481_v47, %v10079_v52 }
 0xa93   : > { %v5941_v35 = vmul.f32 -1.442695, %v2553_v51 }
 0xa94   : > { %v5942_v1 = vmul.f32 -1.442695, %v2560_v60 }
 0xa95   : > { %8291 = vpow2.f32 %v5941_v35 }
 0xa96   : > { %8293 = vpow2.f32 %v5942_v1 }
 0xa9f   : > { %v8292_v39 = vpop.eup %8291 }
 0xaa0   : > { %v2557_v44 = vadd.f32 1.0, %v8292_v39  ;;  %v8294_v8 = vpop.eup %8293 }
 0xaa1   : > { %v2564_v55 = vadd.f32 1.0, %v8294_v8 }
 0xaa2   : > { %8295 = vrcp.f32 %v2557_v44 }
 0xaa3   : > { %8297 = vrcp.f32 %v2564_v55 }
 0xaac   : > { %v8296_v26 = vpop.eup %8295 }
 0xaad   : > { %v2567_v37 = vmul.f32 %v8296_v26, %v2550_v21  ;;  %v8298_v4 = vpop.eup %8297 }
 0xaae   : > { %v2570_v20 = vsub.f32 1.0, %v8298_v4  ;;  %v2572_v12 = vmul.f32 0.0, %v8298_v4 }
 0xaaf   : > { %v2568_v36 = vadd.f32 %v2567_v37, %v10087_v33 }
 0xab1   : > { %8299 = vtanh.f32 %v2568_v36 }
 0xabb   : > { %v8300_v54 = vpop.eup %8299 }
 0xabc   : > { %v2571_v57 = vmul.f32 %v8300_v54, %v2570_v20 }
 0xabe   : > { %v10090_v9 = vadd.f32 %v2572_v12, %v2571_v57 }
 0xac0   : > { %2574 = vst [vmem:[#allocation2] sm:$0x1] %v10090_v9  ;;  %2640 = vmatmul.mubr.f32.vlgmr.msra.gmra.mrb[22].mxu0 %v10090_v9  ;;  %6869 = vmatmul.mubr.f32.vlgmr.msra.gmra.mrb[22].mxu1 %v10090_v9  ;;  %v2745_v8 = vrot.slane %v10090_v9, 7 }
 0xac1   : > { %7727 = vmatpush1.bf16.msra.mxu0 %v9948_v49  ;;  %7758 = vmatpush3.bf16.msra.mxu1 %v9950_v50 }
 0xac2   : > { %7729 = vmatprep.subr.bf16.mxu0 %v9952_v53  ;;  %7759 = vmatprep.subr.bf16.mxu1 %v9077_v7 }
 0xac3   : > { %2817 = vmatprep.mubr.f32.mxu0 %v9076_v5  ;;  %6903 = vmatprep.mubr.msk.f32.mxu1 %vm9078_vm0, %v9076_v5 }
 0xac5   : > { %7731 = vmatpush1.bf16.msra.mxu0 %v9955_v62  ;;  %7761 = vmatpush3.bf16.msra.mxu1 %v9958_v0 }
 0xac6   : > { %7733 = vmatprep.subr.bf16.mxu0 %v9961_v2  ;;  %7762 = vmatprep.subr.bf16.mxu1 %v9077_v7 }
 0xac9   : > { %7735 = vmatpush1.bf16.msra.mxu0 %v9968_v24  ;;  %7764 = vmatpush3.bf16.msra.mxu1 %v9971_v27 }
 0xaca   : > { %7737 = vmatprep.subr.bf16.mxu0 %v9974_v28  ;;  %7765 = vmatprep.subr.bf16.mxu1 %v9077_v7 }
 0xacd   : > { %7739 = vmatpush1.bf16.msra.mxu0 %v9978_v23  ;;  %7767 = vmatpush3.bf16.msra.mxu1 %v9981_v34 }
 0xace   : > { %7741 = vmatprep.subr.bf16.mxu0 %v9984_v38  ;;  %7768 = vmatprep.subr.bf16.mxu1 %v9077_v7 }
 0xad1   : > { %7743 = vmatpush1.bf16.msra.mxu0 %v9988_v56  ;;  %7770 = vmatpush3.bf16.msra.mxu1 %v9991_v61 }
 0xad2   : > { %7745 = vmatprep.subr.bf16.mxu0 %v9994_v41  ;;  %7771 = vmatprep.subr.bf16.mxu1 %v9077_v7 }
 0xad5   : > { %7747 = vmatpush1.bf16.msra.mxu0 %v9998_v11  ;;  %7773 = vmatpush3.bf16.msra.mxu1 %v10001_v15 }
 0xad6   : > { %7749 = vmatprep.subr.bf16.mxu0 %v10004_v18  ;;  %7774 = vmatprep.subr.bf16.mxu1 %v9077_v7 }
 0xad9   : > { %7751 = vmatpush1.bf16.msra.mxu0 %v10008_v40  ;;  %7776 = vmatpush3.bf16.msra.mxu1 %v10011_v46 }
 0xada   : > { %7753 = vmatprep.subr.bf16.mxu0 %v10014_v45  ;;  %7777 = vmatprep.subr.bf16.mxu1 %v9077_v7 }
 0xadd   : > { %7755 = vmatpush1.bf16.msra.mxu0 %v10018_v58  ;;  %7779 = vmatpush3.bf16.msra.mxu1 %v10021_v59 }
 0xade   : > { %7781 = vmatprep.subr.bf16.mxu0 %v9937_v32  ;;  %7812 = vmatprep.subr.bf16.mxu1 %v9077_v7 }
 0xb93   : > { %v2641_v3 = vpop.f32.mrb[22].mxu0  ;;  %v2712_v63 = vpop.f32.mrb[22].mxu1 }
 0xb94   : > { %v2642_v10 = vadd.f32 %v2641_v3, %v10067_v19  ;;  %v2643_v13 = vpop.f32.mrb[23].mxu0  ;;  %v6870_v14 = vpop.f32.mrb[23].mxu1  ;;  %v2713_v1 = vadd.f32 %v2712_v63, %v10083_v6 }
 0xb95   : > { %v2644_v25 = vadd.f32 %v2643_v13, %v10071_v30 }
 0xb96   : > { %v2717_v29 = vrot.slane %v2642_v10, 7  ;;  %v2737_v39 = vrot.slane %v2713_v1, 7 }
 0xb97   : > { %v2727_v16 = vrot.slane %v2644_v25, 7 }
 0xb98   : > { %v2719_v17 = vadd.f32 %v2717_v29, %v10074_v22 }
 0xb99   : > { %v2729_v31 = vadd.f32 %v2727_v16, %v10079_v52 }
 0xb9a   : > { %v5943_v42 = vmul.f32 -1.442695, %v2719_v17 }
 0xb9b   : > { %v5944_v43 = vmul.f32 -1.442695, %v2729_v31 }
 0xb9c   : > { %8301 = vpow2.f32 %v5943_v42 }
 0xb9d   : > { %8303 = vpow2.f32 %v5944_v43 }
 0xba6   : > { %v8302_v47 = vpop.eup %8301 }
 0xba7   : > { %v8304_v51 = vpop.eup %8303  ;;  %v2723_v35 = vadd.f32 1.0, %v8302_v47 }
 0xba8   : > { %v2733_v60 = vadd.f32 1.0, %v8304_v51 }
 0xba9   : > { %8305 = vrcp.f32 %v2723_v35 }
 0xbaa   : > { %8307 = vrcp.f32 %v2733_v60 }
 0xbb3   : > { %v8306_v44 = vpop.eup %8305 }
 0xbb4   : > { %v8308_v48 = vpop.eup %8307  ;;  %v2739_v55 = vmul.f32 %v8306_v44, %v2737_v39 }
 0xbb5   : > { %v2747_v21 = vmul.f32 %v8308_v48, %v2745_v8  ;;  %v2742_v37 = vsub.f32 1.0, %v8308_v48 }
 0xbb6   : > { %v2740_v26 = vadd.f32 %v2739_v55, %v10087_v33 }
 0xbb8   : > { %8309 = vtanh.f32 %v2740_v26 }
 0xbc2   : > { %v8310_v36 = vpop.eup %8309 }
 0xbc3   : > { %v2743_v4 = vmul.f32 %v8310_v36, %v2742_v37 }
 0xbc5   : > { %v10137_v20 = vadd.f32 %v2747_v21, %v2743_v4 }
 0xbc7   : > { %2749 = vst [vmem:[#allocation2] sm:$0x2] %v10137_v20  ;;  %v2751_v54 = vrot.slane %v10137_v20, 1  ;;  %v2922_v1 = vrot.slane %v10137_v20, 7 }
 0xbc9   : > { %2818 = vmatmul.mubr.f32.vlgmr.msra.gmra.mrb[24].mxu0 %v2751_v54  ;;  %6904 = vmatmul.mubr.f32.vlgmr.msra.gmra.mrb[24].mxu1 %v2751_v54 }
 0xbca   : > { %7783 = vmatpush1.bf16.msra.mxu0 %v9948_v49  ;;  %7814 = vmatpush3.bf16.msra.mxu1 %v9950_v50 }
 0xbcb   : > { %7785 = vmatprep.subr.bf16.mxu0 %v9952_v53  ;;  %7815 = vmatprep.subr.bf16.mxu1 %v9077_v7 }
 0xbcc   : > { %2994 = vmatprep.mubr.f32.mxu0 %v9076_v5  ;;  %6938 = vmatprep.mubr.msk.f32.mxu1 %vm9078_vm0, %v9076_v5 }
 0xbce   : > { %7787 = vmatpush1.bf16.msra.mxu0 %v9955_v62  ;;  %7817 = vmatpush3.bf16.msra.mxu1 %v9958_v0 }
 0xbcf   : > { %7789 = vmatprep.subr.bf16.mxu0 %v9961_v2  ;;  %7818 = vmatprep.subr.bf16.mxu1 %v9077_v7 }
 0xbd2   : > { %7791 = vmatpush1.bf16.msra.mxu0 %v9968_v24  ;;  %7820 = vmatpush3.bf16.msra.mxu1 %v9971_v27 }
 0xbd3   : > { %7793 = vmatprep.subr.bf16.mxu0 %v9974_v28  ;;  %7821 = vmatprep.subr.bf16.mxu1 %v9077_v7 }
 0xbd6   : > { %7795 = vmatpush1.bf16.msra.mxu0 %v9978_v23  ;;  %7823 = vmatpush3.bf16.msra.mxu1 %v9981_v34 }
 0xbd7   : > { %7797 = vmatprep.subr.bf16.mxu0 %v9984_v38  ;;  %7824 = vmatprep.subr.bf16.mxu1 %v9077_v7 }
 0xbda   : > { %7799 = vmatpush1.bf16.msra.mxu0 %v9988_v56  ;;  %7826 = vmatpush3.bf16.msra.mxu1 %v9991_v61 }
 0xbdb   : > { %7801 = vmatprep.subr.bf16.mxu0 %v9994_v41  ;;  %7827 = vmatprep.subr.bf16.mxu1 %v9077_v7 }
 0xbde   : > { %7803 = vmatpush1.bf16.msra.mxu0 %v9998_v11  ;;  %7829 = vmatpush3.bf16.msra.mxu1 %v10001_v15 }
 0xbdf   : > { %7805 = vmatprep.subr.bf16.mxu0 %v10004_v18  ;;  %7830 = vmatprep.subr.bf16.mxu1 %v9077_v7 }
 0xbe2   : > { %7807 = vmatpush1.bf16.msra.mxu0 %v10008_v40  ;;  %7832 = vmatpush3.bf16.msra.mxu1 %v10011_v46 }
 0xbe3   : > { %7809 = vmatprep.subr.bf16.mxu0 %v10014_v45  ;;  %7833 = vmatprep.subr.bf16.mxu1 %v9077_v7 }
 0xbe6   : > { %7811 = vmatpush1.bf16.msra.mxu0 %v10018_v58  ;;  %7835 = vmatpush3.bf16.msra.mxu1 %v10021_v59 }
 0xbe7   : > { %7837 = vmatprep.subr.bf16.mxu0 %v9937_v32  ;;  %7868 = vmatprep.subr.bf16.mxu1 %v9077_v7 }
 0xc9c   : > { %v2819_v57 = vpop.f32.mrb[24].mxu0  ;;  %v2890_v12 = vpop.f32.mrb[24].mxu1 }
 0xc9d   : > { %v2820_v9 = vadd.f32 %v2819_v57, %v10067_v19  ;;  %v2821_v3 = vpop.f32.mrb[25].mxu0  ;;  %v6905_v63 = vpop.f32.mrb[25].mxu1  ;;  %v2891_v51 = vadd.f32 %v2890_v12, %v10083_v6 }
 0xc9e   : > { %v2822_v10 = vadd.f32 %v2821_v3, %v10071_v30 }
 0xc9f   : > { %v2895_v13 = vrot.slane %v2820_v9, 6  ;;  %v2915_v35 = vrot.slane %v2891_v51, 6 }
 0xca0   : > { %v2905_v14 = vrot.slane %v2822_v10, 6 }
 0xca1   : > { %v2897_v25 = vadd.f32 %v2895_v13, %v10074_v22 }
 0xca2   : > { %v2907_v29 = vadd.f32 %v2905_v14, %v10079_v52 }
 0xca3   : > { %v5945_v16 = vmul.f32 -1.442695, %v2897_v25 }
 0xca4   : > { %v5946_v17 = vmul.f32 -1.442695, %v2907_v29 }
 0xca5   : > { %8311 = vpow2.f32 %v5945_v16 }
 0xca6   : > { %8313 = vpow2.f32 %v5946_v17 }
 0xcaf   : > { %v8312_v31 = vpop.eup %8311 }
 0xcb0   : > { %v8314_v42 = vpop.eup %8313  ;;  %v2901_v43 = vadd.f32 1.0, %v8312_v31 }
 0xcb1   : > { %v2911_v47 = vadd.f32 1.0, %v8314_v42 }
 0xcb2   : > { %8315 = vrcp.f32 %v2901_v43 }
 0xcb3   : > { %8317 = vrcp.f32 %v2911_v47 }
 0xcbc   : > { %v8316_v60 = vpop.eup %8315 }
 0xcbd   : > { %v8318_v39 = vpop.eup %8317  ;;  %v2917_v44 = vmul.f32 %v8316_v60, %v2915_v35 }
 0xcbe   : > { %v2924_v8 = vmul.f32 %v8318_v39, %v2922_v1  ;;  %v2920_v55 = vsub.f32 1.0, %v8318_v39 }
 0xcbf   : > { %v2918_v48 = vadd.f32 %v2917_v44, %v10087_v33 }
 0xcc1   : > { %8319 = vtanh.f32 %v2918_v48 }
 0xccb   : > { %v8320_v21 = vpop.eup %8319 }
 0xccc   : > { %v2921_v26 = vmul.f32 %v8320_v21, %v2920_v55 }
 0xcce   : > { %v10183_v37 = vadd.f32 %v2924_v8, %v2921_v26 }
 0xcd0   : > { %2926 = vst [vmem:[#allocation2] sm:$0x4] %v10183_v37  ;;  %v2928_v36 = vrot.slane %v10183_v37, 2  ;;  %v3099_v51 = vrot.slane %v10183_v37, 7 }
 0xcd2   : > { %2995 = vmatmul.mubr.f32.vlgmr.msra.gmra.mrb[26].mxu0 %v2928_v36  ;;  %6939 = vmatmul.mubr.f32.vlgmr.msra.gmra.mrb[26].mxu1 %v2928_v36 }
 0xcd3   : > { %7839 = vmatpush1.bf16.msra.mxu0 %v9948_v49  ;;  %7870 = vmatpush3.bf16.msra.mxu1 %v9950_v50 }
 0xcd4   : > { %7841 = vmatprep.subr.bf16.mxu0 %v9952_v53  ;;  %7871 = vmatprep.subr.bf16.mxu1 %v9077_v7 }
 0xcd5   : > { %3171 = vmatprep.mubr.f32.mxu0 %v9076_v5  ;;  %6973 = vmatprep.mubr.msk.f32.mxu1 %vm9078_vm0, %v9076_v5 }
 0xcd7   : > { %7843 = vmatpush1.bf16.msra.mxu0 %v9955_v62  ;;  %7873 = vmatpush3.bf16.msra.mxu1 %v9958_v0 }
 0xcd8   : > { %7845 = vmatprep.subr.bf16.mxu0 %v9961_v2  ;;  %7874 = vmatprep.subr.bf16.mxu1 %v9077_v7 }
 0xcdb   : > { %7847 = vmatpush1.bf16.msra.mxu0 %v9968_v24  ;;  %7876 = vmatpush3.bf16.msra.mxu1 %v9971_v27 }
 0xcdc   : > { %7849 = vmatprep.subr.bf16.mxu0 %v9974_v28  ;;  %7877 = vmatprep.subr.bf16.mxu1 %v9077_v7 }
 0xcdf   : > { %7851 = vmatpush1.bf16.msra.mxu0 %v9978_v23  ;;  %7879 = vmatpush3.bf16.msra.mxu1 %v9981_v34 }
 0xce0   : > { %7853 = vmatprep.subr.bf16.mxu0 %v9984_v38  ;;  %7880 = vmatprep.subr.bf16.mxu1 %v9077_v7 }
 0xce3   : > { %7855 = vmatpush1.bf16.msra.mxu0 %v9988_v56  ;;  %7882 = vmatpush3.bf16.msra.mxu1 %v9991_v61 }
 0xce4   : > { %7857 = vmatprep.subr.bf16.mxu0 %v9994_v41  ;;  %7883 = vmatprep.subr.bf16.mxu1 %v9077_v7 }
 0xce7   : > { %7859 = vmatpush1.bf16.msra.mxu0 %v9998_v11  ;;  %7885 = vmatpush3.bf16.msra.mxu1 %v10001_v15 }
 0xce8   : > { %7861 = vmatprep.subr.bf16.mxu0 %v10004_v18  ;;  %7886 = vmatprep.subr.bf16.mxu1 %v9077_v7 }
 0xceb   : > { %7863 = vmatpush1.bf16.msra.mxu0 %v10008_v40  ;;  %7888 = vmatpush3.bf16.msra.mxu1 %v10011_v46 }
 0xcec   : > { %7865 = vmatprep.subr.bf16.mxu0 %v10014_v45  ;;  %7889 = vmatprep.subr.bf16.mxu1 %v9077_v7 }
 0xcef   : > { %7867 = vmatpush1.bf16.msra.mxu0 %v10018_v58  ;;  %7891 = vmatpush3.bf16.msra.mxu1 %v10021_v59 }
 0xcf0   : > { %7893 = vmatprep.subr.bf16.mxu0 %v9937_v32  ;;  %7924 = vmatprep.subr.bf16.mxu1 %v9077_v7 }
 0xda5   : > { %v2996_v4 = vpop.f32.mrb[26].mxu0  ;;  %v3067_v20 = vpop.f32.mrb[26].mxu1 }
 0xda6   : > { %v2997_v54 = vadd.f32 %v2996_v4, %v10067_v19  ;;  %v2998_v57 = vpop.f32.mrb[27].mxu0  ;;  %v6940_v12 = vpop.f32.mrb[27].mxu1  ;;  %v3068_v42 = vadd.f32 %v3067_v20, %v10083_v6 }
 0xda7   : > { %v2999_v9 = vadd.f32 %v2998_v57, %v10071_v30 }
 0xda8   : > { %v3072_v3 = vrot.slane %v2997_v54, 5  ;;  %v3092_v43 = vrot.slane %v3068_v42, 5 }
 0xda9   : > { %v3082_v63 = vrot.slane %v2999_v9, 5 }
 0xdaa   : > { %v3074_v10 = vadd.f32 %v3072_v3, %v10074_v22 }
 0xdab   : > { %v3084_v13 = vadd.f32 %v3082_v63, %v10079_v52 }
 0xdac   : > { %v5947_v14 = vmul.f32 -1.442695, %v3074_v10 }
 0xdad   : > { %v5948_v25 = vmul.f32 -1.442695, %v3084_v13 }
 0xdae   : > { %8321 = vpow2.f32 %v5947_v14 }
 0xdaf   : > { %8323 = vpow2.f32 %v5948_v25 }
 0xdb8   : > { %v8322_v29 = vpop.eup %8321 }
 0xdb9   : > { %v8324_v16 = vpop.eup %8323  ;;  %v3078_v17 = vadd.f32 1.0, %v8322_v29 }
 0xdba   : > { %v3088_v31 = vadd.f32 1.0, %v8324_v16 }
 0xdbb   : > { %8325 = vrcp.f32 %v3078_v17 }
 0xdbc   : > { %8327 = vrcp.f32 %v3088_v31 }
 0xdc5   : > { %v8326_v47 = vpop.eup %8325 }
 0xdc6   : > { %v8328_v35 = vpop.eup %8327  ;;  %v3094_v60 = vmul.f32 %v8326_v47, %v3092_v43 }
 0xdc7   : > { %v3101_v1 = vmul.f32 %v8328_v35, %v3099_v51  ;;  %v3097_v44 = vsub.f32 1.0, %v8328_v35 }
 0xdc8   : > { %v3095_v39 = vadd.f32 %v3094_v60, %v10087_v33 }
 0xdca   : > { %8329 = vtanh.f32 %v3095_v39 }
 0xdd4   : > { %v8330_v8 = vpop.eup %8329 }
 0xdd5   : > { %v3098_v48 = vmul.f32 %v8330_v8, %v3097_v44 }
 0xdd7   : > { %v10229_v55 = vadd.f32 %v3101_v1, %v3098_v48 }
 0xdd9   : > { %3103 = vst [vmem:[#allocation2] sm:$0x8] %v10229_v55  ;;  %v3105_v21 = vrot.slane %v10229_v55, 3  ;;  %v3276_v42 = vrot.slane %v10229_v55, 7 }
 0xddb   : > { %3172 = vmatmul.mubr.f32.vlgmr.msra.gmra.mrb[28].mxu0 %v3105_v21  ;;  %6974 = vmatmul.mubr.f32.vlgmr.msra.gmra.mrb[28].mxu1 %v3105_v21 }
 0xddc   : > { %7895 = vmatpush1.bf16.msra.mxu0 %v9948_v49  ;;  %7926 = vmatpush3.bf16.msra.mxu1 %v9950_v50 }
 0xddd   : > { %7897 = vmatprep.subr.bf16.mxu0 %v9952_v53  ;;  %7927 = vmatprep.subr.bf16.mxu1 %v9077_v7 }
 0xdde   : > { %3348 = vmatprep.mubr.f32.mxu0 %v9076_v5  ;;  %7008 = vmatprep.mubr.msk.f32.mxu1 %vm9078_vm0, %v9076_v5 }
 0xde0   : > { %7899 = vmatpush1.bf16.msra.mxu0 %v9955_v62  ;;  %7929 = vmatpush3.bf16.msra.mxu1 %v9958_v0 }
 0xde1   : > { %7901 = vmatprep.subr.bf16.mxu0 %v9961_v2  ;;  %7930 = vmatprep.subr.bf16.mxu1 %v9077_v7 }
 0xde4   : > { %7903 = vmatpush1.bf16.msra.mxu0 %v9968_v24  ;;  %7932 = vmatpush3.bf16.msra.mxu1 %v9971_v27 }
 0xde5   : > { %7905 = vmatprep.subr.bf16.mxu0 %v9974_v28  ;;  %7933 = vmatprep.subr.bf16.mxu1 %v9077_v7 }
 0xde8   : > { %7907 = vmatpush1.bf16.msra.mxu0 %v9978_v23  ;;  %7935 = vmatpush3.bf16.msra.mxu1 %v9981_v34 }
 0xde9   : > { %7909 = vmatprep.subr.bf16.mxu0 %v9984_v38  ;;  %7936 = vmatprep.subr.bf16.mxu1 %v9077_v7 }
 0xdec   : > { %7911 = vmatpush1.bf16.msra.mxu0 %v9988_v56  ;;  %7938 = vmatpush3.bf16.msra.mxu1 %v9991_v61 }
 0xded   : > { %7913 = vmatprep.subr.bf16.mxu0 %v9994_v41  ;;  %7939 = vmatprep.subr.bf16.mxu1 %v9077_v7 }
 0xdf0   : > { %7915 = vmatpush1.bf16.msra.mxu0 %v9998_v11  ;;  %7941 = vmatpush3.bf16.msra.mxu1 %v10001_v15 }
 0xdf1   : > { %7917 = vmatprep.subr.bf16.mxu0 %v10004_v18  ;;  %7942 = vmatprep.subr.bf16.mxu1 %v9077_v7 }
 0xdf4   : > { %7919 = vmatpush1.bf16.msra.mxu0 %v10008_v40  ;;  %7944 = vmatpush3.bf16.msra.mxu1 %v10011_v46 }
 0xdf5   : > { %7921 = vmatprep.subr.bf16.mxu0 %v10014_v45  ;;  %7945 = vmatprep.subr.bf16.mxu1 %v9077_v7 }
 0xdf8   : > { %7923 = vmatpush1.bf16.msra.mxu0 %v10018_v58  ;;  %7947 = vmatpush3.bf16.msra.mxu1 %v10021_v59 }
 0xdf9   : > { %7949 = vmatprep.subr.bf16.mxu0 %v9937_v32  ;;  %7980 = vmatprep.subr.bf16.mxu1 %v9077_v7 }
 0xeae   : > { %v3173_v26 = vpop.f32.mrb[28].mxu0  ;;  %v3244_v37 = vpop.f32.mrb[28].mxu1 }
 0xeaf   : > { %v3174_v36 = vadd.f32 %v3173_v26, %v10067_v19  ;;  %v3175_v4 = vpop.f32.mrb[29].mxu0  ;;  %v6975_v20 = vpop.f32.mrb[29].mxu1  ;;  %v3245_v16 = vadd.f32 %v3244_v37, %v10083_v6 }
 0xeb0   : > { %v3176_v54 = vadd.f32 %v3175_v4, %v10071_v30 }
 0xeb1   : > { %v3249_v57 = vrot.slane %v3174_v36, 4  ;;  %v3269_v17 = vrot.slane %v3245_v16, 4 }
 0xeb2   : > { %v3259_v12 = vrot.slane %v3176_v54, 4 }
 0xeb3   : > { %v3251_v9 = vadd.f32 %v3249_v57, %v10074_v22 }
 0xeb4   : > { %v3261_v3 = vadd.f32 %v3259_v12, %v10079_v52 }
 0xeb5   : > { %v5949_v63 = vmul.f32 -1.442695, %v3251_v9 }
 0xeb6   : > { %v5950_v10 = vmul.f32 -1.442695, %v3261_v3 }
 0xeb7   : > { %8331 = vpow2.f32 %v5949_v63 }
 0xeb8   : > { %8333 = vpow2.f32 %v5950_v10 }
 0xec1   : > { %v8332_v13 = vpop.eup %8331 }
 0xec2   : > { %v8334_v14 = vpop.eup %8333  ;;  %v3255_v25 = vadd.f32 1.0, %v8332_v13 }
 0xec3   : > { %v3265_v29 = vadd.f32 1.0, %v8334_v14 }
 0xec4   : > { %8335 = vrcp.f32 %v3255_v25 }
 0xec5   : > { %8337 = vrcp.f32 %v3265_v29 }
 0xece   : > { %v8336_v31 = vpop.eup %8335 }
 0xecf   : > { %v8338_v43 = vpop.eup %8337  ;;  %v3271_v47 = vmul.f32 %v8336_v31, %v3269_v17 }
 0xed0   : > { %v3278_v51 = vmul.f32 %v8338_v43, %v3276_v42  ;;  %v3274_v60 = vsub.f32 1.0, %v8338_v43 }
 0xed1   : > { %v3272_v35 = vadd.f32 %v3271_v47, %v10087_v33 }
 0xed3   : > { %8339 = vtanh.f32 %v3272_v35 }
 0xedd   : > { %v8340_v1 = vpop.eup %8339 }
 0xede   : > { %v3275_v39 = vmul.f32 %v8340_v1, %v3274_v60 }
 0xee0   : > { %v10275_v44 = vadd.f32 %v3278_v51, %v3275_v39 }
 0xee2   : > { %3280 = vst [vmem:[#allocation2] sm:$0x10] %v10275_v44  ;;  %v3282_v8 = vrot.slane %v10275_v44, 4  ;;  %v3453_v29 = vrot.slane %v10275_v44, 7 }
 0xee4   : > { %3349 = vmatmul.mubr.f32.vlgmr.msra.gmra.mrb[30].mxu0 %v3282_v8  ;;  %7009 = vmatmul.mubr.f32.vlgmr.msra.gmra.mrb[30].mxu1 %v3282_v8 }
 0xee5   : > { %7951 = vmatpush1.bf16.msra.mxu0 %v9948_v49  ;;  %7982 = vmatpush3.bf16.msra.mxu1 %v9950_v50 }
 0xee6   : > { %7953 = vmatprep.subr.bf16.mxu0 %v9952_v53  ;;  %7983 = vmatprep.subr.bf16.mxu1 %v9077_v7 }
 0xee7   : > { %3525 = vmatprep.mubr.f32.mxu0 %v9076_v5  ;;  %7043 = vmatprep.mubr.msk.f32.mxu1 %vm9078_vm0, %v9076_v5 }
 0xee9   : > { %7955 = vmatpush1.bf16.msra.mxu0 %v9955_v62  ;;  %7985 = vmatpush3.bf16.msra.mxu1 %v9958_v0 }
 0xeea   : > { %7957 = vmatprep.subr.bf16.mxu0 %v9961_v2  ;;  %7986 = vmatprep.subr.bf16.mxu1 %v9077_v7 }
 0xeed   : > { %7959 = vmatpush1.bf16.msra.mxu0 %v9968_v24  ;;  %7988 = vmatpush3.bf16.msra.mxu1 %v9971_v27 }
 0xeee   : > { %7961 = vmatprep.subr.bf16.mxu0 %v9974_v28  ;;  %7989 = vmatprep.subr.bf16.mxu1 %v9077_v7 }
 0xef1   : > { %7963 = vmatpush1.bf16.msra.mxu0 %v9978_v23  ;;  %7991 = vmatpush3.bf16.msra.mxu1 %v9981_v34 }
 0xef2   : > { %7965 = vmatprep.subr.bf16.mxu0 %v9984_v38  ;;  %7992 = vmatprep.subr.bf16.mxu1 %v9077_v7 }
 0xef5   : > { %7967 = vmatpush1.bf16.msra.mxu0 %v9988_v56  ;;  %7994 = vmatpush3.bf16.msra.mxu1 %v9991_v61 }
 0xef6   : > { %7969 = vmatprep.subr.bf16.mxu0 %v9994_v41  ;;  %7995 = vmatprep.subr.bf16.mxu1 %v9077_v7 }
 0xef9   : > { %7971 = vmatpush1.bf16.msra.mxu0 %v9998_v11  ;;  %7997 = vmatpush3.bf16.msra.mxu1 %v10001_v15 }
 0xefa   : > { %7973 = vmatprep.subr.bf16.mxu0 %v10004_v18  ;;  %7998 = vmatprep.subr.bf16.mxu1 %v9077_v7 }
 0xefd   : > { %7975 = vmatpush1.bf16.msra.mxu0 %v10008_v40  ;;  %8000 = vmatpush3.bf16.msra.mxu1 %v10011_v46 }
 0xefe   : > { %7977 = vmatprep.subr.bf16.mxu0 %v10014_v45  ;;  %8001 = vmatprep.subr.bf16.mxu1 %v9077_v7 }
 0xf01   : > { %7979 = vmatpush1.bf16.msra.mxu0 %v10018_v58  ;;  %8003 = vmatpush3.bf16.msra.mxu1 %v10021_v59 }
 0xf02   : > { %8005 = vmatprep.subr.bf16.mxu0 %v9937_v32  ;;  %8036 = vmatprep.subr.bf16.mxu1 %v9077_v7 }
 0xfb7   : > { %v3350_v48 = vpop.f32.mrb[30].mxu0  ;;  %v3421_v55 = vpop.f32.mrb[30].mxu1 }
 0xfb8   : > { %v3351_v21 = vadd.f32 %v3350_v48, %v10067_v19  ;;  %v3352_v26 = vpop.f32.mrb[31].mxu0  ;;  %v7010_v37 = vpop.f32.mrb[31].mxu1  ;;  %v3422_v13 = vadd.f32 %v3421_v55, %v10083_v6 }
 0xfb9   : > { %v3353_v36 = vadd.f32 %v3352_v26, %v10071_v30 }
 0xfba   : > { %v3426_v4 = vrot.slane %v3351_v21, 3  ;;  %v3446_v14 = vrot.slane %v3422_v13, 3 }
 0xfbb   : > { %v3436_v20 = vrot.slane %v3353_v36, 3 }
 0xfbc   : > { %v3428_v54 = vadd.f32 %v3426_v4, %v10074_v22 }
 0xfbd   : > { %v3438_v57 = vadd.f32 %v3436_v20, %v10079_v52 }
 0xfbe   : > { %v5951_v12 = vmul.f32 -1.442695, %v3428_v54 }
 0xfbf   : > { %v5952_v9 = vmul.f32 -1.442695, %v3438_v57 }
 0xfc0   : > { %8341 = vpow2.f32 %v5951_v12 }
 0xfc1   : > { %8343 = vpow2.f32 %v5952_v9 }
 0xfca   : > { %v8342_v32 = vpop.eup %8341 }
 0xfcb   : > { %v8344_v3 = vpop.eup %8343  ;;  %v3432_v63 = vadd.f32 1.0, %v8342_v32 }
 0xfcc   : > { %v3442_v10 = vadd.f32 1.0, %v8344_v3 }
 0xfcd   : > { %8345 = vrcp.f32 %v3432_v63 }
 0xfce   : > { %8347 = vrcp.f32 %v3442_v10 }
 0xfd7   : > { %v8346_v25 = vpop.eup %8345 }
 0xfd8   : > { %v8348_v16 = vpop.eup %8347  ;;  %v3448_v17 = vmul.f32 %v8346_v25, %v3446_v14 }
 0xfd9   : > { %v3455_v31 = vmul.f32 %v8348_v16, %v3453_v29  ;;  %v3451_v43 = vsub.f32 1.0, %v8348_v16 }
 0xfda   : > { %v3449_v42 = vadd.f32 %v3448_v17, %v10087_v33 }
 0xfdc   : > { %8349 = vtanh.f32 %v3449_v42 }
 0xfe6   : > { %v8350_v47 = vpop.eup %8349 }
 0xfe7   : > { %v3452_v51 = vmul.f32 %v8350_v47, %v3451_v43 }
 0xfe9   : > { %v10321_v35 = vadd.f32 %v3455_v31, %v3452_v51 }
 0xfeb   : > { %3457 = vst [vmem:[#allocation2] sm:$0x20] %v10321_v35  ;;  %v3459_v60 = vrot.slane %v10321_v35, 5 }
 0xfed   : > { %3526 = vmatmul.mubr.f32.vlgmr.msra.gmra.mrb[32].mxu0 %v3459_v60  ;;  %7044 = vmatmul.mubr.f32.vlgmr.msra.gmra.mrb[32].mxu1 %v3459_v60 }
 0xfee   : > { %8007 = vmatpush1.bf16.msra.mxu0 %v9948_v49  ;;  %8038 = vmatpush3.bf16.msra.mxu1 %v9950_v50 }
 0xfef   : > { %8009 = vmatprep.subr.bf16.mxu0 %v9952_v53  ;;  %8039 = vmatprep.subr.bf16.mxu1 %v9077_v7 }
 0xff0   : > { %3702 = vmatprep.mubr.f32.mxu0 %v9076_v5  ;;  %7078 = vmatprep.mubr.msk.f32.mxu1 %vm9078_vm0, %v9076_v5 }
 0xff2   : > { %8011 = vmatpush1.bf16.msra.mxu0 %v9955_v62  ;;  %8041 = vmatpush3.bf16.msra.mxu1 %v9958_v0 }
 0xff3   : > { %8013 = vmatprep.subr.bf16.mxu0 %v9961_v2  ;;  %8042 = vmatprep.subr.bf16.mxu1 %v9077_v7 }
 0xff6   : > { %8015 = vmatpush1.bf16.msra.mxu0 %v9968_v24  ;;  %8044 = vmatpush3.bf16.msra.mxu1 %v9971_v27 }
 0xff7   : > { %8017 = vmatprep.subr.bf16.mxu0 %v9974_v28  ;;  %8045 = vmatprep.subr.bf16.mxu1 %v9077_v7 }
 0xffa   : > { %8019 = vmatpush1.bf16.msra.mxu0 %v9978_v23  ;;  %8047 = vmatpush3.bf16.msra.mxu1 %v9981_v34 }
 0xffb   : > { %8021 = vmatprep.subr.bf16.mxu0 %v9984_v38  ;;  %8048 = vmatprep.subr.bf16.mxu1 %v9077_v7 }
 0xffe   : > { %8023 = vmatpush1.bf16.msra.mxu0 %v9988_v56  ;;  %8050 = vmatpush3.bf16.msra.mxu1 %v9991_v61 }
 0xfff   : > { %8025 = vmatprep.subr.bf16.mxu0 %v9994_v41  ;;  %8051 = vmatprep.subr.bf16.mxu1 %v9077_v7 }
0x1002   : > { %8027 = vmatpush1.bf16.msra.mxu0 %v9998_v11  ;;  %8053 = vmatpush3.bf16.msra.mxu1 %v10001_v15 }
0x1003   : > { %8029 = vmatprep.subr.bf16.mxu0 %v10004_v18  ;;  %8054 = vmatprep.subr.bf16.mxu1 %v9077_v7  ;;  %v3630_v18 = vrot.slane %v10321_v35, 7 }
0x1006   : > { %8031 = vmatpush1.bf16.msra.mxu0 %v10008_v40  ;;  %8056 = vmatpush3.bf16.msra.mxu1 %v10011_v46 }
0x1007   : > { %8033 = vmatprep.subr.bf16.mxu0 %v10014_v45  ;;  %8057 = vmatprep.subr.bf16.mxu1 %v9077_v7 }
0x100a   : > { %8035 = vmatpush1.bf16.msra.mxu0 %v10018_v58  ;;  %8059 = vmatpush3.bf16.msra.mxu1 %v10021_v59 }
0x10c0   : > { %v3527_v5 = vpop.f32.mrb[32].mxu0  ;;  %v3598_v49 = vpop.f32.mrb[32].mxu1 }
0x10c1   : > { %v3528_v50 = vadd.f32 %v3527_v5, %v10067_v19  ;;  %v3529_v53 = vpop.f32.mrb[33].mxu0  ;;  %v7045_v62 = vpop.f32.mrb[33].mxu1  ;;  %v3599_v41 = vadd.f32 %v3598_v49, %v10083_v6 }
0x10c2   : > { %v3530_v0 = vadd.f32 %v3529_v53, %v10071_v30 }
0x10c3   : > { %v3603_v2 = vrot.slane %v3528_v50, 2  ;;  %v3623_v11 = vrot.slane %v3599_v41, 2 }
0x10c4   : > { %v3613_v24 = vrot.slane %v3530_v0, 2 }
0x10c5   : > { %v3605_v27 = vadd.f32 %v3603_v2, %v10074_v22 }
0x10c6   : > { %v3615_v28 = vadd.f32 %v3613_v24, %v10079_v52 }
0x10c7   : > { %v5953_v23 = vmul.f32 -1.442695, %v3605_v27 }
0x10c8   : > { %v5954_v7 = vmul.f32 -1.442695, %v3615_v28 }
0x10c9   : > { %8351 = vpow2.f32 %v5953_v23 }
0x10ca   : > { %8353 = vpow2.f32 %v5954_v7 }
0x10d3   : > { %v8352_v34 = vpop.eup %8351 }
0x10d4   : > { %v8354_v38 = vpop.eup %8353  ;;  %v3609_v56 = vadd.f32 1.0, %v8352_v34 }
0x10d5   : > { %v3619_v61 = vadd.f32 1.0, %v8354_v38 }
0x10d6   : > { %8355 = vrcp.f32 %v3609_v56 }
0x10d7   : > { %8357 = vrcp.f32 %v3619_v61 }
0x10e0   : > { %v8356_v15 = vpop.eup %8355 }
0x10e1   : > { %v8358_v40 = vpop.eup %8357  ;;  %v3625_v46 = vmul.f32 %v8356_v15, %v3623_v11 }
0x10e2   : > { %v3632_v45 = vmul.f32 %v8358_v40, %v3630_v18  ;;  %v3628_v59 = vsub.f32 1.0, %v8358_v40 }
0x10e3   : > { %v3626_v58 = vadd.f32 %v3625_v46, %v10087_v33 }
0x10e5   : > { %8359 = vtanh.f32 %v3626_v58 }
0x10ef   : > { %v8360_v1 = vpop.eup %8359 }
0x10f0   : > { %v3629_v39 = vmul.f32 %v8360_v1, %v3628_v59 }
0x10f2   : > { %v3633_v44 = vadd.f32 %v3632_v45, %v3629_v39 }
0x10f4   : > { %3634 = vst [vmem:[#allocation2] sm:$0x40] %v3633_v44  ;;  %v3636_v8 = vrot.slane %v3633_v44, 6  ;;  %v3807_v14 = vrot.slane %v3633_v44, 7 }
0x10f6   : > { %3703 = vmatmul.mubr.f32.vlgmr.msra.gmra.mrb[34].mxu0 %v3636_v8  ;;  %7079 = vmatmul.mubr.f32.vlgmr.msra.gmra.mrb[34].mxu1 %v3636_v8 }
0x11c9   : > { %v3704_v48 = vpop.f32.mrb[34].mxu0  ;;  %v3775_v55 = vpop.f32.mrb[34].mxu1 }
0x11ca   : > { %v3705_v21 = vadd.f32 %v3704_v48, %v10067_v19  ;;  %v3706_v26 = vpop.f32.mrb[35].mxu0  ;;  %v7080_v37 = vpop.f32.mrb[35].mxu1  ;;  %v3776_v19 = vadd.f32 %v3775_v55, %v10083_v6 }
0x11cb   : > { %v3707_v36 = vadd.f32 %v3706_v26, %v10071_v30 }
0x11cc   : > { %v3780_v4 = vrot.slane %v3705_v21, 1  ;;  %v3800_v13 = vrot.slane %v3776_v19, 1 }
0x11cd   : > { %v3790_v20 = vrot.slane %v3707_v36, 1 }
0x11ce   : > { %v3782_v54 = vadd.f32 %v3780_v4, %v10074_v22 }
0x11cf   : > { %v3792_v57 = vadd.f32 %v3790_v20, %v10079_v52 }
0x11d0   : > { %v5955_v12 = vmul.f32 -1.442695, %v3782_v54 }
0x11d1   : > { %v5956_v9 = vmul.f32 -1.442695, %v3792_v57 }
0x11d2   : > { %8361 = vpow2.f32 %v5955_v12 }
0x11d3   : > { %8363 = vpow2.f32 %v5956_v9 }
0x11dc   : > { %v8362_v32 = vpop.eup %8361 }
0x11dd   : > { %v8364_v3 = vpop.eup %8363  ;;  %v3786_v63 = vadd.f32 1.0, %v8362_v32 }
0x11de   : > { %v3796_v10 = vadd.f32 1.0, %v8364_v3 }
0x11df   : > { %8365 = vrcp.f32 %v3786_v63 }
0x11e0   : > { %8367 = vrcp.f32 %v3796_v10 }
0x11e9   : > { %v8366_v30 = vpop.eup %8365 }
0x11ea   : > { %v8368_v25 = vpop.eup %8367  ;;  %v3802_v29 = vmul.f32 %v8366_v30, %v3800_v13 }
0x11eb   : > { %v3809_v22 = vmul.f32 %v8368_v25, %v3807_v14  ;;  %v3805_v16 = vsub.f32 1.0, %v8368_v25 }
0x11ec   : > { %v3803_v52 = vadd.f32 %v3802_v29, %v10087_v33 }
0x11ee   : > { %8369 = vtanh.f32 %v3803_v52 }
0x11f8   : > { %v8370_v17 = vpop.eup %8369 }
0x11f9   : > { %v3806_v31 = vmul.f32 %v8370_v17, %v3805_v16 }
0x11fb   : > { %v3810_v42 = vadd.f32 %v3809_v22, %v3806_v31 }
0x11fd   : > { %3811 = vst [vmem:[#allocation2] sm:$0x80] %v3810_v42 }
0x11fe PF: > { %v8371_v6 = vld [vmem:[%s9478_s11 + $0x4] ss:$108 sps:$4 sm:$0xff]   ;;  %v8373_v43 = vld [vmem:[%s9478_s11 + $0xc] ss:$108 sps:$4 sm:$0xff]   ;;  %v9079_v47 = vmov 0   ;;  %vm9081_vm2 = vmmov 0  }
0x11ff   : > { %5158 = vmatprep.mubr.bf16.mxu0 %v9079_v47  ;;  %5199 = vmatprep.mubr.bf16.mxu1 %v9079_v47  ;;  %v8375_v33 = vld [vmem:[%s9478_s11] ss:$108 sps:$4 sm:$0xff]   ;;  %v8376_v51 = vld [vmem:[%s9478_s11 + $0x8] ss:$108 sps:$4 sm:$0xff]   ;;  %v8379_v60 = vld [vmem:[%s9478_s11 + $0xe4] ss:$108 sps:$4 sm:$0xff]  }
0x1200   : > { %5126 = vmatprep.subr.bf16.mxu0 %v8371_v6  ;;  %5167 = vmatprep.subr.bf16.mxu1 %v8373_v43  ;;  %v8377_v35 = vld [vmem:[%s9478_s11 + $0xdc] ss:$108 sps:$4 sm:$0xff]   ;;  %v8381_v5 = vld [vmem:[%s9478_s11 + $0xd8] ss:$108 sps:$4 sm:$0xff]   ;;  %v8382_v49 = vld [vmem:[%s9478_s11 + $0xe0] ss:$108 sps:$4 sm:$0xff]  }
0x1201   : > { %5127 = vmatpush1.bf16.msra.mxu0 %v8375_v33  ;;  %5168 = vmatpush1.bf16.msra.mxu1 %v8376_v51  ;;  %v8383_v50 = vld [vmem:[%s9478_s11 + $0x1b4] ss:$108 sps:$4 sm:$0xff]   ;;  %v8385_v53 = vld [vmem:[%s9478_s11 + $0x1bc] ss:$108 sps:$4 sm:$0xff]   ;;  %v8388_v0 = vld [vmem:[%s9478_s11 + $0x1b8] ss:$108 sps:$4 sm:$0xff]  }
0x1202   : > { %5128 = vmatprep.subr.bf16.mxu0 %v8377_v35  ;;  %5169 = vmatprep.subr.bf16.mxu1 %v8379_v60  ;;  %v8387_v62 = vld [vmem:[%s9478_s11 + $0x1b0] ss:$108 sps:$4 sm:$0xff]   ;;  %v8389_v2 = vld [vmem:[%s9478_s11 + $0x28c] ss:$108 sps:$4 sm:$0xff]   ;;  %v8391_v24 = vld [vmem:[%s9478_s11 + $0x294] ss:$108 sps:$4 sm:$0xff]  }
0x1203   : > { %v8393_v27 = vld [vmem:[%s9478_s11 + $0x288] ss:$108 sps:$4 sm:$0xff]   ;;  %v8394_v28 = vld [vmem:[%s9478_s11 + $0x290] ss:$108 sps:$4 sm:$0xff]   ;;  %v8397_v7 = vld [vmem:[%s9478_s11 + $0x36c] ss:$108 sps:$4 sm:$0xff]  }
0x1204   : > { %v8395_v23 = vld [vmem:[%s9478_s11 + $0x364] ss:$108 sps:$4 sm:$0xff]   ;;  %v8399_v34 = vld [vmem:[%s9478_s11 + $0x360] ss:$108 sps:$4 sm:$0xff]   ;;  %v8400_v38 = vld [vmem:[%s9478_s11 + $0x368] ss:$108 sps:$4 sm:$0xff]  }
0x1205   : > { %5129 = vmatpush1.bf16.msra.mxu0 %v8381_v5  ;;  %5170 = vmatpush1.bf16.msra.mxu1 %v8382_v49  ;;  %v8401_v56 = vld [vmem:[%s9478_s11 + $0x43c] ss:$108 sps:$4 sm:$0xff]   ;;  %v8403_v61 = vld [vmem:[%s9478_s11 + $0x444] ss:$108 sps:$4 sm:$0xff]   ;;  %v8406_v11 = vld [vmem:[%s9478_s11 + $0x440] ss:$108 sps:$4 sm:$0xff]  }
0x1206   : > { %5130 = vmatprep.subr.bf16.mxu0 %v8383_v50  ;;  %5171 = vmatprep.subr.bf16.mxu1 %v8385_v53  ;;  %v8405_v41 = vld [vmem:[%s9478_s11 + $0x438] ss:$108 sps:$4 sm:$0xff]   ;;  %v8407_v15 = vld [vmem:[%s9478_s11 + $0x514] ss:$108 sps:$4 sm:$0xff]   ;;  %v8409_v18 = vld [vmem:[%s9478_s11 + $0x51c] ss:$108 sps:$4 sm:$0xff]  }
0x1207   : > { %v8411_v40 = vld [vmem:[%s9478_s11 + $0x510] ss:$108 sps:$4 sm:$0xff]   ;;  %v8412_v46 = vld [vmem:[%s9478_s11 + $0x518] ss:$108 sps:$4 sm:$0xff]   ;;  %v8415_v58 = vld [vmem:[%s9478_s11 + $0x5f4] ss:$108 sps:$4 sm:$0xff]  }
0x1208   : > { %v8413_v45 = vld [vmem:[%s9478_s11 + $0x5ec] ss:$108 sps:$4 sm:$0xff]   ;;  %v8417_v59 = vld [vmem:[%s9478_s11 + $0x5e8] ss:$108 sps:$4 sm:$0xff]   ;;  %v8418_v1 = vld [vmem:[%s9478_s11 + $0x5f0] ss:$108 sps:$4 sm:$0xff]  }
0x1209   : > { %5131 = vmatpush1.bf16.msra.mxu0 %v8387_v62  ;;  %5172 = vmatpush1.bf16.msra.mxu1 %v8388_v0  ;;  %v3812_v39 = vld [vmem:[#allocation2] sm:$0xff]  ;;  %v8424_v8 = vld [vmem:[%s9478_s11 + $0x1c] ss:$108 sps:$4 sm:$0xff]   ;;  %v8422_v21 = vld [vmem:[%s9478_s11 + $0x18] ss:$108 sps:$4 sm:$0xff]   ;;  %s6177_s17 = smul.u32 3456, %s9159_s19 }
0x120a   : > { %5132 = vmatprep.subr.bf16.mxu0 %v8389_v2  ;;  %5173 = vmatprep.subr.bf16.mxu1 %v8391_v24  ;;  %v8421_v44 = vld [vmem:[%s9478_s11 + $0x14] ss:$108 sps:$4 sm:$0xff]   ;;  %v10407_v48 = vpack.c.bf16 %v3812_v39, %v3812_v39  ;;  %v8419_v55 = vld [vmem:[%s9478_s11 + $0x10] ss:$108 sps:$4 sm:$0xff]   ;;  %v8427_v26 = vld [vmem:[%s9478_s11 + $0xec] ss:$108 sps:$4 sm:$0xff]  }
0x120b   : > { %v8430_v37 = vld [vmem:[%s9478_s11 + $0xf4] ss:$108 sps:$4 sm:$0xff]   ;;  %v8428_v4 = vld [vmem:[%s9478_s11 + $0xf0] ss:$108 sps:$4 sm:$0xff]   ;;  %v8436_v54 = vld [vmem:[%s9478_s11 + $0x1cc] ss:$108 sps:$4 sm:$0xff]  }
0x120c   : > { %v8425_v36 = vld [vmem:[%s9478_s11 + $0xe8] ss:$108 sps:$4 sm:$0xff]   ;;  %v8433_v20 = vld [vmem:[%s9478_s11 + $0x1c4] ss:$108 sps:$4 sm:$0xff]   ;;  %v8431_v57 = vld [vmem:[%s9478_s11 + $0x1c0] ss:$108 sps:$4 sm:$0xff]  }
0x120d   : > { %5133 = vmatpush1.bf16.msra.mxu0 %v8393_v27  ;;  %5174 = vmatpush1.bf16.msra.mxu1 %v8394_v28  ;;  %v8434_v12 = vld [vmem:[%s9478_s11 + $0x1c8] ss:$108 sps:$4 sm:$0xff]   ;;  %v8442_v32 = vld [vmem:[%s9478_s11 + $0x2a4] ss:$108 sps:$4 sm:$0xff]   ;;  %v8440_v63 = vld [vmem:[%s9478_s11 + $0x2a0] ss:$108 sps:$4 sm:$0xff]  }
0x120e   : > { %5134 = vmatprep.subr.bf16.mxu0 %v8395_v23  ;;  %5175 = vmatprep.subr.bf16.mxu1 %v8397_v7  ;;  %v8439_v9 = vld [vmem:[%s9478_s11 + $0x29c] ss:$108 sps:$4 sm:$0xff]   ;;  %v8437_v3 = vld [vmem:[%s9478_s11 + $0x298] ss:$108 sps:$4 sm:$0xff]   ;;  %v8445_v10 = vld [vmem:[%s9478_s11 + $0x374] ss:$108 sps:$4 sm:$0xff]  }
0x120f   : > { %v8448_v19 = vld [vmem:[%s9478_s11 + $0x37c] ss:$108 sps:$4 sm:$0xff]   ;;  %v8446_v30 = vld [vmem:[%s9478_s11 + $0x378] ss:$108 sps:$4 sm:$0xff]   ;;  %v8454_v25 = vld [vmem:[%s9478_s11 + $0x454] ss:$108 sps:$4 sm:$0xff]  }
0x1210   : > { %v8443_v13 = vld [vmem:[%s9478_s11 + $0x370] ss:$108 sps:$4 sm:$0xff]   ;;  %v8451_v14 = vld [vmem:[%s9478_s11 + $0x44c] ss:$108 sps:$4 sm:$0xff]   ;;  %v8449_v29 = vld [vmem:[%s9478_s11 + $0x448] ss:$108 sps:$4 sm:$0xff]  }
0x1211   : > { %5135 = vmatpush1.bf16.msra.mxu0 %v8399_v34  ;;  %5176 = vmatpush1.bf16.msra.mxu1 %v8400_v38  ;;  %v8452_v22 = vld [vmem:[%s9478_s11 + $0x450] ss:$108 sps:$4 sm:$0xff]   ;;  %v8460_v16 = vld [vmem:[%s9478_s11 + $0x52c] ss:$108 sps:$4 sm:$0xff]   ;;  %v8458_v31 = vld [vmem:[%s9478_s11 + $0x528] ss:$108 sps:$4 sm:$0xff]  }
0x1212   : > { %5136 = vmatprep.subr.bf16.mxu0 %v8401_v56  ;;  %5177 = vmatprep.subr.bf16.mxu1 %v8403_v61  ;;  %v8457_v52 = vld [vmem:[%s9478_s11 + $0x524] ss:$108 sps:$4 sm:$0xff]   ;;  %v8455_v17 = vld [vmem:[%s9478_s11 + $0x520] ss:$108 sps:$4 sm:$0xff]   ;;  %v8463_v42 = vld [vmem:[%s9478_s11 + $0x5fc] ss:$108 sps:$4 sm:$0xff]  }
0x1213   : > { %v8466_v6 = vld [vmem:[%s9478_s11 + $0x604] ss:$108 sps:$4 sm:$0xff]   ;;  %v8464_v33 = vld [vmem:[%s9478_s11 + $0x600] ss:$108 sps:$4 sm:$0xff]   ;;  %v8470_v5 = vld [vmem:[%s9478_s11 + $0x28] ss:$108 sps:$4 sm:$0xff]  }
0x1214   : > { %v8461_v43 = vld [vmem:[%s9478_s11 + $0x5f8] ss:$108 sps:$4 sm:$0xff]   ;;  %v8467_v60 = vld [vmem:[%s9478_s11 + $0x20] ss:$108 sps:$4 sm:$0xff]   ;;  %v8475_v49 = vld [vmem:[%s9478_s11 + $0xfc] ss:$108 sps:$4 sm:$0xff]  }
0x1215   : > { %5137 = vmatpush1.bf16.msra.mxu0 %v8405_v41  ;;  %5178 = vmatpush1.bf16.msra.mxu1 %v8406_v11  ;;  %v8469_v51 = vld [vmem:[%s9478_s11 + $0x24] ss:$108 sps:$4 sm:$0xff]   ;;  %v8472_v35 = vld [vmem:[%s9478_s11 + $0x2c] ss:$108 sps:$4 sm:$0xff]   ;;  %v8481_v0 = vld [vmem:[%s9478_s11 + $0x1d4] ss:$108 sps:$4 sm:$0xff]  }
0x1216   : > { %5138 = vmatprep.subr.bf16.mxu0 %v8407_v15  ;;  %5179 = vmatprep.subr.bf16.mxu1 %v8409_v18  ;;  %v8478_v50 = vld [vmem:[%s9478_s11 + $0x104] ss:$108 sps:$4 sm:$0xff]   ;;  %v8476_v62 = vld [vmem:[%s9478_s11 + $0x100] ss:$108 sps:$4 sm:$0xff]   ;;  %v8484_v2 = vld [vmem:[%s9478_s11 + $0x1dc] ss:$108 sps:$4 sm:$0xff]  }
0x1217   : > { %v8473_v53 = vld [vmem:[%s9478_s11 + $0xf8] ss:$108 sps:$4 sm:$0xff]   ;;  %v8479_v24 = vld [vmem:[%s9478_s11 + $0x1d0] ss:$108 sps:$4 sm:$0xff]   ;;  %v8490_v23 = vld [vmem:[%s9478_s11 + $0x2b4] ss:$108 sps:$4 sm:$0xff]  }
0x1218   : > { %v8482_v27 = vld [vmem:[%s9478_s11 + $0x1d8] ss:$108 sps:$4 sm:$0xff]   ;;  %v8485_v7 = vld [vmem:[%s9478_s11 + $0x2a8] ss:$108 sps:$4 sm:$0xff]   ;;  %v8488_v34 = vld [vmem:[%s9478_s11 + $0x2b0] ss:$108 sps:$4 sm:$0xff]  }
0x1219   : > { %5139 = vmatpush1.bf16.msra.mxu0 %v8411_v40  ;;  %5180 = vmatpush1.bf16.msra.mxu1 %v8412_v46  ;;  %v8487_v28 = vld [vmem:[%s9478_s11 + $0x2ac] ss:$108 sps:$4 sm:$0xff]   ;;  %v8493_v38 = vld [vmem:[%s9478_s11 + $0x384] ss:$108 sps:$4 sm:$0xff]   ;;  %v8494_v41 = vld [vmem:[%s9478_s11 + $0x388] ss:$108 sps:$4 sm:$0xff]  }
0x121a   : > { %5140 = vmatprep.subr.bf16.mxu0 %v8413_v45  ;;  %5181 = vmatprep.subr.bf16.mxu1 %v8415_v58  ;;  %v8496_v56 = vld [vmem:[%s9478_s11 + $0x38c] ss:$108 sps:$4 sm:$0xff]   ;;  %v8499_v11 = vld [vmem:[%s9478_s11 + $0x45c] ss:$108 sps:$4 sm:$0xff]   ;;  %v8502_v15 = vld [vmem:[%s9478_s11 + $0x464] ss:$108 sps:$4 sm:$0xff]  }
0x121b   : > { %v8491_v61 = vld [vmem:[%s9478_s11 + $0x380] ss:$108 sps:$4 sm:$0xff]   ;;  %v8497_v18 = vld [vmem:[%s9478_s11 + $0x458] ss:$108 sps:$4 sm:$0xff]   ;;  %v8508_v45 = vld [vmem:[%s9478_s11 + $0x53c] ss:$108 sps:$4 sm:$0xff]  }
0x121c   : > { %v8500_v40 = vld [vmem:[%s9478_s11 + $0x460] ss:$108 sps:$4 sm:$0xff]   ;;  %v8503_v58 = vld [vmem:[%s9478_s11 + $0x530] ss:$108 sps:$4 sm:$0xff]   ;;  %s5741_s27 = sshll.u32 %s9485_s18, 4  ;;  %s10734_s12 = sld [smem:[#allocation31_spill]]  ;;  %s10647_s27 = int_to_ptr.vmem [resolvable:$true] %s5741_s27 }
0x121d   : > { %5141 = vmatpush1.bf16.msra.mxu0 %v8417_v59  ;;  %5182 = vmatpush1.bf16.msra.mxu1 %v8418_v1  ;;  %v8505_v46 = vld [vmem:[%s9478_s11 + $0x534] ss:$108 sps:$4 sm:$0xff]   ;;  %v8506_v59 = vld [vmem:[%s9478_s11 + $0x538] ss:$108 sps:$4 sm:$0xff]   ;;  %s5727_s19 = scalar_lea.sflag [#allocation5], %s9474_s25  ;;  %s8973_s28 = scalar_lea.vmem %s10647_s27, 3456 }
0x121e   : > { %5208 = vmatprep.subr.bf16.mxu0 %v8421_v44  ;;  %5249 = vmatprep.subr.bf16.mxu1 %v8424_v8  ;;  %v8511_v1 = vld [vmem:[%s9478_s11 + $0x60c] ss:$108 sps:$4 sm:$0xff]   ;;  %v8514_v39 = vld [vmem:[%s9478_s11 + $0x614] ss:$108 sps:$4 sm:$0xff]   ;;  %v8512_v8 = vld [vmem:[%s9478_s11 + $0x610] ss:$108 sps:$4 sm:$0xff]   ;;  %p8974_p7 = scmp.ne.s32.totalorder %s10647_s27, %s8973_s28 }
0x121f   : > { %v8509_v44 = vld [vmem:[%s9478_s11 + $0x608] ss:$108 sps:$4 sm:$0xff]   ;;  %p10735_p2 = scmp.ne.s32.totalorder %s10718_s21, 0  ;;  %s9082_s29 = smov [#allocation20]  }
0x1220   : > { %5159 = vmatmul.mubr.bf16.vlgmr.msra.gmra.mrb[0].mxu0 %v10407_v48  ;;  %5200 = vmatmul.mubr.bf16.vlgmr.msra.gmra.mrb[0].mxu1 %v10407_v48  ;;  %s8977_s24 = sshll.u32 %s9082_s29, 4  ;;  %s8978_s24 = int_to_ptr.vmem [resolvable:$false] %s8977_s24 }
0x1221   : > { %5209 = vmatpush1.bf16.msra.mxu0 %v8419_v55  ;;  %5250 = vmatpush1.bf16.msra.mxu1 %v8422_v21  ;;  %v8517_v55 = vld [vmem:[%s9478_s11 + $0x34] ss:$108 sps:$4 sm:$0xff]   ;;  %v8520_v21 = vld [vmem:[%s9478_s11 + $0x3c] ss:$108 sps:$4 sm:$0xff]   ;;  %p8975_p8 = pnand %p8974_p7, %p10735_p2  ;;  %s8979_s1 = scalar_lea.vmem %s8978_s24, 6912 }
0x1222   : > { %5210 = vmatprep.subr.bf16.mxu0 %v8427_v26  ;;  %5251 = vmatprep.subr.bf16.mxu1 %v8430_v37  ;;  %v8515_v26 = vld [vmem:[%s9478_s11 + $0x30] ss:$108 sps:$4 sm:$0xff]   ;;  %v8518_v37 = vld [vmem:[%s9478_s11 + $0x38] ss:$108 sps:$4 sm:$0xff]   ;;  %s10645_s10 = scalar_lea.hbm %s10734_s12, %s6177_s17  ;;  %p8980_p5 = scmp.lt.s32.totalorder %s10647_s27, %s8978_s24 }
0x1223   : > { %5240 = vmatprep.mubr.bf16.mxu0 %v9079_v47  ;;  %5281 = vmatprep.mubr.bf16.mxu1 %v9079_v47  ;;  %p8976_p0 = pneg %p8975_p8  ;;  %p8981_p6 = scmp.lt.s32.totalorder %s8979_s1, %s8973_s28 }
0x1225   : > { %5211 = vmatpush1.bf16.msra.mxu0 %v8425_v36  ;;  %5252 = vmatpush1.bf16.msra.mxu1 %v8428_v4  ;;  %v8523_v36 = vld [vmem:[%s9478_s11 + $0x10c] ss:$108 sps:$4 sm:$0xff]   ;;  %v8526_v4 = vld [vmem:[%s9478_s11 + $0x114] ss:$108 sps:$4 sm:$0xff]   ;;  %p8982_p10 = por %p8981_p6, %p8980_p5 }
0x1226   : > { %5212 = vmatprep.subr.bf16.mxu0 %v8433_v20  ;;  %5253 = vmatprep.subr.bf16.mxu1 %v8436_v54  ;;  %v8521_v20 = vld [vmem:[%s9478_s11 + $0x108] ss:$108 sps:$4 sm:$0xff]   ;;  %v8524_v54 = vld [vmem:[%s9478_s11 + $0x110] ss:$108 sps:$4 sm:$0xff]  }
0x1227   : > { %p8983_p9 = pnand %p8982_p10, %p8976_p0 }
0x1229   : > { %5213 = vmatpush1.bf16.msra.mxu0 %v8431_v57  ;;  %5254 = vmatpush1.bf16.msra.mxu1 %v8434_v12  ;;  %v8529_v57 = vld [vmem:[%s9478_s11 + $0x1e4] ss:$108 sps:$4 sm:$0xff]   ;;  %v8532_v12 = vld [vmem:[%s9478_s11 + $0x1ec] ss:$108 sps:$4 sm:$0xff]  }
0x122a   : > { %5214 = vmatprep.subr.bf16.mxu0 %v8439_v9  ;;  %5255 = vmatprep.subr.bf16.mxu1 %v8442_v32  ;;  %v8527_v9 = vld [vmem:[%s9478_s11 + $0x1e0] ss:$108 sps:$4 sm:$0xff]   ;;  %v8530_v32 = vld [vmem:[%s9478_s11 + $0x1e8] ss:$108 sps:$4 sm:$0xff]  }
0x122d   : > { %5215 = vmatpush1.bf16.msra.mxu0 %v8437_v3  ;;  %5256 = vmatpush1.bf16.msra.mxu1 %v8440_v63  ;;  %v8535_v3 = vld [vmem:[%s9478_s11 + $0x2bc] ss:$108 sps:$4 sm:$0xff]   ;;  %v8538_v63 = vld [vmem:[%s9478_s11 + $0x2c4] ss:$108 sps:$4 sm:$0xff]  }
0x122e   : > { %5216 = vmatprep.subr.bf16.mxu0 %v8445_v10  ;;  %5257 = vmatprep.subr.bf16.mxu1 %v8448_v19  ;;  %v8533_v10 = vld [vmem:[%s9478_s11 + $0x2b8] ss:$108 sps:$4 sm:$0xff]   ;;  %v8536_v19 = vld [vmem:[%s9478_s11 + $0x2c0] ss:$108 sps:$4 sm:$0xff]  }
0x1231   : > { %5217 = vmatpush1.bf16.msra.mxu0 %v8443_v13  ;;  %5258 = vmatpush1.bf16.msra.mxu1 %v8446_v30  ;;  %v8541_v13 = vld [vmem:[%s9478_s11 + $0x394] ss:$108 sps:$4 sm:$0xff]   ;;  %v8544_v30 = vld [vmem:[%s9478_s11 + $0x39c] ss:$108 sps:$4 sm:$0xff]  }
0x1232   : > { %5218 = vmatprep.subr.bf16.mxu0 %v8451_v14  ;;  %5259 = vmatprep.subr.bf16.mxu1 %v8454_v25  ;;  %v8539_v14 = vld [vmem:[%s9478_s11 + $0x390] ss:$108 sps:$4 sm:$0xff]   ;;  %v8542_v25 = vld [vmem:[%s9478_s11 + $0x398] ss:$108 sps:$4 sm:$0xff]  }
0x1235   : > { %5219 = vmatpush1.bf16.msra.mxu0 %v8449_v29  ;;  %5260 = vmatpush1.bf16.msra.mxu1 %v8452_v22  ;;  %v8547_v29 = vld [vmem:[%s9478_s11 + $0x46c] ss:$108 sps:$4 sm:$0xff]   ;;  %v8550_v22 = vld [vmem:[%s9478_s11 + $0x474] ss:$108 sps:$4 sm:$0xff]  }
0x1236   : > { %5220 = vmatprep.subr.bf16.mxu0 %v8457_v52  ;;  %5261 = vmatprep.subr.bf16.mxu1 %v8460_v16  ;;  %v8545_v52 = vld [vmem:[%s9478_s11 + $0x468] ss:$108 sps:$4 sm:$0xff]   ;;  %v8548_v16 = vld [vmem:[%s9478_s11 + $0x470] ss:$108 sps:$4 sm:$0xff]  }
0x1239   : > { %5221 = vmatpush1.bf16.msra.mxu0 %v8455_v17  ;;  %5262 = vmatpush1.bf16.msra.mxu1 %v8458_v31  ;;  %v8553_v17 = vld [vmem:[%s9478_s11 + $0x544] ss:$108 sps:$4 sm:$0xff]   ;;  %v8556_v31 = vld [vmem:[%s9478_s11 + $0x54c] ss:$108 sps:$4 sm:$0xff]  }
0x123a   : > { %5222 = vmatprep.subr.bf16.mxu0 %v8463_v42  ;;  %5263 = vmatprep.subr.bf16.mxu1 %v8466_v6  ;;  %v8551_v42 = vld [vmem:[%s9478_s11 + $0x540] ss:$108 sps:$4 sm:$0xff]   ;;  %v8554_v6 = vld [vmem:[%s9478_s11 + $0x548] ss:$108 sps:$4 sm:$0xff]  }
0x123d   : > { %5223 = vmatpush1.bf16.msra.mxu0 %v8461_v43  ;;  %5264 = vmatpush1.bf16.msra.mxu1 %v8464_v33  ;;  %v8559_v43 = vld [vmem:[%s9478_s11 + $0x61c] ss:$108 sps:$4 sm:$0xff]   ;;  %v8562_v33 = vld [vmem:[%s9478_s11 + $0x624] ss:$108 sps:$4 sm:$0xff]  }
0x123e   : > { %5290 = vmatprep.subr.bf16.mxu0 %v8469_v51  ;;  %5331 = vmatprep.subr.bf16.mxu1 %v8472_v35  ;;  %v8557_v51 = vld [vmem:[%s9478_s11 + $0x618] ss:$108 sps:$4 sm:$0xff]   ;;  %v8560_v35 = vld [vmem:[%s9478_s11 + $0x620] ss:$108 sps:$4 sm:$0xff]  }
0x1240   : > { %5241 = vmatmul.mubr.bf16.vlgmr.msra.gmra.mrb[4].mxu0 %v10407_v48  ;;  %5282 = vmatmul.mubr.bf16.vlgmr.msra.gmra.mrb[4].mxu1 %v10407_v48 }
0x1241   : > { %5291 = vmatpush1.bf16.msra.mxu0 %v8467_v60  ;;  %5332 = vmatpush1.bf16.msra.mxu1 %v8470_v5  ;;  %v8565_v60 = vld [vmem:[%s9478_s11 + $0x44] ss:$108 sps:$4 sm:$0xff]   ;;  %v8568_v5 = vld [vmem:[%s9478_s11 + $0x4c] ss:$108 sps:$4 sm:$0xff]  }
0x1242   : > { %5292 = vmatprep.subr.bf16.mxu0 %v8475_v49  ;;  %5333 = vmatprep.subr.bf16.mxu1 %v8478_v50  ;;  %v8563_v49 = vld [vmem:[%s9478_s11 + $0x40] ss:$108 sps:$4 sm:$0xff]   ;;  %v8566_v50 = vld [vmem:[%s9478_s11 + $0x48] ss:$108 sps:$4 sm:$0xff]  }
0x1243   : > { %5322 = vmatprep.mubr.bf16.mxu0 %v9079_v47  ;;  %5363 = vmatprep.mubr.bf16.mxu1 %v9079_v47 }
0x1245   : > { %5293 = vmatpush1.bf16.msra.mxu0 %v8473_v53  ;;  %5334 = vmatpush1.bf16.msra.mxu1 %v8476_v62  ;;  %v8571_v53 = vld [vmem:[%s9478_s11 + $0x11c] ss:$108 sps:$4 sm:$0xff]   ;;  %v8574_v62 = vld [vmem:[%s9478_s11 + $0x124] ss:$108 sps:$4 sm:$0xff]  }
0x1246   : > { %5294 = vmatprep.subr.bf16.mxu0 %v8481_v0  ;;  %5335 = vmatprep.subr.bf16.mxu1 %v8484_v2  ;;  %v8569_v0 = vld [vmem:[%s9478_s11 + $0x118] ss:$108 sps:$4 sm:$0xff]   ;;  %v8572_v2 = vld [vmem:[%s9478_s11 + $0x120] ss:$108 sps:$4 sm:$0xff]  }
0x1249   : > { %5295 = vmatpush1.bf16.msra.mxu0 %v8479_v24  ;;  %5336 = vmatpush1.bf16.msra.mxu1 %v8482_v27  ;;  %v8577_v24 = vld [vmem:[%s9478_s11 + $0x1f4] ss:$108 sps:$4 sm:$0xff]   ;;  %v8580_v27 = vld [vmem:[%s9478_s11 + $0x1fc] ss:$108 sps:$4 sm:$0xff]  }
0x124a   : > { %5296 = vmatprep.subr.bf16.mxu0 %v8487_v28  ;;  %5337 = vmatprep.subr.bf16.mxu1 %v8490_v23  ;;  %v8575_v28 = vld [vmem:[%s9478_s11 + $0x1f0] ss:$108 sps:$4 sm:$0xff]   ;;  %v8578_v23 = vld [vmem:[%s9478_s11 + $0x1f8] ss:$108 sps:$4 sm:$0xff]  }
0x124d   : > { %5297 = vmatpush1.bf16.msra.mxu0 %v8485_v7  ;;  %5338 = vmatpush1.bf16.msra.mxu1 %v8488_v34  ;;  %v8583_v7 = vld [vmem:[%s9478_s11 + $0x2cc] ss:$108 sps:$4 sm:$0xff]   ;;  %v8586_v34 = vld [vmem:[%s9478_s11 + $0x2d4] ss:$108 sps:$4 sm:$0xff]  }
0x124e   : > { %5298 = vmatprep.subr.bf16.mxu0 %v8493_v38  ;;  %5339 = vmatprep.subr.bf16.mxu1 %v8496_v56  ;;  %v8581_v38 = vld [vmem:[%s9478_s11 + $0x2c8] ss:$108 sps:$4 sm:$0xff]   ;;  %v8584_v56 = vld [vmem:[%s9478_s11 + $0x2d0] ss:$108 sps:$4 sm:$0xff]  }
0x1251   : > { %5299 = vmatpush1.bf16.msra.mxu0 %v8491_v61  ;;  %5340 = vmatpush1.bf16.msra.mxu1 %v8494_v41  ;;  %v8589_v61 = vld [vmem:[%s9478_s11 + $0x3a4] ss:$108 sps:$4 sm:$0xff]   ;;  %v8592_v41 = vld [vmem:[%s9478_s11 + $0x3ac] ss:$108 sps:$4 sm:$0xff]  }
0x1252   : > { %5300 = vmatprep.subr.bf16.mxu0 %v8499_v11  ;;  %5341 = vmatprep.subr.bf16.mxu1 %v8502_v15  ;;  %v8587_v11 = vld [vmem:[%s9478_s11 + $0x3a0] ss:$108 sps:$4 sm:$0xff]   ;;  %v8590_v15 = vld [vmem:[%s9478_s11 + $0x3a8] ss:$108 sps:$4 sm:$0xff]  }
0x1255   : > { %5301 = vmatpush1.bf16.msra.mxu0 %v8497_v18  ;;  %5342 = vmatpush1.bf16.msra.mxu1 %v8500_v40  ;;  %v8595_v18 = vld [vmem:[%s9478_s11 + $0x47c] ss:$108 sps:$4 sm:$0xff]   ;;  %v8598_v40 = vld [vmem:[%s9478_s11 + $0x484] ss:$108 sps:$4 sm:$0xff]  }
0x1256   : > { %5302 = vmatprep.subr.bf16.mxu0 %v8505_v46  ;;  %5343 = vmatprep.subr.bf16.mxu1 %v8508_v45  ;;  %v8593_v46 = vld [vmem:[%s9478_s11 + $0x478] ss:$108 sps:$4 sm:$0xff]   ;;  %v8596_v45 = vld [vmem:[%s9478_s11 + $0x480] ss:$108 sps:$4 sm:$0xff]  }
0x1259   : > { %5303 = vmatpush1.bf16.msra.mxu0 %v8503_v58  ;;  %5344 = vmatpush1.bf16.msra.mxu1 %v8506_v59  ;;  %v8601_v58 = vld [vmem:[%s9478_s11 + $0x554] ss:$108 sps:$4 sm:$0xff]   ;;  %v8604_v59 = vld [vmem:[%s9478_s11 + $0x55c] ss:$108 sps:$4 sm:$0xff]  }
0x125a   : > { %5304 = vmatprep.subr.bf16.mxu0 %v8511_v1  ;;  %5345 = vmatprep.subr.bf16.mxu1 %v8514_v39  ;;  %v8599_v1 = vld [vmem:[%s9478_s11 + $0x550] ss:$108 sps:$4 sm:$0xff]   ;;  %v8602_v39 = vld [vmem:[%s9478_s11 + $0x558] ss:$108 sps:$4 sm:$0xff]  }
0x125d   : > { %5305 = vmatpush1.bf16.msra.mxu0 %v8509_v44  ;;  %5346 = vmatpush1.bf16.msra.mxu1 %v8512_v8  ;;  %v8607_v44 = vld [vmem:[%s9478_s11 + $0x62c] ss:$108 sps:$4 sm:$0xff]   ;;  %v8610_v8 = vld [vmem:[%s9478_s11 + $0x634] ss:$108 sps:$4 sm:$0xff]  }
0x125e   : > { %5372 = vmatprep.subr.bf16.mxu0 %v8517_v55  ;;  %5413 = vmatprep.subr.bf16.mxu1 %v8520_v21  ;;  %v8605_v55 = vld [vmem:[%s9478_s11 + $0x628] ss:$108 sps:$4 sm:$0xff]   ;;  %v8608_v21 = vld [vmem:[%s9478_s11 + $0x630] ss:$108 sps:$4 sm:$0xff]  }
0x1260   : > { %5323 = vmatmul.mubr.bf16.vlgmr.msra.gmra.mrb[8].mxu0 %v10407_v48  ;;  %5364 = vmatmul.mubr.bf16.vlgmr.msra.gmra.mrb[8].mxu1 %v10407_v48 }
0x1261   : > { %5373 = vmatpush1.bf16.msra.mxu0 %v8515_v26  ;;  %5414 = vmatpush1.bf16.msra.mxu1 %v8518_v37  ;;  %v8613_v26 = vld [vmem:[%s9478_s11 + $0x54] ss:$108 sps:$4 sm:$0xff]   ;;  %v8616_v37 = vld [vmem:[%s9478_s11 + $0x5c] ss:$108 sps:$4 sm:$0xff]  }
0x1262   : > { %5374 = vmatprep.subr.bf16.mxu0 %v8523_v36  ;;  %5415 = vmatprep.subr.bf16.mxu1 %v8526_v4  ;;  %v8611_v36 = vld [vmem:[%s9478_s11 + $0x50] ss:$108 sps:$4 sm:$0xff]   ;;  %v8614_v4 = vld [vmem:[%s9478_s11 + $0x58] ss:$108 sps:$4 sm:$0xff]  }
0x1263   : > { %5404 = vmatprep.mubr.bf16.mxu0 %v9079_v47  ;;  %5445 = vmatprep.mubr.bf16.mxu1 %v9079_v47 }
0x1265   : > { %5375 = vmatpush1.bf16.msra.mxu0 %v8521_v20  ;;  %5416 = vmatpush1.bf16.msra.mxu1 %v8524_v54  ;;  %v8619_v20 = vld [vmem:[%s9478_s11 + $0x12c] ss:$108 sps:$4 sm:$0xff]   ;;  %v8622_v54 = vld [vmem:[%s9478_s11 + $0x134] ss:$108 sps:$4 sm:$0xff]  }
0x1266   : > { %5376 = vmatprep.subr.bf16.mxu0 %v8529_v57  ;;  %5417 = vmatprep.subr.bf16.mxu1 %v8532_v12  ;;  %v8617_v57 = vld [vmem:[%s9478_s11 + $0x128] ss:$108 sps:$4 sm:$0xff]   ;;  %v8620_v12 = vld [vmem:[%s9478_s11 + $0x130] ss:$108 sps:$4 sm:$0xff]  }
0x1269   : > { %5377 = vmatpush1.bf16.msra.mxu0 %v8527_v9  ;;  %5418 = vmatpush1.bf16.msra.mxu1 %v8530_v32  ;;  %v8625_v9 = vld [vmem:[%s9478_s11 + $0x204] ss:$108 sps:$4 sm:$0xff]   ;;  %v8628_v32 = vld [vmem:[%s9478_s11 + $0x20c] ss:$108 sps:$4 sm:$0xff]  }
0x126a   : > { %5378 = vmatprep.subr.bf16.mxu0 %v8535_v3  ;;  %5419 = vmatprep.subr.bf16.mxu1 %v8538_v63  ;;  %v8623_v3 = vld [vmem:[%s9478_s11 + $0x200] ss:$108 sps:$4 sm:$0xff]   ;;  %v8626_v63 = vld [vmem:[%s9478_s11 + $0x208] ss:$108 sps:$4 sm:$0xff]  }
0x126d   : > { %5379 = vmatpush1.bf16.msra.mxu0 %v8533_v10  ;;  %5420 = vmatpush1.bf16.msra.mxu1 %v8536_v19  ;;  %v8631_v10 = vld [vmem:[%s9478_s11 + $0x2dc] ss:$108 sps:$4 sm:$0xff]   ;;  %v8634_v19 = vld [vmem:[%s9478_s11 + $0x2e4] ss:$108 sps:$4 sm:$0xff]  }
0x126e   : > { %5380 = vmatprep.subr.bf16.mxu0 %v8541_v13  ;;  %5421 = vmatprep.subr.bf16.mxu1 %v8544_v30  ;;  %v8629_v13 = vld [vmem:[%s9478_s11 + $0x2d8] ss:$108 sps:$4 sm:$0xff]   ;;  %v8632_v30 = vld [vmem:[%s9478_s11 + $0x2e0] ss:$108 sps:$4 sm:$0xff]  }
0x1271   : > { %5381 = vmatpush1.bf16.msra.mxu0 %v8539_v14  ;;  %5422 = vmatpush1.bf16.msra.mxu1 %v8542_v25  ;;  %v8637_v14 = vld [vmem:[%s9478_s11 + $0x3b4] ss:$108 sps:$4 sm:$0xff]   ;;  %v8640_v25 = vld [vmem:[%s9478_s11 + $0x3bc] ss:$108 sps:$4 sm:$0xff]  }
0x1272   : > { %5382 = vmatprep.subr.bf16.mxu0 %v8547_v29  ;;  %5423 = vmatprep.subr.bf16.mxu1 %v8550_v22  ;;  %v8635_v29 = vld [vmem:[%s9478_s11 + $0x3b0] ss:$108 sps:$4 sm:$0xff]   ;;  %v8638_v22 = vld [vmem:[%s9478_s11 + $0x3b8] ss:$108 sps:$4 sm:$0xff]  }
0x1275   : > { %5383 = vmatpush1.bf16.msra.mxu0 %v8545_v52  ;;  %5424 = vmatpush1.bf16.msra.mxu1 %v8548_v16  ;;  %v8643_v52 = vld [vmem:[%s9478_s11 + $0x48c] ss:$108 sps:$4 sm:$0xff]   ;;  %v8646_v16 = vld [vmem:[%s9478_s11 + $0x494] ss:$108 sps:$4 sm:$0xff]  }
0x1276   : > { %5384 = vmatprep.subr.bf16.mxu0 %v8553_v17  ;;  %5425 = vmatprep.subr.bf16.mxu1 %v8556_v31  ;;  %v8641_v17 = vld [vmem:[%s9478_s11 + $0x488] ss:$108 sps:$4 sm:$0xff]   ;;  %v8644_v31 = vld [vmem:[%s9478_s11 + $0x490] ss:$108 sps:$4 sm:$0xff]  }
0x1279   : > { %5385 = vmatpush1.bf16.msra.mxu0 %v8551_v42  ;;  %5426 = vmatpush1.bf16.msra.mxu1 %v8554_v6  ;;  %v8649_v42 = vld [vmem:[%s9478_s11 + $0x564] ss:$108 sps:$4 sm:$0xff]   ;;  %v8652_v6 = vld [vmem:[%s9478_s11 + $0x56c] ss:$108 sps:$4 sm:$0xff]  }
0x127a   : > { %5386 = vmatprep.subr.bf16.mxu0 %v8559_v43  ;;  %5427 = vmatprep.subr.bf16.mxu1 %v8562_v33  ;;  %v8647_v43 = vld [vmem:[%s9478_s11 + $0x560] ss:$108 sps:$4 sm:$0xff]   ;;  %v8650_v33 = vld [vmem:[%s9478_s11 + $0x568] ss:$108 sps:$4 sm:$0xff]  }
0x127d   : > { %5387 = vmatpush1.bf16.msra.mxu0 %v8557_v51  ;;  %5428 = vmatpush1.bf16.msra.mxu1 %v8560_v35  ;;  %v8655_v51 = vld [vmem:[%s9478_s11 + $0x63c] ss:$108 sps:$4 sm:$0xff]   ;;  %v8658_v35 = vld [vmem:[%s9478_s11 + $0x644] ss:$108 sps:$4 sm:$0xff]  }
0x127e   : > { %5454 = vmatprep.subr.bf16.mxu0 %v8565_v60  ;;  %5495 = vmatprep.subr.bf16.mxu1 %v8568_v5  ;;  %v8653_v60 = vld [vmem:[%s9478_s11 + $0x638] ss:$108 sps:$4 sm:$0xff]   ;;  %v8656_v5 = vld [vmem:[%s9478_s11 + $0x640] ss:$108 sps:$4 sm:$0xff]  }
0x1280   : > { %5405 = vmatmul.mubr.bf16.vlgmr.msra.gmra.mrb[12].mxu0 %v10407_v48  ;;  %5446 = vmatmul.mubr.bf16.vlgmr.msra.gmra.mrb[12].mxu1 %v10407_v48 }
0x1281   : > { %5455 = vmatpush1.bf16.msra.mxu0 %v8563_v49  ;;  %5496 = vmatpush1.bf16.msra.mxu1 %v8566_v50  ;;  %v8661_v49 = vld [vmem:[%s9478_s11 + $0x64] ss:$108 sps:$4 sm:$0xff]   ;;  %v8659_v50 = vld [vmem:[%s9478_s11 + $0x60] ss:$108 sps:$4 sm:$0xff]  }
0x1282   : > { %5456 = vmatprep.subr.bf16.mxu0 %v8571_v53  ;;  %5497 = vmatprep.subr.bf16.mxu1 %v8574_v62  ;;  %v8662_v53 = vld [vmem:[%s9478_s11 + $0x68] ss:$108 sps:$4 sm:$0xff]   ;;  %v9080_v62 = vmov 0.0  }
0x1283   : > { %5486 = vmatprep.mubr.bf16.mxu0 %v9079_v47  ;;  %5527 = vmatprep.mubr.bf16.mxu1 %v9079_v47 }
0x1285   : > { %5457 = vmatpush1.bf16.msra.mxu0 %v8569_v0  ;;  %5498 = vmatpush1.bf16.msra.mxu1 %v8572_v2  ;;  %v8665_v0 = vld [vmem:[%s9478_s11 + $0x13c] ss:$108 sps:$4 sm:$0xff]   ;;  %v8663_v2 = vld [vmem:[%s9478_s11 + $0x138] ss:$108 sps:$4 sm:$0xff]  }
0x1286   : > { %5458 = vmatprep.subr.bf16.mxu0 %v8577_v24  ;;  %5499 = vmatprep.subr.bf16.mxu1 %v8580_v27  ;;  %v8666_v24 = vld [vmem:[%s9478_s11 + $0x140] ss:$108 sps:$4 sm:$0xff]  }
0x1287   : > { %v8669_v27 = vld [vmem:[%s9478_s11 + $0x214] ss:$108 sps:$4 sm:$0xff]  }
0x1289   : > { %5459 = vmatpush1.bf16.msra.mxu0 %v8575_v28  ;;  %5500 = vmatpush1.bf16.msra.mxu1 %v8578_v23  ;;  %v8667_v28 = vld [vmem:[%s9478_s11 + $0x210] ss:$108 sps:$4 sm:$0xff]   ;;  %v8670_v23 = vld [vmem:[%s9478_s11 + $0x218] ss:$108 sps:$4 sm:$0xff]  }
0x128a   : > { %5460 = vmatprep.subr.bf16.mxu0 %v8583_v7  ;;  %5501 = vmatprep.subr.bf16.mxu1 %v8586_v34  ;;  %v8673_v7 = vld [vmem:[%s9478_s11 + $0x2ec] ss:$108 sps:$4 sm:$0xff]   ;;  %v8671_v34 = vld [vmem:[%s9478_s11 + $0x2e8] ss:$108 sps:$4 sm:$0xff]  }
0x128d   : > { %5461 = vmatpush1.bf16.msra.mxu0 %v8581_v38  ;;  %5502 = vmatpush1.bf16.msra.mxu1 %v8584_v56  ;;  %v8674_v38 = vld [vmem:[%s9478_s11 + $0x2f0] ss:$108 sps:$4 sm:$0xff]   ;;  %v8675_v56 = vld [vmem:[%s9478_s11 + $0x3c0] ss:$108 sps:$4 sm:$0xff]  }
0x128e   : > { %5462 = vmatprep.subr.bf16.mxu0 %v8589_v61  ;;  %5503 = vmatprep.subr.bf16.mxu1 %v8592_v41  ;;  %v8678_v61 = vld [vmem:[%s9478_s11 + $0x3c8] ss:$108 sps:$4 sm:$0xff]  }
0x128f   : > { %v8681_v41 = vld [vmem:[%s9478_s11 + $0x49c] ss:$108 sps:$4 sm:$0xff]  }
0x1291   : > { %5463 = vmatpush1.bf16.msra.mxu0 %v8587_v11  ;;  %5504 = vmatpush1.bf16.msra.mxu1 %v8590_v15  ;;  %v8679_v11 = vld [vmem:[%s9478_s11 + $0x498] ss:$108 sps:$4 sm:$0xff]   ;;  %v8682_v15 = vld [vmem:[%s9478_s11 + $0x4a0] ss:$108 sps:$4 sm:$0xff]  }
0x1292   : > { %5464 = vmatprep.subr.bf16.mxu0 %v8595_v18  ;;  %5505 = vmatprep.subr.bf16.mxu1 %v8598_v40  ;;  %v8685_v18 = vld [vmem:[%s9478_s11 + $0x574] ss:$108 sps:$4 sm:$0xff]   ;;  %v8683_v40 = vld [vmem:[%s9478_s11 + $0x570] ss:$108 sps:$4 sm:$0xff]  }
0x1295   : > { %5465 = vmatpush1.bf16.msra.mxu0 %v8593_v46  ;;  %5506 = vmatpush1.bf16.msra.mxu1 %v8596_v45  ;;  %v8686_v46 = vld [vmem:[%s9478_s11 + $0x578] ss:$108 sps:$4 sm:$0xff]  }
0x1296   : > { %5466 = vmatprep.subr.bf16.mxu0 %v8601_v58  ;;  %5507 = vmatprep.subr.bf16.mxu1 %v8604_v59  ;;  %v8689_v45 = vld [vmem:[%s9478_s11 + $0x64c] ss:$108 sps:$4 sm:$0xff]   ;;  %v8687_v58 = vld [vmem:[%s9478_s11 + $0x648] ss:$108 sps:$4 sm:$0xff]   ;;  %v8690_v59 = vld [vmem:[%s9478_s11 + $0x650] ss:$108 sps:$4 sm:$0xff]  }
0x1299   : > { %5467 = vmatpush1.bf16.msra.mxu0 %v8599_v1  ;;  %5508 = vmatpush1.bf16.msra.mxu1 %v8602_v39 }
0x129a   : > { %5468 = vmatprep.subr.bf16.mxu0 %v8607_v44  ;;  %5509 = vmatprep.subr.bf16.mxu1 %v8610_v8 }
0x129d   : > { %5469 = vmatpush1.bf16.msra.mxu0 %v8605_v55  ;;  %5510 = vmatpush1.bf16.msra.mxu1 %v8608_v21 }
0x129e   : > { %5536 = vmatprep.subr.bf16.mxu0 %v8613_v26  ;;  %5577 = vmatprep.subr.bf16.mxu1 %v8616_v37 }
0x12a0   : > { %5487 = vmatmul.mubr.bf16.vlgmr.msra.gmra.mrb[16].mxu0 %v10407_v48  ;;  %5528 = vmatmul.mubr.bf16.vlgmr.msra.gmra.mrb[16].mxu1 %v10407_v48 }
0x12a1   : > { %5537 = vmatpush1.bf16.msra.mxu0 %v8611_v36  ;;  %5578 = vmatpush1.bf16.msra.mxu1 %v8614_v4 }
0x12a2   : > { %5538 = vmatprep.subr.bf16.mxu0 %v8619_v20  ;;  %5579 = vmatprep.subr.bf16.mxu1 %v8622_v54 }
0x12a3   : > { %5568 = vmatprep.mubr.bf16.mxu0 %v9079_v47  ;;  %5609 = vmatprep.mubr.bf16.mxu1 %v9079_v47 }
0x12a5   : > { %5539 = vmatpush1.bf16.msra.mxu0 %v8617_v57  ;;  %5580 = vmatpush1.bf16.msra.mxu1 %v8620_v12 }
0x12a6   : > { %5540 = vmatprep.subr.bf16.mxu0 %v8625_v9  ;;  %5581 = vmatprep.subr.bf16.mxu1 %v8628_v32 }
0x12a9   : > { %5541 = vmatpush1.bf16.msra.mxu0 %v8623_v3  ;;  %5582 = vmatpush1.bf16.msra.mxu1 %v8626_v63 }
0x12aa   : > { %5542 = vmatprep.subr.bf16.mxu0 %v8631_v10  ;;  %5583 = vmatprep.subr.bf16.mxu1 %v8634_v19 }
0x12ad   : > { %5543 = vmatpush1.bf16.msra.mxu0 %v8629_v13  ;;  %5584 = vmatpush1.bf16.msra.mxu1 %v8632_v30 }
0x12ae   : > { %5544 = vmatprep.subr.bf16.mxu0 %v8637_v14  ;;  %5585 = vmatprep.subr.bf16.mxu1 %v8640_v25 }
0x12b1   : > { %5545 = vmatpush1.bf16.msra.mxu0 %v8635_v29  ;;  %5586 = vmatpush1.bf16.msra.mxu1 %v8638_v22 }
0x12b2   : > { %5546 = vmatprep.subr.bf16.mxu0 %v8643_v52  ;;  %5587 = vmatprep.subr.bf16.mxu1 %v8646_v16 }
0x12b5   : > { %5547 = vmatpush1.bf16.msra.mxu0 %v8641_v17  ;;  %5588 = vmatpush1.bf16.msra.mxu1 %v8644_v31 }
0x12b6   : > { %5548 = vmatprep.subr.bf16.mxu0 %v8649_v42  ;;  %5589 = vmatprep.subr.bf16.mxu1 %v8652_v6 }
0x12b9   : > { %5549 = vmatpush1.bf16.msra.mxu0 %v8647_v43  ;;  %5590 = vmatpush1.bf16.msra.mxu1 %v8650_v33 }
0x12ba   : > { %5550 = vmatprep.subr.bf16.mxu0 %v8655_v51  ;;  %5591 = vmatprep.subr.bf16.mxu1 %v8658_v35 }
0x12bd   : > { %5551 = vmatpush1.bf16.msra.mxu0 %v8653_v60  ;;  %5592 = vmatpush1.bf16.msra.mxu1 %v8656_v5 }
0x12be   : > { %5618 = vmatprep.subr.bf16.mxu0 %v8661_v49  ;;  %7081 = vmatprep.subr.bf16.mxu1 %v9080_v62 }
0x12c0   : > { %5569 = vmatmul.mubr.bf16.vlgmr.msra.gmra.mrb[20].mxu0 %v10407_v48  ;;  %5610 = vmatmul.mubr.bf16.vlgmr.msra.gmra.mrb[20].mxu1 %v10407_v48 }
0x12c1   : > { %5619 = vmatpush1.bf16.msra.mxu0 %v8659_v50  ;;  %7082 = vmatpush3.bf16.msra.mxu1 %v8662_v53 }
0x12c2   : > { %5620 = vmatprep.subr.bf16.mxu0 %v8665_v0  ;;  %7083 = vmatprep.subr.bf16.mxu1 %v9080_v62 }
0x12c3   : > { %5650 = vmatprep.mubr.bf16.mxu0 %v9079_v47  ;;  %7097 = vmatprep.mubr.msk.bf16.mxu1 %vm9081_vm2, %v9080_v62  ;;  %v8677_v47 = vld [vmem:[%s9478_s11 + $0x3c4] ss:$108 sps:$4 sm:$0xff]  }
0x12c5   : > { %5621 = vmatpush1.bf16.msra.mxu0 %v8663_v2  ;;  %7084 = vmatpush3.bf16.msra.mxu1 %v8666_v24 }
0x12c6   : > { %5622 = vmatprep.subr.bf16.mxu0 %v8669_v27  ;;  %7085 = vmatprep.subr.bf16.mxu1 %v9080_v62 }
0x12c9   : > { %5623 = vmatpush1.bf16.msra.mxu0 %v8667_v28  ;;  %7086 = vmatpush3.bf16.msra.mxu1 %v8670_v23 }
0x12ca   : > { %5624 = vmatprep.subr.bf16.mxu0 %v8673_v7  ;;  %7087 = vmatprep.subr.bf16.mxu1 %v9080_v62 }
0x12cd   : > { %5625 = vmatpush1.bf16.msra.mxu0 %v8671_v34  ;;  %7088 = vmatpush3.bf16.msra.mxu1 %v8674_v38 }
0x12ce   : > { %5626 = vmatprep.subr.bf16.mxu0 %v8677_v47  ;;  %7089 = vmatprep.subr.bf16.mxu1 %v9080_v62 }
0x12d1   : > { %5627 = vmatpush1.bf16.msra.mxu0 %v8675_v56  ;;  %7090 = vmatpush3.bf16.msra.mxu1 %v8678_v61 }
0x12d2   : > { %5628 = vmatprep.subr.bf16.mxu0 %v8681_v41  ;;  %7091 = vmatprep.subr.bf16.mxu1 %v9080_v62 }
0x12d5   : > { %5629 = vmatpush1.bf16.msra.mxu0 %v8679_v11  ;;  %7092 = vmatpush3.bf16.msra.mxu1 %v8682_v15 }
0x12d6   : > { %5630 = vmatprep.subr.bf16.mxu0 %v8685_v18  ;;  %7093 = vmatprep.subr.bf16.mxu1 %v9080_v62 }
0x12d9   : > { %5631 = vmatpush1.bf16.msra.mxu0 %v8683_v40  ;;  %7094 = vmatpush3.bf16.msra.mxu1 %v8686_v46 }
0x12da   : > { %5632 = vmatprep.subr.bf16.mxu0 %v8689_v45  ;;  %7095 = vmatprep.subr.bf16.mxu1 %v9080_v62 }
0x12dd   : > { %5633 = vmatpush1.bf16.msra.mxu0 %v8687_v58  ;;  %7096 = vmatpush3.bf16.msra.mxu1 %v8690_v59 }
0x12e0   : > { %5651 = vmatmul.mubr.bf16.vlgmr.msra.gmra.mrb[24].mxu0 %v10407_v48  ;;  %7098 = vmatmul.mubr.bf16.vlgmr.msra.gmra.mrb[24].mxu1 %v10407_v48 }
0x12f3   : > { %v5160_v1 = vpop.f32.mrb[0].mxu0  ;;  %v5201_v39 = vpop.f32.mrb[0].mxu1 }
0x12f4   : > { %5699 = vst [vmem:[%s9485_s18] sm:$0xff] %v5160_v1  ;;  %5701 = vst [vmem:[%s9485_s18 + $0x10] sm:$0xff] %v5201_v39  ;;  %v5162_v44 = vpop.f32.mrb[1].mxu0  ;;  %v5203_v8 = vpop.f32.mrb[1].mxu1 }
0x12f5   : > { %5700 = vst [vmem:[%s9485_s18 + $0x8] sm:$0xff] %v5162_v44  ;;  %5702 = vst [vmem:[%s9485_s18 + $0x18] sm:$0xff] %v5203_v8  ;;  %v5164_v55 = vpop.f32.mrb[2].mxu0  ;;  %v5205_v21 = vpop.f32.mrb[2].mxu1 }
0x12f6   : > { %v5165_v26 = vpop.f32.mrb[3].mxu0  ;;  %v5206_v37 = vpop.f32.mrb[3].mxu1 }
0x1313   : > { %v5242_v36 = vpop.f32.mrb[4].mxu0  ;;  %v5283_v4 = vpop.f32.mrb[4].mxu1 }
0x1314   : > { %5703 = vst [vmem:[%s9485_s18 + $0x20] sm:$0xff] %v5242_v36  ;;  %5705 = vst [vmem:[%s9485_s18 + $0x30] sm:$0xff] %v5283_v4  ;;  %v5244_v48 = vpop.f32.mrb[5].mxu0  ;;  %v5285_v20 = vpop.f32.mrb[5].mxu1 }
0x1315   : > { %5704 = vst [vmem:[%s9485_s18 + $0x28] sm:$0xff] %v5244_v48  ;;  %5706 = vst [vmem:[%s9485_s18 + $0x38] sm:$0xff] %v5285_v20  ;;  %v5246_v54 = vpop.f32.mrb[6].mxu0  ;;  %v5287_v57 = vpop.f32.mrb[6].mxu1 }
0x1316   : > { %v5247_v12 = vpop.f32.mrb[7].mxu0  ;;  %v5288_v9 = vpop.f32.mrb[7].mxu1 }
0x1333   : > { %v5324_v32 = vpop.f32.mrb[8].mxu0  ;;  %v5365_v3 = vpop.f32.mrb[8].mxu1 }
0x1334   : > { %5707 = vst [vmem:[%s9485_s18 + $0x40] sm:$0xff] %v5324_v32  ;;  %5709 = vst [vmem:[%s9485_s18 + $0x50] sm:$0xff] %v5365_v3  ;;  %v5326_v63 = vpop.f32.mrb[9].mxu0  ;;  %v5367_v10 = vpop.f32.mrb[9].mxu1 }
0x1335   : > { %5708 = vst [vmem:[%s9485_s18 + $0x48] sm:$0xff] %v5326_v63  ;;  %5710 = vst [vmem:[%s9485_s18 + $0x58] sm:$0xff] %v5367_v10  ;;  %v5328_v19 = vpop.f32.mrb[10].mxu0  ;;  %v5369_v13 = vpop.f32.mrb[10].mxu1 }
0x1336   : > { %v5329_v30 = vpop.f32.mrb[11].mxu0  ;;  %v5370_v14 = vpop.f32.mrb[11].mxu1 }
0x1353   : > { %v5406_v25 = vpop.f32.mrb[12].mxu0  ;;  %v5447_v29 = vpop.f32.mrb[12].mxu1 }
0x1354   : > { %5711 = vst [vmem:[%s9485_s18 + $0x60] sm:$0xff] %v5406_v25  ;;  %5713 = vst [vmem:[%s9485_s18 + $0x70] sm:$0xff] %v5447_v29  ;;  %v5408_v22 = vpop.f32.mrb[13].mxu0  ;;  %v5449_v52 = vpop.f32.mrb[13].mxu1 }
0x1355   : > { %5712 = vst [vmem:[%s9485_s18 + $0x68] sm:$0xff] %v5408_v22  ;;  %5714 = vst [vmem:[%s9485_s18 + $0x78] sm:$0xff] %v5449_v52  ;;  %v5410_v16 = vpop.f32.mrb[14].mxu0  ;;  %v5451_v17 = vpop.f32.mrb[14].mxu1 }
0x1356   : > { %v5411_v31 = vpop.f32.mrb[15].mxu0  ;;  %v5452_v42 = vpop.f32.mrb[15].mxu1 }
0x1373   : > { %v5488_v6 = vpop.f32.mrb[16].mxu0  ;;  %v5529_v43 = vpop.f32.mrb[16].mxu1 }
0x1374   : > { %5715 = vst [vmem:[%s9485_s18 + $0x80] sm:$0xff] %v5488_v6  ;;  %5717 = vst [vmem:[%s9485_s18 + $0x90] sm:$0xff] %v5529_v43  ;;  %v5490_v33 = vpop.f32.mrb[17].mxu0  ;;  %v5531_v51 = vpop.f32.mrb[17].mxu1 }
0x1375   : > { %5716 = vst [vmem:[%s9485_s18 + $0x88] sm:$0xff] %v5490_v33  ;;  %5718 = vst [vmem:[%s9485_s18 + $0x98] sm:$0xff] %v5531_v51  ;;  %v5492_v35 = vpop.f32.mrb[18].mxu0  ;;  %v5533_v60 = vpop.f32.mrb[18].mxu1 }
0x1376   : > { %v5493_v5 = vpop.f32.mrb[19].mxu0  ;;  %v5534_v49 = vpop.f32.mrb[19].mxu1 }
0x1393   : > { %v5570_v50 = vpop.f32.mrb[20].mxu0  ;;  %v5611_v53 = vpop.f32.mrb[20].mxu1 }
0x1394   : > { %5719 = vst [vmem:[%s9485_s18 + $0xa0] sm:$0xff] %v5570_v50  ;;  %5721 = vst [vmem:[%s9485_s18 + $0xb0] sm:$0xff] %v5611_v53  ;;  %v5572_v62 = vpop.f32.mrb[21].mxu0  ;;  %v5613_v0 = vpop.f32.mrb[21].mxu1 }
0x1395   : > { %5720 = vst [vmem:[%s9485_s18 + $0xa8] sm:$0xff] %v5572_v62  ;;  %5722 = vst [vmem:[%s9485_s18 + $0xb8] sm:$0xff] %v5613_v0  ;;  %v5574_v2 = vpop.f32.mrb[22].mxu0  ;;  %v5615_v24 = vpop.f32.mrb[22].mxu1 }
0x1396   : > { %v5575_v27 = vpop.f32.mrb[23].mxu0  ;;  %v5616_v28 = vpop.f32.mrb[23].mxu1 }
0x13b3   : > { %v5652_v23 = vpop.f32.mrb[24].mxu0  ;;  %v5693_v7 = vpop.f32.mrb[24].mxu1 }
0x13b4   : > { %5723 = vst [vmem:[%s9485_s18 + $0xc0] sm:$0xff] %v5652_v23  ;;  %5725 = vst [vmem:[%s9485_s18 + $0xd0] sm:$0xff] %v5693_v7  ;;  %v5654_v34 = vpop.f32.mrb[25].mxu0  ;;  %v7099_v38 = vpop.f32.mrb[25].mxu1 }
0x13b5   : > { %5724 = vst [vmem:[%s9485_s18 + $0xc8] sm:$0xff] %v5654_v34  ;;  %v5656_v47 = vpop.f32.mrb[26].mxu0  ;;  %v5696_v56 = vpop.f32.mrb[26].mxu1 }
0x13b6   : > { %v5657_v61 = vpop.f32.mrb[27].mxu0  ;;  %v7100_v41 = vpop.f32.mrb[27].mxu1 }
0x13b7   : > { %8986 = shalt.err (!%p8983_p9)
}
0x13b8   : > { %s8987_s25 = scalar_lea.hbm %s10645_s10, 3456  ;;  %s8991_s18 = scalar_lea.hbm %s10734_s12, 20736 }
0x13b9   : > { %p8988_p11 = scmp.ne.s32.totalorder %s10645_s10, %s8987_s25  ;;  %p8992_p13 = scmp.lt.u32.totalorder %s10645_s10, %s10734_s12 }
0x13ba   : > { %p8993_p1 = scmp.lt.u32.totalorder %s8991_s18, %s8987_s25  ;;  %p8995_p7 = scmp.lt.u32.totalorder %s8987_s25, %s10645_s10 }
0x13bb   : > { %p8989_p3 = pnand %p8988_p11, %p10735_p2 }
0x13bc   : > { %p8994_p4 = por %p8993_p1, %p8992_p13 }
0x13bd   : > { %p8990_p12 = pneg %p8989_p3 }
0x13be   : > { %p8996_p8 = por %p8995_p7, %p8994_p4 }
0x13c0   : > { %p8997_p0 = pnand %p8996_p8, %p8990_p12 }
0x13c2   : > { %9000 = shalt.err (!%p8997_p0)
}
0x13c3   : > { %8101 = dma.vmem_to_hbm [thread:$0]  (%p10735_p2), %s10647_s27, 3456, %s10645_s10, %s5727_s19  }
0x13c4 PF: > { %p8158_p5 = scmp.ge.s32.totalorder %s9059_s16, 2  ;;  %s5753_s0 = sand.u32 1, %s9047_s13  }
0x13c5   : > { %p10736_p6 = scmp.ne.s32.totalorder %s10719_s22, 0  ;;  %s5754_s28 = scalar_lea.sflag [#allocation5], %s5753_s0 }
0x13c7   : > { %p8136_p10 = pnand %p8158_p5, %p10736_p6 }
0x13c9   : > { %9042 = dma.done.wait (!%p8136_p10), %s5754_s28, 3456  }
0x13ca   : > { %9044 = vsyncadd (!%p8136_p10), %s5754_s28, 4294963840  ;;  %p28_p9 = scmp.ge.s32.totalorder %s9381_s23, 8   ;;  %s10737_s13 = smov %s9051_s14 }
0x13cb   : > { %s10738_s14 = smov %s9055_s15  ;;  %s10739_s15 = smov %s9393_s20 }
0x13cc   : > { %s10740_s16 = smov %s9381_s23  ;;  %30 = sbr.rel (!%p28_p9) target bundleno = 14 (0xe), region = 146 }
0x13d3   :  { %5759 = vsyncpa [#allocation4], 1 }
0x13d4   :  { %5761 = vsyncpa [#allocation4 + $0x1], 1 }
0x13d5   :  { %5762 = vsyncpa [#allocation7], 1 }
0x13d6   :  { %5763 = vsyncpa [#allocation10], 1 }
0x13d7   :  { %5764 = vsyncpa [#allocation13], 1 }
0x13d8   :  { %5765 = vsyncpa [#allocation16], 1 }
0x13d9   :  { %5766 = vsyncpa [#allocation19], 1 }
0x13da   :  { %5768 = vsyncpa [#allocation19 + $0x1], 1 }
0x13db   :  { %5769 = vsyncpa [#allocation5], 1 }
0x13dc   :  { %5771 = vsyncpa [#allocation5 + $0x1], 1 }

</bundles_post_ra>
